<compile_context>
chip_gen: v6e
topology: v6e:2x2x1
jax: 0.10.0
libtpu: 0.0.40
codegen_flags: <defaults>
</compile_context>

<pallas_src>
import math

import jax
import jax.numpy as jnp
from jax.experimental import pallas as pl
from jax.experimental.pallas import tpu as pltpu

# ----------------------------- small config ---------------------------------
B_SZ = 2          # batch
C_IN = 3          # image channels
IMG = 16          # image H = W
PATCH = 8         # patch size
GRID = IMG // PATCH
N_PATCH = GRID * GRID
SEQ = N_PATCH + 1  # +1 cls token
D = 32            # transformer width
N_HEAD = 4
HEAD_D = D // N_HEAD
MLP_D = 4 * D
N_LAYERS = 2      # number of LoRA resblocks
RANK = 4          # LoRA rank r
OUT_DIM = 768     # num_classes must be 768 for OpenCLIP proj
EPS = 1e-5        # PyTorch LayerNorm default eps
CPP = C_IN * PATCH * PATCH
# TODO(synk): LoRA merge uses scaling lora_alpha / r == 1.0; set this to the
# module's alpha/r if alpha != r.
LORA_SCALE = 1.0

# --------------- packed constant-slab layout ([SLAB_ROWS, 128] f32) ----------
ROW_CONV = 0                    # conv1 weight [CPP, D], lanes [0, D)
ROW_POS = CPP                   # (cls + positional) embedding [SEQ, D]
ROW_LN = ROW_POS + 8            # ln_pre_g / ln_pre_b / ln_post_g / ln_post_b rows
HDR_ROWS = ROW_LN + 8
OFF_WQ, OFF_WK, OFF_WV, OFF_WO = 0, D, 2 * D, 3 * D   # [D, D] each, [in, out] layout
OFF_WFC1 = 4 * D                # [D, MLP_D]
OFF_WFC2 = 5 * D                # [MLP_D, D]
OFF_VEC = 5 * D + MLP_D         # [16, 128] per-layer bias / LN vector block
LAYER_ROWS = OFF_VEC + 16
SLAB_ROWS = HDR_ROWS + N_LAYERS * LAYER_ROWS
# per-layer vector rows (relative to OFF_VEC)
V_LN1G, V_LN1B, V_BQ, V_BK, V_BV, V_BO, V_LN2G, V_LN2B, V_BFC1, V_BFC2 = range(10)


# ------------------------------ fused kernel ---------------------------------
def _fused_vit_kernel(patches_ref, slab_ref, proj_ref, o_ref):
    f32 = jnp.float32

    def _ln(v, g, b):
        mu = jnp.mean(v, axis=-1, keepdims=True)
        var = jnp.mean(jnp.square(v - mu), axis=-1, keepdims=True)
        return (v - mu) * jax.lax.rsqrt(var + EPS) * g + b

    def _mm(a, b):
        return jnp.dot(a, b, preferred_element_type=f32)

    def _gelu(u):
        # Exact (erf) GELU, matching nn.GELU's default. erf via Abramowitz-Stegun
        # 7.1.26 (|err| < 1.5e-7) so only exp / mul / add / where are needed.
        z = u * 0.7071067811865476
        az = jnp.abs(z)
        t = 1.0 / (1.0 + 0.3275911 * az)
        poly = t * (0.254829592 + t * (-0.284496736 + t * (1.421413741
               + t * (-1.453152027 + t * 1.061405429))))
        erf_abs = 1.0 - poly * jnp.exp(-az * az)
        erf_z = jnp.where(z < 0.0, -erf_abs, erf_abs)
        return 0.5 * u * (1.0 + erf_z)

    # --- patch embed + (cls + pos) + ln_pre -----------------------------------
    patches = patches_ref[0]                                     # [SEQ, CPP]
    conv_w = slab_ref[ROW_CONV:ROW_CONV + CPP, 0:D]              # [CPP, D]
    pos = slab_ref[ROW_POS:ROW_POS + SEQ, 0:D]                   # [SEQ, D] (cls folded in)
    x = _mm(patches, conv_w) + pos                               # [SEQ, D]
    x = _ln(x, slab_ref[ROW_LN:ROW_LN + 1, 0:D],
            slab_ref[ROW_LN + 1:ROW_LN + 2, 0:D])                # ln_pre

    # --- transformer blocks (static unroll; N_LAYERS is small) ----------------
    for l in range(N_LAYERS):
        base = HDR_ROWS + l * LAYER_ROWS
        vb = base + OFF_VEC

        h = _ln(x, slab_ref[vb + V_LN1G:vb + V_LN1G + 1, 0:D],
                slab_ref[vb + V_LN1B:vb + V_LN1B + 1, 0:D])      # [SEQ, D]

        # per-head attention: only 2-D matmuls, no stacks / concats / transposes.
        attn = None
        for hd in range(N_HEAD):
            c0, c1 = hd * HEAD_D, (hd + 1) * HEAD_D
            # q pre-scaled by 1/sqrt(HEAD_D), LoRA pre-merged (wrapper).
            q_h = _mm(h, slab_ref[base + OFF_WQ:base + OFF_WQ + D, c0:c1]) \
                  + slab_ref[vb + V_BQ:vb + V_BQ + 1, c0:c1]     # [SEQ, HEAD_D]
            k_h = _mm(h, slab_ref[base + OFF_WK:base + OFF_WK + D, c0:c1]) \
                  + slab_ref[vb + V_BK:vb + V_BK + 1, c0:c1]
            v_h = _mm(h, slab_ref[base + OFF_WV:base + OFF_WV + D, c0:c1]) \
                  + slab_ref[vb + V_BV:vb + V_BV + 1, c0:c1]
            # scores: contract head_dim of both operands (no materialized k^T).
            s = jax.lax.dot_general(q_h, k_h, (((1,), (1,)), ((), ())),
                                    preferred_element_type=f32)  # [SEQ, SEQ]
            s = s - jnp.max(s, axis=-1, keepdims=True)
            p = jnp.exp(s)
            p = p / jnp.sum(p, axis=-1, keepdims=True)           # exact softmax
            o_h = _mm(p, v_h)                                    # [SEQ, HEAD_D]
            # fold this head's rows of out_proj straight into the accumulator
            contrib = _mm(o_h, slab_ref[base + OFF_WO + hd * HEAD_D:
                                        base + OFF_WO + (hd + 1) * HEAD_D, 0:D])
            attn = contrib if attn is None else attn + contrib
        x = x + attn + slab_ref[vb + V_BO:vb + V_BO + 1, 0:D]    # residual (ls_1 = Id)

        h2 = _ln(x, slab_ref[vb + V_LN2G:vb + V_LN2G + 1, 0:D],
                 slab_ref[vb + V_LN2B:vb + V_LN2B + 1, 0:D])
        m = _gelu(_mm(h2, slab_ref[base + OFF_WFC1:base + OFF_WFC1 + D, 0:MLP_D])
                  + slab_ref[vb + V_BFC1:vb + V_BFC1 + 1, 0:MLP_D])
        x = x + _mm(m, slab_ref[base + OFF_WFC2:base + OFF_WFC2 + MLP_D, 0:D]) \
              + slab_ref[vb + V_BFC2:vb + V_BFC2 + 1, 0:D]       # residual (ls_2 = Id)

    # --- head: ln_post on CLS token, then projection ---------------------------
    cls_tok = _ln(x[0:1, :], slab_ref[ROW_LN + 2:ROW_LN + 3, 0:D],
                  slab_ref[ROW_LN + 3:ROW_LN + 4, 0:D])          # [1, D]
    o_ref[0] = _mm(cls_tok, proj_ref[...])                       # [1, OUT_DIM]


# ------------------------------ wrapper ---------------------------------------
def lora_vit_openclip_forward(x, params):
    """x: NCHW [B, C, IMG, IMG] float32 -> [B, OUT_DIM] float32."""
    bsz = x.shape[0]
    f32 = jnp.float32

    # ---- layout plumbing / weight prep in XLA (one-time work, not in-kernel) ----
    # patchify NCHW -> [B, N_PATCH, C*P*P]  (equivalent to the strided conv)
    xp = x.reshape(bsz, C_IN, GRID, PATCH, GRID, PATCH)
    xp = xp.transpose(0, 2, 4, 1, 3, 5).reshape(bsz, N_PATCH, CPP)
    # zero row per batch at the CLS position -> [B, SEQ, CPP]
    patches = jnp.concatenate([jnp.zeros((bsz, 1, CPP), f32), xp], axis=1)

    conv_w_t = params["conv_w"].reshape(D, CPP).T                       # [CPP, D]
    pos_cls = params["pos_emb"].at[0].add(params["class_emb"])          # [SEQ, D]
    ln_io = jnp.concatenate([params["ln_pre_g"], params["ln_pre_b"],
                             params["ln_post_g"], params["ln_post_b"]], axis=0)  # [4, D]

    scale = 1.0 / math.sqrt(HEAD_D)

    def pad_block(a, rows):
        a = a.astype(f32)
        r, c = a.shape
        return jnp.pad(a, ((0, rows - r), (0, 128 - c)))

    def row(v):
        v = v.astype(f32).reshape(1, -1)
        return jnp.pad(v, ((0, 0), (0, 128 - v.shape[1])))

    slab_parts = [pad_block(conv_w_t, CPP),          # rows [0, CPP)
                  pad_block(pos_cls, 8),             # rows [CPP, CPP+8)
                  pad_block(ln_io, 8)]               # rows [CPP+8, CPP+16)

    for blk in params["blocks"]:
        (ln1_g, ln1_b, w_in, b_in, a_q, b_q, a_k, b_k, a_v, b_v,
         w_out, b_out, ln2_g, ln2_b, w_fc1, b_fc1, w_fc2, b_fc2) = blk

        # merge LoRA deltas into q/k/v, pre-transpose to [in, out], fold 1/sqrt(d) into q
        wq_eff = (w_in[0 * D:1 * D] + LORA_SCALE * (b_q @ a_q)).T * scale   # [D, D]
        wk_eff = (w_in[1 * D:2 * D] + LORA_SCALE * (b_k @ a_k)).T           # [D, D]
        wv_eff = (w_in[2 * D:3 * D] + LORA_SCALE * (b_v @ a_v)).T           # [D, D]
        bq_eff = b_in[:, 0 * D:1 * D] * scale
        bk_eff = b_in[:, 1 * D:2 * D]
        bv_eff = b_in[:, 2 * D:3 * D]

        vec = jnp.concatenate([
            row(ln1_g), row(ln1_b), row(bq_eff), row(bk_eff), row(bv_eff),
            row(b_out), row(ln2_g), row(ln2_b), row(b_fc1), row(b_fc2),
            jnp.zeros((6, 128), f32)], axis=0)                              # [16, 128]

        slab_parts += [pad_block(wq_eff, D), pad_block(wk_eff, D), pad_block(wv_eff, D),
                       pad_block(w_out.T, D),                               # [D, D]
                       pad_block(w_fc1.T, D),                               # [D, MLP_D]
                       pad_block(w_fc2.T, MLP_D),                           # [MLP_D, D]
                       vec]

    slab = jnp.concatenate(slab_parts, axis=0)                              # [SLAB_ROWS, 128]
    assert slab.shape == (SLAB_ROWS, 128)

    out3 = pl.pallas_call(
        _fused_vit_kernel,
        out_shape=jax.ShapeDtypeStruct((bsz, 1, OUT_DIM), f32),
        grid=(bsz,),
        in_specs=[
            pl.BlockSpec((1, SEQ, CPP), lambda b: (b, 0, 0)),      # per-image patches
            pl.BlockSpec((SLAB_ROWS, 128), lambda b: (0, 0)),      # constant slab (DMA'd once)
            pl.BlockSpec((D, OUT_DIM), lambda b: (0, 0)),          # proj (DMA'd once)
        ],
        out_specs=pl.BlockSpec((1, 1, OUT_DIM), lambda b: (b, 0, 0)),
        compiler_params=pltpu.CompilerParams(
            dimension_semantics=("parallel",)),                    # 2nd TC on v7x
    )(patches, slab, params["proj"].astype(f32))
    return out3.reshape(bsz, OUT_DIM)


# ------------------------- deterministic params -------------------------------
def init_params(key):
    keys = iter(jax.random.split(key, 256))

    def nrm(shape, scale=0.02):
        return (scale * jax.random.normal(next(keys), shape)).astype(jnp.float32)

    params = {
        "conv_w": nrm((D, C_IN, PATCH, PATCH)),     # conv1 weight (no bias)
        "class_emb": nrm((D,)),
        "pos_emb": nrm((SEQ, D)),
        "ln_pre_g": jnp.ones((1, D), jnp.float32),
        "ln_pre_b": jnp.zeros((1, D), jnp.float32),
        "ln_post_g": jnp.ones((1, D), jnp.float32),
        "ln_post_b": jnp.zeros((1, D), jnp.float32),
        "proj": nrm((D, OUT_DIM)),
        "blocks": [],
    }
    for _ in range(N_LAYERS):
        blk = (
            jnp.ones((1, D), jnp.float32),          # ln1 gamma
            jnp.zeros((1, D), jnp.float32),         # ln1 beta
            nrm((3 * D, D)),                        # in_proj_weight
            jnp.zeros((1, 3 * D), jnp.float32),     # in_proj_bias
            nrm((RANK, D)),                         # LoRA A_q
            nrm((D, RANK)),                         # LoRA B_q (nonzero to exercise path)
            nrm((RANK, D)),                         # LoRA A_k
            nrm((D, RANK)),                         # LoRA B_k
            nrm((RANK, D)),                         # LoRA A_v
            nrm((D, RANK)),                         # LoRA B_v
            nrm((D, D)),                            # out_proj weight
            jnp.zeros((1, D), jnp.float32),         # out_proj bias
            jnp.ones((1, D), jnp.float32),          # ln2 gamma
            jnp.zeros((1, D), jnp.float32),         # ln2 beta
            nrm((MLP_D, D)),                        # mlp c_fc weight
            jnp.zeros((1, MLP_D), jnp.float32),     # mlp c_fc bias
            nrm((D, MLP_D)),                        # mlp c_proj weight
            jnp.zeros((1, D), jnp.float32),         # mlp c_proj bias
        )
        params["blocks"].append(blk)
    return params


if __name__ == "__main__":
    key = jax.random.PRNGKey(0)
    pk, xk = jax.random.split(key)
    params = init_params(pk)
    x = jax.random.normal(xk, (B_SZ, C_IN, IMG, IMG), dtype=jnp.float32)

    out = jax.jit(lora_vit_openclip_forward)(x, params)
    out = jax.block_until_ready(out)
    assert out.shape == (B_SZ, OUT_DIM) and out.dtype == jnp.float32
    print("KERNEL_OK")
</pallas_src>

<mosaic_0001>
module attributes {stable_mosaic.version = 11 : i64} {
  func.func @_fused_vit_kernel(%arg0: i32, %arg1: memref<1x5x192xf32, #tpu.memory_space<vmem>>, %arg2: memref<816x128xf32, #tpu.memory_space<vmem>>, %arg3: memref<32x768xf32, #tpu.memory_space<vmem>>, %arg4: memref<1x1x768xf32, #tpu.memory_space<vmem>>) attributes {dimension_semantics = [#tpu.dimension_semantics<parallel>], iteration_bounds = array<i64: 2>, scalar_prefetch = 0 : i64, scratch_operands = 0 : i64, tpu.core_type = #tpu.core_type<tc>, window_params = [{transform_indices = @transform_0, window_bounds = array<i64: 1, 5, 192>}, {pipeline_mode = #tpu.pipeline_mode<synchronous>, transform_indices = @transform_1, window_bounds = array<i64: 816, 128>}, {pipeline_mode = #tpu.pipeline_mode<synchronous>, transform_indices = @transform_2, window_bounds = array<i64: 32, 768>}, {transform_indices = @transform_3, window_bounds = array<i64: 1, 1, 768>}]} {
    %c0 = arith.constant 0 : index
    %c0_0 = arith.constant 0 : index
    %c0_1 = arith.constant 0 : index
    %0 = vector.load %arg1[%c0, %c0_0, %c0_1] : memref<1x5x192xf32, #tpu.memory_space<vmem>>, vector<1x5x192xf32>
    %1 = vector.shape_cast %0 : vector<1x5x192xf32> to vector<5x192xf32>
    %c0_2 = arith.constant 0 : index
    %c0_3 = arith.constant 0 : index
    %2 = vector.load %arg2[%c0_2, %c0_3] : memref<816x128xf32, #tpu.memory_space<vmem>>, vector<192x32xf32>
    %c192 = arith.constant 192 : index
    %c0_4 = arith.constant 0 : index
    %3 = vector.load %arg2[%c192, %c0_4] : memref<816x128xf32, #tpu.memory_space<vmem>>, vector<5x32xf32>
    %cst = arith.constant dense<0.000000e+00> : vector<5x32xf32>
    %4 = tpu.matmul %1, %2, %cst {dimension_numbers = #tpu.dot_dimension_numbers<[1], [0], [0], [1], [0, 0, 1, 1], [], []>} : vector<5x192xf32>, vector<192x32xf32>, vector<5x32xf32> -> vector<5x32xf32>
    %5 = arith.addf %4, %3 : vector<5x32xf32>
    %c200 = arith.constant 200 : index
    %c0_5 = arith.constant 0 : index
    %6 = vector.load %arg2[%c200, %c0_5] : memref<816x128xf32, #tpu.memory_space<vmem>>, vector<1x32xf32>
    %c201 = arith.constant 201 : index
    %c0_6 = arith.constant 0 : index
    %7 = vector.load %arg2[%c201, %c0_6] : memref<816x128xf32, #tpu.memory_space<vmem>>, vector<1x32xf32>
    %cst_7 = arith.constant dense<0.000000e+00> : vector<5xf32>
    %8 = vector.multi_reduction <add>, %5, %cst_7 [1] : vector<5x32xf32> to vector<5xf32>
    %9 = vector.shape_cast %8 : vector<5xf32> to vector<5x1xf32>
    %cst_8 = arith.constant 3.200000e+01 : f32
    %10 = vector.broadcast %cst_8 : f32 to vector<5x1xf32>
    %11 = arith.divf %9, %10 : vector<5x1xf32>
    %12 = vector.broadcast %11 : vector<5x1xf32> to vector<5x32xf32>
    %13 = arith.subf %5, %12 : vector<5x32xf32>
    %14 = arith.mulf %13, %13 : vector<5x32xf32>
    %cst_9 = arith.constant dense<0.000000e+00> : vector<5xf32>
    %15 = vector.multi_reduction <add>, %14, %cst_9 [1] : vector<5x32xf32> to vector<5xf32>
    %16 = vector.shape_cast %15 : vector<5xf32> to vector<5x1xf32>
    %cst_10 = arith.constant 3.200000e+01 : f32
    %17 = vector.broadcast %cst_10 : f32 to vector<5x1xf32>
    %18 = arith.divf %16, %17 : vector<5x1xf32>
    %19 = vector.broadcast %11 : vector<5x1xf32> to vector<5x32xf32>
    %20 = arith.subf %5, %19 : vector<5x32xf32>
    %cst_11 = arith.constant 9.99999974E-6 : f32
    %21 = vector.broadcast %cst_11 : f32 to vector<5x1xf32>
    %22 = arith.addf %18, %21 : vector<5x1xf32>
    %23 = math.rsqrt %22 : vector<5x1xf32>
    %24 = vector.broadcast %23 : vector<5x1xf32> to vector<5x32xf32>
    %25 = arith.mulf %20, %24 : vector<5x32xf32>
    %26 = vector.broadcast %6 : vector<1x32xf32> to vector<5x32xf32>
    %27 = arith.mulf %25, %26 : vector<5x32xf32>
    %28 = vector.broadcast %7 : vector<1x32xf32> to vector<5x32xf32>
    %29 = arith.addf %27, %28 : vector<5x32xf32>
    %c496 = arith.constant 496 : index
    %c0_12 = arith.constant 0 : index
    %30 = vector.load %arg2[%c496, %c0_12] : memref<816x128xf32, #tpu.memory_space<vmem>>, vector<1x32xf32>
    %c497 = arith.constant 497 : index
    %c0_13 = arith.constant 0 : index
    %31 = vector.load %arg2[%c497, %c0_13] : memref<816x128xf32, #tpu.memory_space<vmem>>, vector<1x32xf32>
    %cst_14 = arith.constant dense<0.000000e+00> : vector<5xf32>
    %32 = vector.multi_reduction <add>, %29, %cst_14 [1] : vector<5x32xf32> to vector<5xf32>
    %33 = vector.shape_cast %32 : vector<5xf32> to vector<5x1xf32>
    %cst_15 = arith.constant 3.200000e+01 : f32
    %34 = vector.broadcast %cst_15 : f32 to vector<5x1xf32>
    %35 = arith.divf %33, %34 : vector<5x1xf32>
    %36 = vector.broadcast %35 : vector<5x1xf32> to vector<5x32xf32>
    %37 = arith.subf %29, %36 : vector<5x32xf32>
    %38 = arith.mulf %37, %37 : vector<5x32xf32>
    %cst_16 = arith.constant dense<0.000000e+00> : vector<5xf32>
    %39 = vector.multi_reduction <add>, %38, %cst_16 [1] : vector<5x32xf32> to vector<5xf32>
    %40 = vector.shape_cast %39 : vector<5xf32> to vector<5x1xf32>
    %cst_17 = arith.constant 3.200000e+01 : f32
    %41 = vector.broadcast %cst_17 : f32 to vector<5x1xf32>
    %42 = arith.divf %40, %41 : vector<5x1xf32>
    %43 = vector.broadcast %35 : vector<5x1xf32> to vector<5x32xf32>
    %44 = arith.subf %29, %43 : vector<5x32xf32>
    %cst_18 = arith.constant 9.99999974E-6 : f32
    %45 = vector.broadcast %cst_18 : f32 to vector<5x1xf32>
    %46 = arith.addf %42, %45 : vector<5x1xf32>
    %47 = math.rsqrt %46 : vector<5x1xf32>
    %48 = vector.broadcast %47 : vector<5x1xf32> to vector<5x32xf32>
    %49 = arith.mulf %44, %48 : vector<5x32xf32>
    %50 = vector.broadcast %30 : vector<1x32xf32> to vector<5x32xf32>
    %51 = arith.mulf %49, %50 : vector<5x32xf32>
    %52 = vector.broadcast %31 : vector<1x32xf32> to vector<5x32xf32>
    %53 = arith.addf %51, %52 : vector<5x32xf32>
    %c208 = arith.constant 208 : index
    %c0_19 = arith.constant 0 : index
    %54 = vector.load %arg2[%c208, %c0_19] : memref<816x128xf32, #tpu.memory_space<vmem>>, vector<32x8xf32>
    %cst_20 = arith.constant dense<0.000000e+00> : vector<5x8xf32>
    %55 = tpu.matmul %53, %54, %cst_20 {dimension_numbers = #tpu.dot_dimension_numbers<[1], [0], [0], [1], [0, 0, 1, 1], [], []>} : vector<5x32xf32>, vector<32x8xf32>, vector<5x8xf32> -> vector<5x8xf32>
    %c498 = arith.constant 498 : index
    %c0_21 = arith.constant 0 : index
    %56 = vector.load %arg2[%c498, %c0_21] : memref<816x128xf32, #tpu.memory_space<vmem>>, vector<1x8xf32>
    %57 = vector.broadcast %56 : vector<1x8xf32> to vector<5x8xf32>
    %58 = arith.addf %55, %57 : vector<5x8xf32>
    %c240 = arith.constant 240 : index
    %c0_22 = arith.constant 0 : index
    %59 = vector.load %arg2[%c240, %c0_22] : memref<816x128xf32, #tpu.memory_space<vmem>>, vector<32x8xf32>
    %cst_23 = arith.constant dense<0.000000e+00> : vector<5x8xf32>
    %60 = tpu.matmul %53, %59, %cst_23 {dimension_numbers = #tpu.dot_dimension_numbers<[1], [0], [0], [1], [0, 0, 1, 1], [], []>} : vector<5x32xf32>, vector<32x8xf32>, vector<5x8xf32> -> vector<5x8xf32>
    %c499 = arith.constant 499 : index
    %c0_24 = arith.constant 0 : index
    %61 = vector.load %arg2[%c499, %c0_24] : memref<816x128xf32, #tpu.memory_space<vmem>>, vector<1x8xf32>
    %62 = vector.broadcast %61 : vector<1x8xf32> to vector<5x8xf32>
    %63 = arith.addf %60, %62 : vector<5x8xf32>
    %c272 = arith.constant 272 : index
    %c0_25 = arith.constant 0 : index
    %64 = vector.load %arg2[%c272, %c0_25] : memref<816x128xf32, #tpu.memory_space<vmem>>, vector<32x8xf32>
    %cst_26 = arith.constant dense<0.000000e+00> : vector<5x8xf32>
    %65 = tpu.matmul %53, %64, %cst_26 {dimension_numbers = #tpu.dot_dimension_numbers<[1], [0], [0], [1], [0, 0, 1, 1], [], []>} : vector<5x32xf32>, vector<32x8xf32>, vector<5x8xf32> -> vector<5x8xf32>
    %c500 = arith.constant 500 : index
    %c0_27 = arith.constant 0 : index
    %66 = vector.load %arg2[%c500, %c0_27] : memref<816x128xf32, #tpu.memory_space<vmem>>, vector<1x8xf32>
    %67 = vector.broadcast %66 : vector<1x8xf32> to vector<5x8xf32>
    %68 = arith.addf %65, %67 : vector<5x8xf32>
    %cst_28 = arith.constant dense<0.000000e+00> : vector<5x5xf32>
    %69 = tpu.matmul %58, %63, %cst_28 {dimension_numbers = #tpu.dot_dimension_numbers<[1], [1], [0], [0], [0, 0, 1, 0], [], []>} : vector<5x8xf32>, vector<5x8xf32>, vector<5x5xf32> -> vector<5x5xf32>
    %cst_29 = arith.constant dense<0xFF800000> : vector<5xf32>
    %70 = vector.multi_reduction <maximumf>, %69, %cst_29 [1] : vector<5x5xf32> to vector<5xf32>
    %71 = vector.shape_cast %70 : vector<5xf32> to vector<5x1xf32>
    %72 = vector.broadcast %71 : vector<5x1xf32> to vector<5x5xf32>
    %73 = arith.subf %69, %72 : vector<5x5xf32>
    %74 = math.exp %73 : vector<5x5xf32>
    %cst_30 = arith.constant dense<0.000000e+00> : vector<5xf32>
    %75 = vector.multi_reduction <add>, %74, %cst_30 [1] : vector<5x5xf32> to vector<5xf32>
    %76 = vector.shape_cast %75 : vector<5xf32> to vector<5x1xf32>
    %77 = vector.broadcast %76 : vector<5x1xf32> to vector<5x5xf32>
    %78 = arith.divf %74, %77 : vector<5x5xf32>
    %cst_31 = arith.constant dense<0.000000e+00> : vector<5x8xf32>
    %79 = tpu.matmul %78, %68, %cst_31 {dimension_numbers = #tpu.dot_dimension_numbers<[1], [0], [0], [1], [0, 0, 1, 1], [], []>} : vector<5x5xf32>, vector<5x8xf32>, vector<5x8xf32> -> vector<5x8xf32>
    %c304 = arith.constant 304 : index
    %c0_32 = arith.constant 0 : index
    %80 = vector.load %arg2[%c304, %c0_32] : memref<816x128xf32, #tpu.memory_space<vmem>>, vector<8x32xf32>
    %cst_33 = arith.constant dense<0.000000e+00> : vector<5x32xf32>
    %81 = tpu.matmul %79, %80, %cst_33 {dimension_numbers = #tpu.dot_dimension_numbers<[1], [0], [0], [1], [0, 0, 1, 1], [], []>} : vector<5x8xf32>, vector<8x32xf32>, vector<5x32xf32> -> vector<5x32xf32>
    %c208_34 = arith.constant 208 : index
    %c8 = arith.constant 8 : index
    %82 = vector.load %arg2[%c208_34, %c8] : memref<816x128xf32, #tpu.memory_space<vmem>>, vector<32x8xf32>
    %cst_35 = arith.constant dense<0.000000e+00> : vector<5x8xf32>
    %83 = tpu.matmul %53, %82, %cst_35 {dimension_numbers = #tpu.dot_dimension_numbers<[1], [0], [0], [1], [0, 0, 1, 1], [], []>} : vector<5x32xf32>, vector<32x8xf32>, vector<5x8xf32> -> vector<5x8xf32>
    %c498_36 = arith.constant 498 : index
    %c8_37 = arith.constant 8 : index
    %84 = vector.load %arg2[%c498_36, %c8_37] : memref<816x128xf32, #tpu.memory_space<vmem>>, vector<1x8xf32>
    %85 = vector.broadcast %84 : vector<1x8xf32> to vector<5x8xf32>
    %86 = arith.addf %83, %85 : vector<5x8xf32>
    %c240_38 = arith.constant 240 : index
    %c8_39 = arith.constant 8 : index
    %87 = vector.load %arg2[%c240_38, %c8_39] : memref<816x128xf32, #tpu.memory_space<vmem>>, vector<32x8xf32>
    %cst_40 = arith.constant dense<0.000000e+00> : vector<5x8xf32>
    %88 = tpu.matmul %53, %87, %cst_40 {dimension_numbers = #tpu.dot_dimension_numbers<[1], [0], [0], [1], [0, 0, 1, 1], [], []>} : vector<5x32xf32>, vector<32x8xf32>, vector<5x8xf32> -> vector<5x8xf32>
    %c499_41 = arith.constant 499 : index
    %c8_42 = arith.constant 8 : index
    %89 = vector.load %arg2[%c499_41, %c8_42] : memref<816x128xf32, #tpu.memory_space<vmem>>, vector<1x8xf32>
    %90 = vector.broadcast %89 : vector<1x8xf32> to vector<5x8xf32>
    %91 = arith.addf %88, %90 : vector<5x8xf32>
    %c272_43 = arith.constant 272 : index
    %c8_44 = arith.constant 8 : index
    %92 = vector.load %arg2[%c272_43, %c8_44] : memref<816x128xf32, #tpu.memory_space<vmem>>, vector<32x8xf32>
    %cst_45 = arith.constant dense<0.000000e+00> : vector<5x8xf32>
    %93 = tpu.matmul %53, %92, %cst_45 {dimension_numbers = #tpu.dot_dimension_numbers<[1], [0], [0], [1], [0, 0, 1, 1], [], []>} : vector<5x32xf32>, vector<32x8xf32>, vector<5x8xf32> -> vector<5x8xf32>
    %c500_46 = arith.constant 500 : index
    %c8_47 = arith.constant 8 : index
    %94 = vector.load %arg2[%c500_46, %c8_47] : memref<816x128xf32, #tpu.memory_space<vmem>>, vector<1x8xf32>
    %95 = vector.broadcast %94 : vector<1x8xf32> to vector<5x8xf32>
    %96 = arith.addf %93, %95 : vector<5x8xf32>
    %cst_48 = arith.constant dense<0.000000e+00> : vector<5x5xf32>
    %97 = tpu.matmul %86, %91, %cst_48 {dimension_numbers = #tpu.dot_dimension_numbers<[1], [1], [0], [0], [0, 0, 1, 0], [], []>} : vector<5x8xf32>, vector<5x8xf32>, vector<5x5xf32> -> vector<5x5xf32>
    %cst_49 = arith.constant dense<0xFF800000> : vector<5xf32>
    %98 = vector.multi_reduction <maximumf>, %97, %cst_49 [1] : vector<5x5xf32> to vector<5xf32>
    %99 = vector.shape_cast %98 : vector<5xf32> to vector<5x1xf32>
    %100 = vector.broadcast %99 : vector<5x1xf32> to vector<5x5xf32>
    %101 = arith.subf %97, %100 : vector<5x5xf32>
    %102 = math.exp %101 : vector<5x5xf32>
    %cst_50 = arith.constant dense<0.000000e+00> : vector<5xf32>
    %103 = vector.multi_reduction <add>, %102, %cst_50 [1] : vector<5x5xf32> to vector<5xf32>
    %104 = vector.shape_cast %103 : vector<5xf32> to vector<5x1xf32>
    %105 = vector.broadcast %104 : vector<5x1xf32> to vector<5x5xf32>
    %106 = arith.divf %102, %105 : vector<5x5xf32>
    %cst_51 = arith.constant dense<0.000000e+00> : vector<5x8xf32>
    %107 = tpu.matmul %106, %96, %cst_51 {dimension_numbers = #tpu.dot_dimension_numbers<[1], [0], [0], [1], [0, 0, 1, 1], [], []>} : vector<5x5xf32>, vector<5x8xf32>, vector<5x8xf32> -> vector<5x8xf32>
    %c312 = arith.constant 312 : index
    %c0_52 = arith.constant 0 : index
    %108 = vector.load %arg2[%c312, %c0_52] : memref<816x128xf32, #tpu.memory_space<vmem>>, vector<8x32xf32>
    %cst_53 = arith.constant dense<0.000000e+00> : vector<5x32xf32>
    %109 = tpu.matmul %107, %108, %cst_53 {dimension_numbers = #tpu.dot_dimension_numbers<[1], [0], [0], [1], [0, 0, 1, 1], [], []>} : vector<5x8xf32>, vector<8x32xf32>, vector<5x32xf32> -> vector<5x32xf32>
    %110 = arith.addf %81, %109 : vector<5x32xf32>
    %c208_54 = arith.constant 208 : index
    %c16 = arith.constant 16 : index
    %111 = vector.load %arg2[%c208_54, %c16] : memref<816x128xf32, #tpu.memory_space<vmem>>, vector<32x8xf32>
    %cst_55 = arith.constant dense<0.000000e+00> : vector<5x8xf32>
    %112 = tpu.matmul %53, %111, %cst_55 {dimension_numbers = #tpu.dot_dimension_numbers<[1], [0], [0], [1], [0, 0, 1, 1], [], []>} : vector<5x32xf32>, vector<32x8xf32>, vector<5x8xf32> -> vector<5x8xf32>
    %c498_56 = arith.constant 498 : index
    %c16_57 = arith.constant 16 : index
    %113 = vector.load %arg2[%c498_56, %c16_57] : memref<816x128xf32, #tpu.memory_space<vmem>>, vector<1x8xf32>
    %114 = vector.broadcast %113 : vector<1x8xf32> to vector<5x8xf32>
    %115 = arith.addf %112, %114 : vector<5x8xf32>
    %c240_58 = arith.constant 240 : index
    %c16_59 = arith.constant 16 : index
    %116 = vector.load %arg2[%c240_58, %c16_59] : memref<816x128xf32, #tpu.memory_space<vmem>>, vector<32x8xf32>
    %cst_60 = arith.constant dense<0.000000e+00> : vector<5x8xf32>
    %117 = tpu.matmul %53, %116, %cst_60 {dimension_numbers = #tpu.dot_dimension_numbers<[1], [0], [0], [1], [0, 0, 1, 1], [], []>} : vector<5x32xf32>, vector<32x8xf32>, vector<5x8xf32> -> vector<5x8xf32>
    %c499_61 = arith.constant 499 : index
    %c16_62 = arith.constant 16 : index
    %118 = vector.load %arg2[%c499_61, %c16_62] : memref<816x128xf32, #tpu.memory_space<vmem>>, vector<1x8xf32>
    %119 = vector.broadcast %118 : vector<1x8xf32> to vector<5x8xf32>
    %120 = arith.addf %117, %119 : vector<5x8xf32>
    %c272_63 = arith.constant 272 : index
    %c16_64 = arith.constant 16 : index
    %121 = vector.load %arg2[%c272_63, %c16_64] : memref<816x128xf32, #tpu.memory_space<vmem>>, vector<32x8xf32>
    %cst_65 = arith.constant dense<0.000000e+00> : vector<5x8xf32>
    %122 = tpu.matmul %53, %121, %cst_65 {dimension_numbers = #tpu.dot_dimension_numbers<[1], [0], [0], [1], [0, 0, 1, 1], [], []>} : vector<5x32xf32>, vector<32x8xf32>, vector<5x8xf32> -> vector<5x8xf32>
    %c500_66 = arith.constant 500 : index
    %c16_67 = arith.constant 16 : index
    %123 = vector.load %arg2[%c500_66, %c16_67] : memref<816x128xf32, #tpu.memory_space<vmem>>, vector<1x8xf32>
    %124 = vector.broadcast %123 : vector<1x8xf32> to vector<5x8xf32>
    %125 = arith.addf %122, %124 : vector<5x8xf32>
    %cst_68 = arith.constant dense<0.000000e+00> : vector<5x5xf32>
    %126 = tpu.matmul %115, %120, %cst_68 {dimension_numbers = #tpu.dot_dimension_numbers<[1], [1], [0], [0], [0, 0, 1, 0], [], []>} : vector<5x8xf32>, vector<5x8xf32>, vector<5x5xf32> -> vector<5x5xf32>
    %cst_69 = arith.constant dense<0xFF800000> : vector<5xf32>
    %127 = vector.multi_reduction <maximumf>, %126, %cst_69 [1] : vector<5x5xf32> to vector<5xf32>
    %128 = vector.shape_cast %127 : vector<5xf32> to vector<5x1xf32>
    %129 = vector.broadcast %128 : vector<5x1xf32> to vector<5x5xf32>
    %130 = arith.subf %126, %129 : vector<5x5xf32>
    %131 = math.exp %130 : vector<5x5xf32>
    %cst_70 = arith.constant dense<0.000000e+00> : vector<5xf32>
    %132 = vector.multi_reduction <add>, %131, %cst_70 [1] : vector<5x5xf32> to vector<5xf32>
    %133 = vector.shape_cast %132 : vector<5xf32> to vector<5x1xf32>
    %134 = vector.broadcast %133 : vector<5x1xf32> to vector<5x5xf32>
    %135 = arith.divf %131, %134 : vector<5x5xf32>
    %cst_71 = arith.constant dense<0.000000e+00> : vector<5x8xf32>
    %136 = tpu.matmul %135, %125, %cst_71 {dimension_numbers = #tpu.dot_dimension_numbers<[1], [0], [0], [1], [0, 0, 1, 1], [], []>} : vector<5x5xf32>, vector<5x8xf32>, vector<5x8xf32> -> vector<5x8xf32>
    %c320 = arith.constant 320 : index
    %c0_72 = arith.constant 0 : index
    %137 = vector.load %arg2[%c320, %c0_72] : memref<816x128xf32, #tpu.memory_space<vmem>>, vector<8x32xf32>
    %cst_73 = arith.constant dense<0.000000e+00> : vector<5x32xf32>
    %138 = tpu.matmul %136, %137, %cst_73 {dimension_numbers = #tpu.dot_dimension_numbers<[1], [0], [0], [1], [0, 0, 1, 1], [], []>} : vector<5x8xf32>, vector<8x32xf32>, vector<5x32xf32> -> vector<5x32xf32>
    %139 = arith.addf %110, %138 : vector<5x32xf32>
    %c208_74 = arith.constant 208 : index
    %c24 = arith.constant 24 : index
    %140 = vector.load %arg2[%c208_74, %c24] : memref<816x128xf32, #tpu.memory_space<vmem>>, vector<32x8xf32>
    %cst_75 = arith.constant dense<0.000000e+00> : vector<5x8xf32>
    %141 = tpu.matmul %53, %140, %cst_75 {dimension_numbers = #tpu.dot_dimension_numbers<[1], [0], [0], [1], [0, 0, 1, 1], [], []>} : vector<5x32xf32>, vector<32x8xf32>, vector<5x8xf32> -> vector<5x8xf32>
    %c498_76 = arith.constant 498 : index
    %c24_77 = arith.constant 24 : index
    %142 = vector.load %arg2[%c498_76, %c24_77] : memref<816x128xf32, #tpu.memory_space<vmem>>, vector<1x8xf32>
    %143 = vector.broadcast %142 : vector<1x8xf32> to vector<5x8xf32>
    %144 = arith.addf %141, %143 : vector<5x8xf32>
    %c240_78 = arith.constant 240 : index
    %c24_79 = arith.constant 24 : index
    %145 = vector.load %arg2[%c240_78, %c24_79] : memref<816x128xf32, #tpu.memory_space<vmem>>, vector<32x8xf32>
    %cst_80 = arith.constant dense<0.000000e+00> : vector<5x8xf32>
    %146 = tpu.matmul %53, %145, %cst_80 {dimension_numbers = #tpu.dot_dimension_numbers<[1], [0], [0], [1], [0, 0, 1, 1], [], []>} : vector<5x32xf32>, vector<32x8xf32>, vector<5x8xf32> -> vector<5x8xf32>
    %c499_81 = arith.constant 499 : index
    %c24_82 = arith.constant 24 : index
    %147 = vector.load %arg2[%c499_81, %c24_82] : memref<816x128xf32, #tpu.memory_space<vmem>>, vector<1x8xf32>
    %148 = vector.broadcast %147 : vector<1x8xf32> to vector<5x8xf32>
    %149 = arith.addf %146, %148 : vector<5x8xf32>
    %c272_83 = arith.constant 272 : index
    %c24_84 = arith.constant 24 : index
    %150 = vector.load %arg2[%c272_83, %c24_84] : memref<816x128xf32, #tpu.memory_space<vmem>>, vector<32x8xf32>
    %cst_85 = arith.constant dense<0.000000e+00> : vector<5x8xf32>
    %151 = tpu.matmul %53, %150, %cst_85 {dimension_numbers = #tpu.dot_dimension_numbers<[1], [0], [0], [1], [0, 0, 1, 1], [], []>} : vector<5x32xf32>, vector<32x8xf32>, vector<5x8xf32> -> vector<5x8xf32>
    %c500_86 = arith.constant 500 : index
    %c24_87 = arith.constant 24 : index
    %152 = vector.load %arg2[%c500_86, %c24_87] : memref<816x128xf32, #tpu.memory_space<vmem>>, vector<1x8xf32>
    %153 = vector.broadcast %152 : vector<1x8xf32> to vector<5x8xf32>
    %154 = arith.addf %151, %153 : vector<5x8xf32>
    %cst_88 = arith.constant dense<0.000000e+00> : vector<5x5xf32>
    %155 = tpu.matmul %144, %149, %cst_88 {dimension_numbers = #tpu.dot_dimension_numbers<[1], [1], [0], [0], [0, 0, 1, 0], [], []>} : vector<5x8xf32>, vector<5x8xf32>, vector<5x5xf32> -> vector<5x5xf32>
    %cst_89 = arith.constant dense<0xFF800000> : vector<5xf32>
    %156 = vector.multi_reduction <maximumf>, %155, %cst_89 [1] : vector<5x5xf32> to vector<5xf32>
    %157 = vector.shape_cast %156 : vector<5xf32> to vector<5x1xf32>
    %158 = vector.broadcast %157 : vector<5x1xf32> to vector<5x5xf32>
    %159 = arith.subf %155, %158 : vector<5x5xf32>
    %160 = math.exp %159 : vector<5x5xf32>
    %cst_90 = arith.constant dense<0.000000e+00> : vector<5xf32>
    %161 = vector.multi_reduction <add>, %160, %cst_90 [1] : vector<5x5xf32> to vector<5xf32>
    %162 = vector.shape_cast %161 : vector<5xf32> to vector<5x1xf32>
    %163 = vector.broadcast %162 : vector<5x1xf32> to vector<5x5xf32>
    %164 = arith.divf %160, %163 : vector<5x5xf32>
    %cst_91 = arith.constant dense<0.000000e+00> : vector<5x8xf32>
    %165 = tpu.matmul %164, %154, %cst_91 {dimension_numbers = #tpu.dot_dimension_numbers<[1], [0], [0], [1], [0, 0, 1, 1], [], []>} : vector<5x5xf32>, vector<5x8xf32>, vector<5x8xf32> -> vector<5x8xf32>
    %c328 = arith.constant 328 : index
    %c0_92 = arith.constant 0 : index
    %166 = vector.load %arg2[%c328, %c0_92] : memref<816x128xf32, #tpu.memory_space<vmem>>, vector<8x32xf32>
    %cst_93 = arith.constant dense<0.000000e+00> : vector<5x32xf32>
    %167 = tpu.matmul %165, %166, %cst_93 {dimension_numbers = #tpu.dot_dimension_numbers<[1], [0], [0], [1], [0, 0, 1, 1], [], []>} : vector<5x8xf32>, vector<8x32xf32>, vector<5x32xf32> -> vector<5x32xf32>
    %168 = arith.addf %139, %167 : vector<5x32xf32>
    %169 = arith.addf %29, %168 : vector<5x32xf32>
    %c501 = arith.constant 501 : index
    %c0_94 = arith.constant 0 : index
    %170 = vector.load %arg2[%c501, %c0_94] : memref<816x128xf32, #tpu.memory_space<vmem>>, vector<1x32xf32>
    %171 = vector.broadcast %170 : vector<1x32xf32> to vector<5x32xf32>
    %172 = arith.addf %169, %171 : vector<5x32xf32>
    %c502 = arith.constant 502 : index
    %c0_95 = arith.constant 0 : index
    %173 = vector.load %arg2[%c502, %c0_95] : memref<816x128xf32, #tpu.memory_space<vmem>>, vector<1x32xf32>
    %c503 = arith.constant 503 : index
    %c0_96 = arith.constant 0 : index
    %174 = vector.load %arg2[%c503, %c0_96] : memref<816x128xf32, #tpu.memory_space<vmem>>, vector<1x32xf32>
    %cst_97 = arith.constant dense<0.000000e+00> : vector<5xf32>
    %175 = vector.multi_reduction <add>, %172, %cst_97 [1] : vector<5x32xf32> to vector<5xf32>
    %176 = vector.shape_cast %175 : vector<5xf32> to vector<5x1xf32>
    %cst_98 = arith.constant 3.200000e+01 : f32
    %177 = vector.broadcast %cst_98 : f32 to vector<5x1xf32>
    %178 = arith.divf %176, %177 : vector<5x1xf32>
    %179 = vector.broadcast %178 : vector<5x1xf32> to vector<5x32xf32>
    %180 = arith.subf %172, %179 : vector<5x32xf32>
    %181 = arith.mulf %180, %180 : vector<5x32xf32>
    %cst_99 = arith.constant dense<0.000000e+00> : vector<5xf32>
    %182 = vector.multi_reduction <add>, %181, %cst_99 [1] : vector<5x32xf32> to vector<5xf32>
    %183 = vector.shape_cast %182 : vector<5xf32> to vector<5x1xf32>
    %cst_100 = arith.constant 3.200000e+01 : f32
    %184 = vector.broadcast %cst_100 : f32 to vector<5x1xf32>
    %185 = arith.divf %183, %184 : vector<5x1xf32>
    %186 = vector.broadcast %178 : vector<5x1xf32> to vector<5x32xf32>
    %187 = arith.subf %172, %186 : vector<5x32xf32>
    %cst_101 = arith.constant 9.99999974E-6 : f32
    %188 = vector.broadcast %cst_101 : f32 to vector<5x1xf32>
    %189 = arith.addf %185, %188 : vector<5x1xf32>
    %190 = math.rsqrt %189 : vector<5x1xf32>
    %191 = vector.broadcast %190 : vector<5x1xf32> to vector<5x32xf32>
    %192 = arith.mulf %187, %191 : vector<5x32xf32>
    %193 = vector.broadcast %173 : vector<1x32xf32> to vector<5x32xf32>
    %194 = arith.mulf %192, %193 : vector<5x32xf32>
    %195 = vector.broadcast %174 : vector<1x32xf32> to vector<5x32xf32>
    %196 = arith.addf %194, %195 : vector<5x32xf32>
    %c336 = arith.constant 336 : index
    %c0_102 = arith.constant 0 : index
    %197 = vector.load %arg2[%c336, %c0_102] : memref<816x128xf32, #tpu.memory_space<vmem>>, vector<32x128xf32>
    %cst_103 = arith.constant dense<0.000000e+00> : vector<5x128xf32>
    %198 = tpu.matmul %196, %197, %cst_103 {dimension_numbers = #tpu.dot_dimension_numbers<[1], [0], [0], [1], [0, 0, 1, 1], [], []>} : vector<5x32xf32>, vector<32x128xf32>, vector<5x128xf32> -> vector<5x128xf32>
    %c504 = arith.constant 504 : index
    %c0_104 = arith.constant 0 : index
    %199 = vector.load %arg2[%c504, %c0_104] : memref<816x128xf32, #tpu.memory_space<vmem>>, vector<1x128xf32>
    %200 = vector.broadcast %199 : vector<1x128xf32> to vector<5x128xf32>
    %201 = arith.addf %198, %200 : vector<5x128xf32>
    %cst_105 = arith.constant 0.707106769 : f32
    %202 = vector.broadcast %cst_105 : f32 to vector<5x128xf32>
    %203 = arith.mulf %201, %202 : vector<5x128xf32>
    %204 = math.absf %203 : vector<5x128xf32>
    %cst_106 = arith.constant 0.327591091 : f32
    %205 = vector.broadcast %cst_106 : f32 to vector<5x128xf32>
    %206 = arith.mulf %205, %204 : vector<5x128xf32>
    %cst_107 = arith.constant 1.000000e+00 : f32
    %207 = vector.broadcast %cst_107 : f32 to vector<5x128xf32>
    %208 = arith.addf %207, %206 : vector<5x128xf32>
    %cst_108 = arith.constant 1.000000e+00 : f32
    %209 = vector.broadcast %cst_108 : f32 to vector<5x128xf32>
    %210 = arith.divf %209, %208 : vector<5x128xf32>
    %cst_109 = arith.constant 1.06140542 : f32
    %211 = vector.broadcast %cst_109 : f32 to vector<5x128xf32>
    %212 = arith.mulf %210, %211 : vector<5x128xf32>
    %cst_110 = arith.constant -1.45315206 : f32
    %213 = vector.broadcast %cst_110 : f32 to vector<5x128xf32>
    %214 = arith.addf %213, %212 : vector<5x128xf32>
    %215 = arith.mulf %210, %214 : vector<5x128xf32>
    %cst_111 = arith.constant 1.42141378 : f32
    %216 = vector.broadcast %cst_111 : f32 to vector<5x128xf32>
    %217 = arith.addf %216, %215 : vector<5x128xf32>
    %218 = arith.mulf %210, %217 : vector<5x128xf32>
    %cst_112 = arith.constant -0.284496725 : f32
    %219 = vector.broadcast %cst_112 : f32 to vector<5x128xf32>
    %220 = arith.addf %219, %218 : vector<5x128xf32>
    %221 = arith.mulf %210, %220 : vector<5x128xf32>
    %cst_113 = arith.constant 0.254829586 : f32
    %222 = vector.broadcast %cst_113 : f32 to vector<5x128xf32>
    %223 = arith.addf %222, %221 : vector<5x128xf32>
    %224 = arith.mulf %210, %223 : vector<5x128xf32>
    %cst_114 = arith.constant 0.000000e+00 : f32
    %225 = vector.broadcast %cst_114 : f32 to vector<5x128xf32>
    %226 = arith.subf %225, %204 : vector<5x128xf32>
    %227 = arith.mulf %226, %204 : vector<5x128xf32>
    %228 = math.exp %227 : vector<5x128xf32>
    %229 = arith.mulf %224, %228 : vector<5x128xf32>
    %cst_115 = arith.constant 1.000000e+00 : f32
    %230 = vector.broadcast %cst_115 : f32 to vector<5x128xf32>
    %231 = arith.subf %230, %229 : vector<5x128xf32>
    %cst_116 = arith.constant 0.000000e+00 : f32
    %232 = vector.broadcast %cst_116 : f32 to vector<5x128xf32>
    %233 = arith.cmpf olt, %203, %232 : vector<5x128xf32>
    %cst_117 = arith.constant 0.000000e+00 : f32
    %234 = vector.broadcast %cst_117 : f32 to vector<5x128xf32>
    %235 = arith.subf %234, %231 : vector<5x128xf32>
    %236 = arith.select %233, %235, %231 : vector<5x128xi1>, vector<5x128xf32>
    %cst_118 = arith.constant 5.000000e-01 : f32
    %237 = vector.broadcast %cst_118 : f32 to vector<5x128xf32>
    %238 = arith.mulf %237, %201 : vector<5x128xf32>
    %cst_119 = arith.constant 1.000000e+00 : f32
    %239 = vector.broadcast %cst_119 : f32 to vector<5x128xf32>
    %240 = arith.addf %239, %236 : vector<5x128xf32>
    %241 = arith.mulf %238, %240 : vector<5x128xf32>
    %c368 = arith.constant 368 : index
    %c0_120 = arith.constant 0 : index
    %242 = vector.load %arg2[%c368, %c0_120] : memref<816x128xf32, #tpu.memory_space<vmem>>, vector<128x32xf32>
    %cst_121 = arith.constant dense<0.000000e+00> : vector<5x32xf32>
    %243 = tpu.matmul %241, %242, %cst_121 {dimension_numbers = #tpu.dot_dimension_numbers<[1], [0], [0], [1], [0, 0, 1, 1], [], []>} : vector<5x128xf32>, vector<128x32xf32>, vector<5x32xf32> -> vector<5x32xf32>
    %244 = arith.addf %172, %243 : vector<5x32xf32>
    %c505 = arith.constant 505 : index
    %c0_122 = arith.constant 0 : index
    %245 = vector.load %arg2[%c505, %c0_122] : memref<816x128xf32, #tpu.memory_space<vmem>>, vector<1x32xf32>
    %246 = vector.broadcast %245 : vector<1x32xf32> to vector<5x32xf32>
    %247 = arith.addf %244, %246 : vector<5x32xf32>
    %c800 = arith.constant 800 : index
    %c0_123 = arith.constant 0 : index
    %248 = vector.load %arg2[%c800, %c0_123] : memref<816x128xf32, #tpu.memory_space<vmem>>, vector<1x32xf32>
    %c801 = arith.constant 801 : index
    %c0_124 = arith.constant 0 : index
    %249 = vector.load %arg2[%c801, %c0_124] : memref<816x128xf32, #tpu.memory_space<vmem>>, vector<1x32xf32>
    %cst_125 = arith.constant dense<0.000000e+00> : vector<5xf32>
    %250 = vector.multi_reduction <add>, %247, %cst_125 [1] : vector<5x32xf32> to vector<5xf32>
    %251 = vector.shape_cast %250 : vector<5xf32> to vector<5x1xf32>
    %cst_126 = arith.constant 3.200000e+01 : f32
    %252 = vector.broadcast %cst_126 : f32 to vector<5x1xf32>
    %253 = arith.divf %251, %252 : vector<5x1xf32>
    %254 = vector.broadcast %253 : vector<5x1xf32> to vector<5x32xf32>
    %255 = arith.subf %247, %254 : vector<5x32xf32>
    %256 = arith.mulf %255, %255 : vector<5x32xf32>
    %cst_127 = arith.constant dense<0.000000e+00> : vector<5xf32>
    %257 = vector.multi_reduction <add>, %256, %cst_127 [1] : vector<5x32xf32> to vector<5xf32>
    %258 = vector.shape_cast %257 : vector<5xf32> to vector<5x1xf32>
    %cst_128 = arith.constant 3.200000e+01 : f32
    %259 = vector.broadcast %cst_128 : f32 to vector<5x1xf32>
    %260 = arith.divf %258, %259 : vector<5x1xf32>
    %261 = vector.broadcast %253 : vector<5x1xf32> to vector<5x32xf32>
    %262 = arith.subf %247, %261 : vector<5x32xf32>
    %cst_129 = arith.constant 9.99999974E-6 : f32
    %263 = vector.broadcast %cst_129 : f32 to vector<5x1xf32>
    %264 = arith.addf %260, %263 : vector<5x1xf32>
    %265 = math.rsqrt %264 : vector<5x1xf32>
    %266 = vector.broadcast %265 : vector<5x1xf32> to vector<5x32xf32>
    %267 = arith.mulf %262, %266 : vector<5x32xf32>
    %268 = vector.broadcast %248 : vector<1x32xf32> to vector<5x32xf32>
    %269 = arith.mulf %267, %268 : vector<5x32xf32>
    %270 = vector.broadcast %249 : vector<1x32xf32> to vector<5x32xf32>
    %271 = arith.addf %269, %270 : vector<5x32xf32>
    %c512 = arith.constant 512 : index
    %c0_130 = arith.constant 0 : index
    %272 = vector.load %arg2[%c512, %c0_130] : memref<816x128xf32, #tpu.memory_space<vmem>>, vector<32x8xf32>
    %cst_131 = arith.constant dense<0.000000e+00> : vector<5x8xf32>
    %273 = tpu.matmul %271, %272, %cst_131 {dimension_numbers = #tpu.dot_dimension_numbers<[1], [0], [0], [1], [0, 0, 1, 1], [], []>} : vector<5x32xf32>, vector<32x8xf32>, vector<5x8xf32> -> vector<5x8xf32>
    %c802 = arith.constant 802 : index
    %c0_132 = arith.constant 0 : index
    %274 = vector.load %arg2[%c802, %c0_132] : memref<816x128xf32, #tpu.memory_space<vmem>>, vector<1x8xf32>
    %275 = vector.broadcast %274 : vector<1x8xf32> to vector<5x8xf32>
    %276 = arith.addf %273, %275 : vector<5x8xf32>
    %c544 = arith.constant 544 : index
    %c0_133 = arith.constant 0 : index
    %277 = vector.load %arg2[%c544, %c0_133] : memref<816x128xf32, #tpu.memory_space<vmem>>, vector<32x8xf32>
    %cst_134 = arith.constant dense<0.000000e+00> : vector<5x8xf32>
    %278 = tpu.matmul %271, %277, %cst_134 {dimension_numbers = #tpu.dot_dimension_numbers<[1], [0], [0], [1], [0, 0, 1, 1], [], []>} : vector<5x32xf32>, vector<32x8xf32>, vector<5x8xf32> -> vector<5x8xf32>
    %c803 = arith.constant 803 : index
    %c0_135 = arith.constant 0 : index
    %279 = vector.load %arg2[%c803, %c0_135] : memref<816x128xf32, #tpu.memory_space<vmem>>, vector<1x8xf32>
    %280 = vector.broadcast %279 : vector<1x8xf32> to vector<5x8xf32>
    %281 = arith.addf %278, %280 : vector<5x8xf32>
    %c576 = arith.constant 576 : index
    %c0_136 = arith.constant 0 : index
    %282 = vector.load %arg2[%c576, %c0_136] : memref<816x128xf32, #tpu.memory_space<vmem>>, vector<32x8xf32>
    %cst_137 = arith.constant dense<0.000000e+00> : vector<5x8xf32>
    %283 = tpu.matmul %271, %282, %cst_137 {dimension_numbers = #tpu.dot_dimension_numbers<[1], [0], [0], [1], [0, 0, 1, 1], [], []>} : vector<5x32xf32>, vector<32x8xf32>, vector<5x8xf32> -> vector<5x8xf32>
    %c804 = arith.constant 804 : index
    %c0_138 = arith.constant 0 : index
    %284 = vector.load %arg2[%c804, %c0_138] : memref<816x128xf32, #tpu.memory_space<vmem>>, vector<1x8xf32>
    %285 = vector.broadcast %284 : vector<1x8xf32> to vector<5x8xf32>
    %286 = arith.addf %283, %285 : vector<5x8xf32>
    %cst_139 = arith.constant dense<0.000000e+00> : vector<5x5xf32>
    %287 = tpu.matmul %276, %281, %cst_139 {dimension_numbers = #tpu.dot_dimension_numbers<[1], [1], [0], [0], [0, 0, 1, 0], [], []>} : vector<5x8xf32>, vector<5x8xf32>, vector<5x5xf32> -> vector<5x5xf32>
    %cst_140 = arith.constant dense<0xFF800000> : vector<5xf32>
    %288 = vector.multi_reduction <maximumf>, %287, %cst_140 [1] : vector<5x5xf32> to vector<5xf32>
    %289 = vector.shape_cast %288 : vector<5xf32> to vector<5x1xf32>
    %290 = vector.broadcast %289 : vector<5x1xf32> to vector<5x5xf32>
    %291 = arith.subf %287, %290 : vector<5x5xf32>
    %292 = math.exp %291 : vector<5x5xf32>
    %cst_141 = arith.constant dense<0.000000e+00> : vector<5xf32>
    %293 = vector.multi_reduction <add>, %292, %cst_141 [1] : vector<5x5xf32> to vector<5xf32>
    %294 = vector.shape_cast %293 : vector<5xf32> to vector<5x1xf32>
    %295 = vector.broadcast %294 : vector<5x1xf32> to vector<5x5xf32>
    %296 = arith.divf %292, %295 : vector<5x5xf32>
    %cst_142 = arith.constant dense<0.000000e+00> : vector<5x8xf32>
    %297 = tpu.matmul %296, %286, %cst_142 {dimension_numbers = #tpu.dot_dimension_numbers<[1], [0], [0], [1], [0, 0, 1, 1], [], []>} : vector<5x5xf32>, vector<5x8xf32>, vector<5x8xf32> -> vector<5x8xf32>
    %c608 = arith.constant 608 : index
    %c0_143 = arith.constant 0 : index
    %298 = vector.load %arg2[%c608, %c0_143] : memref<816x128xf32, #tpu.memory_space<vmem>>, vector<8x32xf32>
    %cst_144 = arith.constant dense<0.000000e+00> : vector<5x32xf32>
    %299 = tpu.matmul %297, %298, %cst_144 {dimension_numbers = #tpu.dot_dimension_numbers<[1], [0], [0], [1], [0, 0, 1, 1], [], []>} : vector<5x8xf32>, vector<8x32xf32>, vector<5x32xf32> -> vector<5x32xf32>
    %c512_145 = arith.constant 512 : index
    %c8_146 = arith.constant 8 : index
    %300 = vector.load %arg2[%c512_145, %c8_146] : memref<816x128xf32, #tpu.memory_space<vmem>>, vector<32x8xf32>
    %cst_147 = arith.constant dense<0.000000e+00> : vector<5x8xf32>
    %301 = tpu.matmul %271, %300, %cst_147 {dimension_numbers = #tpu.dot_dimension_numbers<[1], [0], [0], [1], [0, 0, 1, 1], [], []>} : vector<5x32xf32>, vector<32x8xf32>, vector<5x8xf32> -> vector<5x8xf32>
    %c802_148 = arith.constant 802 : index
    %c8_149 = arith.constant 8 : index
    %302 = vector.load %arg2[%c802_148, %c8_149] : memref<816x128xf32, #tpu.memory_space<vmem>>, vector<1x8xf32>
    %303 = vector.broadcast %302 : vector<1x8xf32> to vector<5x8xf32>
    %304 = arith.addf %301, %303 : vector<5x8xf32>
    %c544_150 = arith.constant 544 : index
    %c8_151 = arith.constant 8 : index
    %305 = vector.load %arg2[%c544_150, %c8_151] : memref<816x128xf32, #tpu.memory_space<vmem>>, vector<32x8xf32>
    %cst_152 = arith.constant dense<0.000000e+00> : vector<5x8xf32>
    %306 = tpu.matmul %271, %305, %cst_152 {dimension_numbers = #tpu.dot_dimension_numbers<[1], [0], [0], [1], [0, 0, 1, 1], [], []>} : vector<5x32xf32>, vector<32x8xf32>, vector<5x8xf32> -> vector<5x8xf32>
    %c803_153 = arith.constant 803 : index
    %c8_154 = arith.constant 8 : index
    %307 = vector.load %arg2[%c803_153, %c8_154] : memref<816x128xf32, #tpu.memory_space<vmem>>, vector<1x8xf32>
    %308 = vector.broadcast %307 : vector<1x8xf32> to vector<5x8xf32>
    %309 = arith.addf %306, %308 : vector<5x8xf32>
    %c576_155 = arith.constant 576 : index
    %c8_156 = arith.constant 8 : index
    %310 = vector.load %arg2[%c576_155, %c8_156] : memref<816x128xf32, #tpu.memory_space<vmem>>, vector<32x8xf32>
    %cst_157 = arith.constant dense<0.000000e+00> : vector<5x8xf32>
    %311 = tpu.matmul %271, %310, %cst_157 {dimension_numbers = #tpu.dot_dimension_numbers<[1], [0], [0], [1], [0, 0, 1, 1], [], []>} : vector<5x32xf32>, vector<32x8xf32>, vector<5x8xf32> -> vector<5x8xf32>
    %c804_158 = arith.constant 804 : index
    %c8_159 = arith.constant 8 : index
    %312 = vector.load %arg2[%c804_158, %c8_159] : memref<816x128xf32, #tpu.memory_space<vmem>>, vector<1x8xf32>
    %313 = vector.broadcast %312 : vector<1x8xf32> to vector<5x8xf32>
    %314 = arith.addf %311, %313 : vector<5x8xf32>
    %cst_160 = arith.constant dense<0.000000e+00> : vector<5x5xf32>
    %315 = tpu.matmul %304, %309, %cst_160 {dimension_numbers = #tpu.dot_dimension_numbers<[1], [1], [0], [0], [0, 0, 1, 0], [], []>} : vector<5x8xf32>, vector<5x8xf32>, vector<5x5xf32> -> vector<5x5xf32>
    %cst_161 = arith.constant dense<0xFF800000> : vector<5xf32>
    %316 = vector.multi_reduction <maximumf>, %315, %cst_161 [1] : vector<5x5xf32> to vector<5xf32>
    %317 = vector.shape_cast %316 : vector<5xf32> to vector<5x1xf32>
    %318 = vector.broadcast %317 : vector<5x1xf32> to vector<5x5xf32>
    %319 = arith.subf %315, %318 : vector<5x5xf32>
    %320 = math.exp %319 : vector<5x5xf32>
    %cst_162 = arith.constant dense<0.000000e+00> : vector<5xf32>
    %321 = vector.multi_reduction <add>, %320, %cst_162 [1] : vector<5x5xf32> to vector<5xf32>
    %322 = vector.shape_cast %321 : vector<5xf32> to vector<5x1xf32>
    %323 = vector.broadcast %322 : vector<5x1xf32> to vector<5x5xf32>
    %324 = arith.divf %320, %323 : vector<5x5xf32>
    %cst_163 = arith.constant dense<0.000000e+00> : vector<5x8xf32>
    %325 = tpu.matmul %324, %314, %cst_163 {dimension_numbers = #tpu.dot_dimension_numbers<[1], [0], [0], [1], [0, 0, 1, 1], [], []>} : vector<5x5xf32>, vector<5x8xf32>, vector<5x8xf32> -> vector<5x8xf32>
    %c616 = arith.constant 616 : index
    %c0_164 = arith.constant 0 : index
    %326 = vector.load %arg2[%c616, %c0_164] : memref<816x128xf32, #tpu.memory_space<vmem>>, vector<8x32xf32>
    %cst_165 = arith.constant dense<0.000000e+00> : vector<5x32xf32>
    %327 = tpu.matmul %325, %326, %cst_165 {dimension_numbers = #tpu.dot_dimension_numbers<[1], [0], [0], [1], [0, 0, 1, 1], [], []>} : vector<5x8xf32>, vector<8x32xf32>, vector<5x32xf32> -> vector<5x32xf32>
    %328 = arith.addf %299, %327 : vector<5x32xf32>
    %c512_166 = arith.constant 512 : index
    %c16_167 = arith.constant 16 : index
    %329 = vector.load %arg2[%c512_166, %c16_167] : memref<816x128xf32, #tpu.memory_space<vmem>>, vector<32x8xf32>
    %cst_168 = arith.constant dense<0.000000e+00> : vector<5x8xf32>
    %330 = tpu.matmul %271, %329, %cst_168 {dimension_numbers = #tpu.dot_dimension_numbers<[1], [0], [0], [1], [0, 0, 1, 1], [], []>} : vector<5x32xf32>, vector<32x8xf32>, vector<5x8xf32> -> vector<5x8xf32>
    %c802_169 = arith.constant 802 : index
    %c16_170 = arith.constant 16 : index
    %331 = vector.load %arg2[%c802_169, %c16_170] : memref<816x128xf32, #tpu.memory_space<vmem>>, vector<1x8xf32>
    %332 = vector.broadcast %331 : vector<1x8xf32> to vector<5x8xf32>
    %333 = arith.addf %330, %332 : vector<5x8xf32>
    %c544_171 = arith.constant 544 : index
    %c16_172 = arith.constant 16 : index
    %334 = vector.load %arg2[%c544_171, %c16_172] : memref<816x128xf32, #tpu.memory_space<vmem>>, vector<32x8xf32>
    %cst_173 = arith.constant dense<0.000000e+00> : vector<5x8xf32>
    %335 = tpu.matmul %271, %334, %cst_173 {dimension_numbers = #tpu.dot_dimension_numbers<[1], [0], [0], [1], [0, 0, 1, 1], [], []>} : vector<5x32xf32>, vector<32x8xf32>, vector<5x8xf32> -> vector<5x8xf32>
    %c803_174 = arith.constant 803 : index
    %c16_175 = arith.constant 16 : index
    %336 = vector.load %arg2[%c803_174, %c16_175] : memref<816x128xf32, #tpu.memory_space<vmem>>, vector<1x8xf32>
    %337 = vector.broadcast %336 : vector<1x8xf32> to vector<5x8xf32>
    %338 = arith.addf %335, %337 : vector<5x8xf32>
    %c576_176 = arith.constant 576 : index
    %c16_177 = arith.constant 16 : index
    %339 = vector.load %arg2[%c576_176, %c16_177] : memref<816x128xf32, #tpu.memory_space<vmem>>, vector<32x8xf32>
    %cst_178 = arith.constant dense<0.000000e+00> : vector<5x8xf32>
    %340 = tpu.matmul %271, %339, %cst_178 {dimension_numbers = #tpu.dot_dimension_numbers<[1], [0], [0], [1], [0, 0, 1, 1], [], []>} : vector<5x32xf32>, vector<32x8xf32>, vector<5x8xf32> -> vector<5x8xf32>
    %c804_179 = arith.constant 804 : index
    %c16_180 = arith.constant 16 : index
    %341 = vector.load %arg2[%c804_179, %c16_180] : memref<816x128xf32, #tpu.memory_space<vmem>>, vector<1x8xf32>
    %342 = vector.broadcast %341 : vector<1x8xf32> to vector<5x8xf32>
    %343 = arith.addf %340, %342 : vector<5x8xf32>
    %cst_181 = arith.constant dense<0.000000e+00> : vector<5x5xf32>
    %344 = tpu.matmul %333, %338, %cst_181 {dimension_numbers = #tpu.dot_dimension_numbers<[1], [1], [0], [0], [0, 0, 1, 0], [], []>} : vector<5x8xf32>, vector<5x8xf32>, vector<5x5xf32> -> vector<5x5xf32>
    %cst_182 = arith.constant dense<0xFF800000> : vector<5xf32>
    %345 = vector.multi_reduction <maximumf>, %344, %cst_182 [1] : vector<5x5xf32> to vector<5xf32>
    %346 = vector.shape_cast %345 : vector<5xf32> to vector<5x1xf32>
    %347 = vector.broadcast %346 : vector<5x1xf32> to vector<5x5xf32>
    %348 = arith.subf %344, %347 : vector<5x5xf32>
    %349 = math.exp %348 : vector<5x5xf32>
    %cst_183 = arith.constant dense<0.000000e+00> : vector<5xf32>
    %350 = vector.multi_reduction <add>, %349, %cst_183 [1] : vector<5x5xf32> to vector<5xf32>
    %351 = vector.shape_cast %350 : vector<5xf32> to vector<5x1xf32>
    %352 = vector.broadcast %351 : vector<5x1xf32> to vector<5x5xf32>
    %353 = arith.divf %349, %352 : vector<5x5xf32>
    %cst_184 = arith.constant dense<0.000000e+00> : vector<5x8xf32>
    %354 = tpu.matmul %353, %343, %cst_184 {dimension_numbers = #tpu.dot_dimension_numbers<[1], [0], [0], [1], [0, 0, 1, 1], [], []>} : vector<5x5xf32>, vector<5x8xf32>, vector<5x8xf32> -> vector<5x8xf32>
    %c624 = arith.constant 624 : index
    %c0_185 = arith.constant 0 : index
    %355 = vector.load %arg2[%c624, %c0_185] : memref<816x128xf32, #tpu.memory_space<vmem>>, vector<8x32xf32>
    %cst_186 = arith.constant dense<0.000000e+00> : vector<5x32xf32>
    %356 = tpu.matmul %354, %355, %cst_186 {dimension_numbers = #tpu.dot_dimension_numbers<[1], [0], [0], [1], [0, 0, 1, 1], [], []>} : vector<5x8xf32>, vector<8x32xf32>, vector<5x32xf32> -> vector<5x32xf32>
    %357 = arith.addf %328, %356 : vector<5x32xf32>
    %c512_187 = arith.constant 512 : index
    %c24_188 = arith.constant 24 : index
    %358 = vector.load %arg2[%c512_187, %c24_188] : memref<816x128xf32, #tpu.memory_space<vmem>>, vector<32x8xf32>
    %cst_189 = arith.constant dense<0.000000e+00> : vector<5x8xf32>
    %359 = tpu.matmul %271, %358, %cst_189 {dimension_numbers = #tpu.dot_dimension_numbers<[1], [0], [0], [1], [0, 0, 1, 1], [], []>} : vector<5x32xf32>, vector<32x8xf32>, vector<5x8xf32> -> vector<5x8xf32>
    %c802_190 = arith.constant 802 : index
    %c24_191 = arith.constant 24 : index
    %360 = vector.load %arg2[%c802_190, %c24_191] : memref<816x128xf32, #tpu.memory_space<vmem>>, vector<1x8xf32>
    %361 = vector.broadcast %360 : vector<1x8xf32> to vector<5x8xf32>
    %362 = arith.addf %359, %361 : vector<5x8xf32>
    %c544_192 = arith.constant 544 : index
    %c24_193 = arith.constant 24 : index
    %363 = vector.load %arg2[%c544_192, %c24_193] : memref<816x128xf32, #tpu.memory_space<vmem>>, vector<32x8xf32>
    %cst_194 = arith.constant dense<0.000000e+00> : vector<5x8xf32>
    %364 = tpu.matmul %271, %363, %cst_194 {dimension_numbers = #tpu.dot_dimension_numbers<[1], [0], [0], [1], [0, 0, 1, 1], [], []>} : vector<5x32xf32>, vector<32x8xf32>, vector<5x8xf32> -> vector<5x8xf32>
    %c803_195 = arith.constant 803 : index
    %c24_196 = arith.constant 24 : index
    %365 = vector.load %arg2[%c803_195, %c24_196] : memref<816x128xf32, #tpu.memory_space<vmem>>, vector<1x8xf32>
    %366 = vector.broadcast %365 : vector<1x8xf32> to vector<5x8xf32>
    %367 = arith.addf %364, %366 : vector<5x8xf32>
    %c576_197 = arith.constant 576 : index
    %c24_198 = arith.constant 24 : index
    %368 = vector.load %arg2[%c576_197, %c24_198] : memref<816x128xf32, #tpu.memory_space<vmem>>, vector<32x8xf32>
    %cst_199 = arith.constant dense<0.000000e+00> : vector<5x8xf32>
    %369 = tpu.matmul %271, %368, %cst_199 {dimension_numbers = #tpu.dot_dimension_numbers<[1], [0], [0], [1], [0, 0, 1, 1], [], []>} : vector<5x32xf32>, vector<32x8xf32>, vector<5x8xf32> -> vector<5x8xf32>
    %c804_200 = arith.constant 804 : index
    %c24_201 = arith.constant 24 : index
    %370 = vector.load %arg2[%c804_200, %c24_201] : memref<816x128xf32, #tpu.memory_space<vmem>>, vector<1x8xf32>
    %371 = vector.broadcast %370 : vector<1x8xf32> to vector<5x8xf32>
    %372 = arith.addf %369, %371 : vector<5x8xf32>
    %cst_202 = arith.constant dense<0.000000e+00> : vector<5x5xf32>
    %373 = tpu.matmul %362, %367, %cst_202 {dimension_numbers = #tpu.dot_dimension_numbers<[1], [1], [0], [0], [0, 0, 1, 0], [], []>} : vector<5x8xf32>, vector<5x8xf32>, vector<5x5xf32> -> vector<5x5xf32>
    %cst_203 = arith.constant dense<0xFF800000> : vector<5xf32>
    %374 = vector.multi_reduction <maximumf>, %373, %cst_203 [1] : vector<5x5xf32> to vector<5xf32>
    %375 = vector.shape_cast %374 : vector<5xf32> to vector<5x1xf32>
    %376 = vector.broadcast %375 : vector<5x1xf32> to vector<5x5xf32>
    %377 = arith.subf %373, %376 : vector<5x5xf32>
    %378 = math.exp %377 : vector<5x5xf32>
    %cst_204 = arith.constant dense<0.000000e+00> : vector<5xf32>
    %379 = vector.multi_reduction <add>, %378, %cst_204 [1] : vector<5x5xf32> to vector<5xf32>
    %380 = vector.shape_cast %379 : vector<5xf32> to vector<5x1xf32>
    %381 = vector.broadcast %380 : vector<5x1xf32> to vector<5x5xf32>
    %382 = arith.divf %378, %381 : vector<5x5xf32>
    %cst_205 = arith.constant dense<0.000000e+00> : vector<5x8xf32>
    %383 = tpu.matmul %382, %372, %cst_205 {dimension_numbers = #tpu.dot_dimension_numbers<[1], [0], [0], [1], [0, 0, 1, 1], [], []>} : vector<5x5xf32>, vector<5x8xf32>, vector<5x8xf32> -> vector<5x8xf32>
    %c632 = arith.constant 632 : index
    %c0_206 = arith.constant 0 : index
    %384 = vector.load %arg2[%c632, %c0_206] : memref<816x128xf32, #tpu.memory_space<vmem>>, vector<8x32xf32>
    %cst_207 = arith.constant dense<0.000000e+00> : vector<5x32xf32>
    %385 = tpu.matmul %383, %384, %cst_207 {dimension_numbers = #tpu.dot_dimension_numbers<[1], [0], [0], [1], [0, 0, 1, 1], [], []>} : vector<5x8xf32>, vector<8x32xf32>, vector<5x32xf32> -> vector<5x32xf32>
    %386 = arith.addf %357, %385 : vector<5x32xf32>
    %387 = arith.addf %247, %386 : vector<5x32xf32>
    %c805 = arith.constant 805 : index
    %c0_208 = arith.constant 0 : index
    %388 = vector.load %arg2[%c805, %c0_208] : memref<816x128xf32, #tpu.memory_space<vmem>>, vector<1x32xf32>
    %389 = vector.broadcast %388 : vector<1x32xf32> to vector<5x32xf32>
    %390 = arith.addf %387, %389 : vector<5x32xf32>
    %c806 = arith.constant 806 : index
    %c0_209 = arith.constant 0 : index
    %391 = vector.load %arg2[%c806, %c0_209] : memref<816x128xf32, #tpu.memory_space<vmem>>, vector<1x32xf32>
    %c807 = arith.constant 807 : index
    %c0_210 = arith.constant 0 : index
    %392 = vector.load %arg2[%c807, %c0_210] : memref<816x128xf32, #tpu.memory_space<vmem>>, vector<1x32xf32>
    %cst_211 = arith.constant dense<0.000000e+00> : vector<5xf32>
    %393 = vector.multi_reduction <add>, %390, %cst_211 [1] : vector<5x32xf32> to vector<5xf32>
    %394 = vector.shape_cast %393 : vector<5xf32> to vector<5x1xf32>
    %cst_212 = arith.constant 3.200000e+01 : f32
    %395 = vector.broadcast %cst_212 : f32 to vector<5x1xf32>
    %396 = arith.divf %394, %395 : vector<5x1xf32>
    %397 = vector.broadcast %396 : vector<5x1xf32> to vector<5x32xf32>
    %398 = arith.subf %390, %397 : vector<5x32xf32>
    %399 = arith.mulf %398, %398 : vector<5x32xf32>
    %cst_213 = arith.constant dense<0.000000e+00> : vector<5xf32>
    %400 = vector.multi_reduction <add>, %399, %cst_213 [1] : vector<5x32xf32> to vector<5xf32>
    %401 = vector.shape_cast %400 : vector<5xf32> to vector<5x1xf32>
    %cst_214 = arith.constant 3.200000e+01 : f32
    %402 = vector.broadcast %cst_214 : f32 to vector<5x1xf32>
    %403 = arith.divf %401, %402 : vector<5x1xf32>
    %404 = vector.broadcast %396 : vector<5x1xf32> to vector<5x32xf32>
    %405 = arith.subf %390, %404 : vector<5x32xf32>
    %cst_215 = arith.constant 9.99999974E-6 : f32
    %406 = vector.broadcast %cst_215 : f32 to vector<5x1xf32>
    %407 = arith.addf %403, %406 : vector<5x1xf32>
    %408 = math.rsqrt %407 : vector<5x1xf32>
    %409 = vector.broadcast %408 : vector<5x1xf32> to vector<5x32xf32>
    %410 = arith.mulf %405, %409 : vector<5x32xf32>
    %411 = vector.broadcast %391 : vector<1x32xf32> to vector<5x32xf32>
    %412 = arith.mulf %410, %411 : vector<5x32xf32>
    %413 = vector.broadcast %392 : vector<1x32xf32> to vector<5x32xf32>
    %414 = arith.addf %412, %413 : vector<5x32xf32>
    %c640 = arith.constant 640 : index
    %c0_216 = arith.constant 0 : index
    %415 = vector.load %arg2[%c640, %c0_216] : memref<816x128xf32, #tpu.memory_space<vmem>>, vector<32x128xf32>
    %cst_217 = arith.constant dense<0.000000e+00> : vector<5x128xf32>
    %416 = tpu.matmul %414, %415, %cst_217 {dimension_numbers = #tpu.dot_dimension_numbers<[1], [0], [0], [1], [0, 0, 1, 1], [], []>} : vector<5x32xf32>, vector<32x128xf32>, vector<5x128xf32> -> vector<5x128xf32>
    %c808 = arith.constant 808 : index
    %c0_218 = arith.constant 0 : index
    %417 = vector.load %arg2[%c808, %c0_218] : memref<816x128xf32, #tpu.memory_space<vmem>>, vector<1x128xf32>
    %418 = vector.broadcast %417 : vector<1x128xf32> to vector<5x128xf32>
    %419 = arith.addf %416, %418 : vector<5x128xf32>
    %cst_219 = arith.constant 0.707106769 : f32
    %420 = vector.broadcast %cst_219 : f32 to vector<5x128xf32>
    %421 = arith.mulf %419, %420 : vector<5x128xf32>
    %422 = math.absf %421 : vector<5x128xf32>
    %cst_220 = arith.constant 0.327591091 : f32
    %423 = vector.broadcast %cst_220 : f32 to vector<5x128xf32>
    %424 = arith.mulf %423, %422 : vector<5x128xf32>
    %cst_221 = arith.constant 1.000000e+00 : f32
    %425 = vector.broadcast %cst_221 : f32 to vector<5x128xf32>
    %426 = arith.addf %425, %424 : vector<5x128xf32>
    %cst_222 = arith.constant 1.000000e+00 : f32
    %427 = vector.broadcast %cst_222 : f32 to vector<5x128xf32>
    %428 = arith.divf %427, %426 : vector<5x128xf32>
    %cst_223 = arith.constant 1.06140542 : f32
    %429 = vector.broadcast %cst_223 : f32 to vector<5x128xf32>
    %430 = arith.mulf %428, %429 : vector<5x128xf32>
    %cst_224 = arith.constant -1.45315206 : f32
    %431 = vector.broadcast %cst_224 : f32 to vector<5x128xf32>
    %432 = arith.addf %431, %430 : vector<5x128xf32>
    %433 = arith.mulf %428, %432 : vector<5x128xf32>
    %cst_225 = arith.constant 1.42141378 : f32
    %434 = vector.broadcast %cst_225 : f32 to vector<5x128xf32>
    %435 = arith.addf %434, %433 : vector<5x128xf32>
    %436 = arith.mulf %428, %435 : vector<5x128xf32>
    %cst_226 = arith.constant -0.284496725 : f32
    %437 = vector.broadcast %cst_226 : f32 to vector<5x128xf32>
    %438 = arith.addf %437, %436 : vector<5x128xf32>
    %439 = arith.mulf %428, %438 : vector<5x128xf32>
    %cst_227 = arith.constant 0.254829586 : f32
    %440 = vector.broadcast %cst_227 : f32 to vector<5x128xf32>
    %441 = arith.addf %440, %439 : vector<5x128xf32>
    %442 = arith.mulf %428, %441 : vector<5x128xf32>
    %cst_228 = arith.constant 0.000000e+00 : f32
    %443 = vector.broadcast %cst_228 : f32 to vector<5x128xf32>
    %444 = arith.subf %443, %422 : vector<5x128xf32>
    %445 = arith.mulf %444, %422 : vector<5x128xf32>
    %446 = math.exp %445 : vector<5x128xf32>
    %447 = arith.mulf %442, %446 : vector<5x128xf32>
    %cst_229 = arith.constant 1.000000e+00 : f32
    %448 = vector.broadcast %cst_229 : f32 to vector<5x128xf32>
    %449 = arith.subf %448, %447 : vector<5x128xf32>
    %cst_230 = arith.constant 0.000000e+00 : f32
    %450 = vector.broadcast %cst_230 : f32 to vector<5x128xf32>
    %451 = arith.cmpf olt, %421, %450 : vector<5x128xf32>
    %cst_231 = arith.constant 0.000000e+00 : f32
    %452 = vector.broadcast %cst_231 : f32 to vector<5x128xf32>
    %453 = arith.subf %452, %449 : vector<5x128xf32>
    %454 = arith.select %451, %453, %449 : vector<5x128xi1>, vector<5x128xf32>
    %cst_232 = arith.constant 5.000000e-01 : f32
    %455 = vector.broadcast %cst_232 : f32 to vector<5x128xf32>
    %456 = arith.mulf %455, %419 : vector<5x128xf32>
    %cst_233 = arith.constant 1.000000e+00 : f32
    %457 = vector.broadcast %cst_233 : f32 to vector<5x128xf32>
    %458 = arith.addf %457, %454 : vector<5x128xf32>
    %459 = arith.mulf %456, %458 : vector<5x128xf32>
    %c672 = arith.constant 672 : index
    %c0_234 = arith.constant 0 : index
    %460 = vector.load %arg2[%c672, %c0_234] : memref<816x128xf32, #tpu.memory_space<vmem>>, vector<128x32xf32>
    %cst_235 = arith.constant dense<0.000000e+00> : vector<5x32xf32>
    %461 = tpu.matmul %459, %460, %cst_235 {dimension_numbers = #tpu.dot_dimension_numbers<[1], [0], [0], [1], [0, 0, 1, 1], [], []>} : vector<5x128xf32>, vector<128x32xf32>, vector<5x32xf32> -> vector<5x32xf32>
    %462 = arith.addf %390, %461 : vector<5x32xf32>
    %c809 = arith.constant 809 : index
    %c0_236 = arith.constant 0 : index
    %463 = vector.load %arg2[%c809, %c0_236] : memref<816x128xf32, #tpu.memory_space<vmem>>, vector<1x32xf32>
    %464 = vector.broadcast %463 : vector<1x32xf32> to vector<5x32xf32>
    %465 = arith.addf %462, %464 : vector<5x32xf32>
    %466 = vector.extract_strided_slice %465 {offsets = [0, 0], sizes = [1, 32], strides = [1, 1]} : vector<5x32xf32> to vector<1x32xf32>
    %c202 = arith.constant 202 : index
    %c0_237 = arith.constant 0 : index
    %467 = vector.load %arg2[%c202, %c0_237] : memref<816x128xf32, #tpu.memory_space<vmem>>, vector<1x32xf32>
    %c203 = arith.constant 203 : index
    %c0_238 = arith.constant 0 : index
    %468 = vector.load %arg2[%c203, %c0_238] : memref<816x128xf32, #tpu.memory_space<vmem>>, vector<1x32xf32>
    %cst_239 = arith.constant dense<0.000000e+00> : vector<1xf32>
    %469 = vector.multi_reduction <add>, %466, %cst_239 [1] : vector<1x32xf32> to vector<1xf32>
    %470 = vector.shape_cast %469 : vector<1xf32> to vector<1x1xf32>
    %cst_240 = arith.constant 3.200000e+01 : f32
    %471 = vector.broadcast %cst_240 : f32 to vector<1x1xf32>
    %472 = arith.divf %470, %471 : vector<1x1xf32>
    %473 = vector.broadcast %472 : vector<1x1xf32> to vector<1x32xf32>
    %474 = arith.subf %466, %473 : vector<1x32xf32>
    %475 = arith.mulf %474, %474 : vector<1x32xf32>
    %cst_241 = arith.constant dense<0.000000e+00> : vector<1xf32>
    %476 = vector.multi_reduction <add>, %475, %cst_241 [1] : vector<1x32xf32> to vector<1xf32>
    %477 = vector.shape_cast %476 : vector<1xf32> to vector<1x1xf32>
    %cst_242 = arith.constant 3.200000e+01 : f32
    %478 = vector.broadcast %cst_242 : f32 to vector<1x1xf32>
    %479 = arith.divf %477, %478 : vector<1x1xf32>
    %480 = vector.broadcast %472 : vector<1x1xf32> to vector<1x32xf32>
    %481 = arith.subf %466, %480 : vector<1x32xf32>
    %cst_243 = arith.constant 9.99999974E-6 : f32
    %482 = vector.broadcast %cst_243 : f32 to vector<1x1xf32>
    %483 = arith.addf %479, %482 : vector<1x1xf32>
    %484 = math.rsqrt %483 : vector<1x1xf32>
    %485 = vector.broadcast %484 : vector<1x1xf32> to vector<1x32xf32>
    %486 = arith.mulf %481, %485 : vector<1x32xf32>
    %487 = arith.mulf %486, %467 : vector<1x32xf32>
    %488 = arith.addf %487, %468 : vector<1x32xf32>
    %c0_244 = arith.constant 0 : index
    %c0_245 = arith.constant 0 : index
    %489 = vector.load %arg3[%c0_244, %c0_245] : memref<32x768xf32, #tpu.memory_space<vmem>>, vector<32x768xf32>
    %cst_246 = arith.constant dense<0.000000e+00> : vector<1x768xf32>
    %490 = tpu.matmul %488, %489, %cst_246 {dimension_numbers = #tpu.dot_dimension_numbers<[1], [0], [0], [1], [0, 0, 1, 1], [], []>} : vector<1x32xf32>, vector<32x768xf32>, vector<1x768xf32> -> vector<1x768xf32>
    %c0_247 = arith.constant 0 : index
    %c0_248 = arith.constant 0 : index
    %c0_249 = arith.constant 0 : index
    %491 = vector.load %arg4[%c0_247, %c0_248, %c0_249] : memref<1x1x768xf32, #tpu.memory_space<vmem>>, vector<1x1x768xf32>
    %492 = vector.shape_cast %491 : vector<1x1x768xf32> to vector<1x768xf32>
    %493 = vector.shape_cast %490 : vector<1x768xf32> to vector<1x1x768xf32>
    tpu.vector_store %arg4[%c0_247, %c0_248, %c0_249], %493 {strides = array<i32>} : memref<1x1x768xf32, #tpu.memory_space<vmem>>, vector<1x1x768xf32>,
    return
  }
  func.func @transform_0(%arg0: i32) -> (i32, i32, i32) {
    %c0_i32 = arith.constant 0 : i32
    %c0_i32_0 = arith.constant 0 : i32
    %c0_i32_1 = arith.constant 0 : i32
    return %arg0, %c0_i32, %c0_i32_0 : i32, i32, i32
  }
  func.func @transform_1(%arg0: i32) -> (i32, i32) {
    %c0_i32 = arith.constant 0 : i32
    %c0_i32_0 = arith.constant 0 : i32
    %c0_i32_1 = arith.constant 0 : i32
    return %c0_i32, %c0_i32_0 : i32, i32
  }
  func.func @transform_2(%arg0: i32) -> (i32, i32) {
    %c0_i32 = arith.constant 0 : i32
    %c0_i32_0 = arith.constant 0 : i32
    %c0_i32_1 = arith.constant 0 : i32
    return %c0_i32, %c0_i32_0 : i32, i32
  }
  func.func @transform_3(%arg0: i32) -> (i32, i32, i32) {
    %c0_i32 = arith.constant 0 : i32
    %c0_i32_0 = arith.constant 0 : i32
    %c0_i32_1 = arith.constant 0 : i32
    return %arg0, %c0_i32, %c0_i32_0 : i32, i32, i32
  }
}

</mosaic_0001>

<bundles_post_ra>
// kernel: lora_vit_openclip_forward.1
= control target key start
LH: loop header
LB: loop body
LE: loop exit
PB: predicated region body
PF: predicated region fallthrough
CT: control target
= control target key end

     0   :  { %s6014_s12 = smov 0   ;;  %s7190_s0 = inlined_call_operand.vmem [shape: f32[2,5,192], index: 0, kind: input, shape index: {}]   ;;  %s7191_s1 = inlined_call_operand.vmem [shape: f32[816,128], index: 1, kind: input, shape index: {}]   ;;  %s7192_s2 = inlined_call_operand.vmem [shape: f32[32,768], index: 2, kind: input, shape index: {}]   ;;  %s7193_s3 = inlined_call_operand.vmem [shape: f32[2,1,768], index: 3, kind: output, shape index: {}]  }
   0x1 LB: > { %s5123_s13 = sadd.s32 4294967295, %s5986_s12   ;;  %p5127_p0 = scmp.ge.s32.totalorder %s5986_s12, 1  ;;  %s5986_s12 = sphi %s6014_s12, %s13_s12  }
   0x2   : > { %p137_p1 = scmp.lt.s32.totalorder %s5986_s12, 3 }
   0x4   : > { %p138_p2 = pnand %p5127_p0, %p137_p1 }
   0x5   : > { %p160_p3 = scmp.lt.s32.totalorder (!%p138_p2), %s5123_s13, 1  ;;  %s5990_s5 = smov (!%p138_p2), 120  }
   0x6   : > { %141 = sbr.rel (%p138_p2) target bundleno = 10455 (0x28d7), region = 32  ;;  %s5991_s6 = smov (!%p138_p2), 112  }
   0x7   : > { %s5992_s11 = smov (!%p138_p2), 104  }
   0xb   : > { %v186_v0 = vld [vmem:[%s7191_s1 + $0x78] sm:$0xff]  ;;  %v5988_v1 = vmov 0.0   ;;  %v185_v2 = vld [vmem:[%s7191_s1 + $0x70] sm:$0xff]  ;;  %s7195_s13 = smov (!%p160_p3, %s5123_s13), 1  ;;  %v184_v3 = vld [vmem:[%s7191_s1 + $0x68] sm:$0xff]  ;;  %vm196_vm0 = vcmask 523264  }
   0xc   : > { %200 = vmatprep.subr.mxu0 %v5988_v1  ;;  %5437 = vmatprep.subr.mxu1 %v5988_v1  ;;  %s5224_s20 = sshll.u32 %s7195_s13, 4  ;;  %v183_v4 = vld [vmem:[%s7191_s1 + $0x60] sm:$0xff]  ;;  %v182_v5 = vld [vmem:[%s7191_s1 + $0x58] sm:$0xff]  ;;  %v181_v7 = vld [vmem:[%s7191_s1 + $0x50] sm:$0xff]  ;;  %vm272_vm1 = vcmask 258048   ;;  %vm5989_vm2 = vmmov 0  }
   0xd   : > { %201 = vmatpush1.msra.mxu0 %v186_v0  ;;  %s6044_s25 = scalar_lea.vmem %s7190_s0, %s5224_s20  ;;  %v180_v8 = vld [vmem:[%s7191_s1 + $0x48] sm:$0xff]  ;;  %v179_v9 = vld [vmem:[%s7191_s1 + $0x40] sm:$0xff]  ;;  %v178_v10 = vld [vmem:[%s7191_s1 + $0x38] sm:$0xff]  ;;  %5445 = vmatprep.mubr.msk.f32.mxu1 %vm5989_vm2, %v5988_v1  ;;  %vm331_vm3 = vcmask 261120   ;;  %vm563_vm4 = vcmask 64512   ;;  %vm656_vm5 = vcmask 1044480  }
   0xe   : > { %202 = vmatprep.subr.mxu0 %v5988_v1  ;;  %v170_v6 = vld [vmem:[%s6044_s25 + $0x8] sm:$0x1f]  ;;  %v177_v11 = vld [vmem:[%s7191_s1 + $0x30] sm:$0xff]  ;;  %v175_v13 = vld [vmem:[%s7191_s1 + $0x20] sm:$0xff]  ;;  %vm640_vm6 = vcmask 36864   ;;  %vm652_vm7 = vcmask 39936  }
   0xf   : > { %203 = vmatpush1.msra.mxu0 %v185_v2  ;;  %5130 = vmatprep.mubr.msk.f32.mxu0 %vm196_vm0, %v170_v6  ;;  %v176_v12 = vld [vmem:[%s7191_s1 + $0x28] sm:$0xff]  ;;  %v174_v14 = vld [vmem:[%s7191_s1 + $0x18] sm:$0xff]  ;;  %v173_v15 = vld [vmem:[%s7191_s1 + $0x10] sm:$0xff]  ;;  %vm4762_vm10 = vcmask 253952   ;;  %s5913_s20 = smul.u32 6, %s7195_s13 }
  0x10   : > { %204 = vmatprep.subr.mxu0 %v5988_v1  ;;  %v172_v16 = vld [vmem:[%s7191_s1 + $0x8] sm:$0xff]  ;;  %v171_v17 = vld [vmem:[%s7191_s1] sm:$0xff]  ;;  %v194_v18 = vld [vmem:[%s7191_s1 + $0xb8] sm:$0xff] }
  0x11   : > { %205 = vmatpush1.msra.mxu0 %v184_v3  ;;  %v193_v19 = vld [vmem:[%s7191_s1 + $0xb0] sm:$0xff]  ;;  %v192_v20 = vld [vmem:[%s7191_s1 + $0xa8] sm:$0xff]  ;;  %v191_v21 = vld [vmem:[%s7191_s1 + $0xa0] sm:$0xff]  ;;  %s168_s23 = scalar_lea.vmem %s7193_s3, %s5913_s20 }
  0x12   : > { %206 = vmatprep.subr.mxu0 %v5988_v1  ;;  %v190_v22 = vld [vmem:[%s7191_s1 + $0x98] sm:$0xff]  ;;  %v189_v23 = vld [vmem:[%s7191_s1 + $0x90] sm:$0xff]  ;;  %v188_v24 = vld [vmem:[%s7191_s1 + $0x88] sm:$0xff] }
  0x13   : > { %207 = vmatpush1.msra.mxu0 %v183_v4  ;;  %v187_v25 = vld [vmem:[%s7191_s1 + $0x80] sm:$0xff]  ;;  %v5131_v41 = vld [vmem:[%s7191_s1 + $0xc8] ss:$0 sm:$0xff]  ;;  %v5132_v43 = vld [vmem:[%s7191_s1 + $0xc9] ss:$0 sm:$0xff] }
  0x14   : > { %208 = vmatprep.subr.mxu0 %v5988_v1  ;;  %v169_v26 = vld [vmem:[%s6044_s25] sm:$0x1f]  ;;  %v6150_v52 = vld [vmem:[%s7191_s1 + $0xe8] sm:$0xff]  ;;  %v6164_v54 = vld [vmem:[%s7191_s1 + $0xd8] sm:$0xff] }
  0x15   : > { %209 = vmatpush1.msra.mxu0 %v182_v5  ;;  %v195_v27 = vld [vmem:[%s7191_s1 + $0xc0] sm:$0x1f]  ;;  %5438 = vmatpush3.msra.mxu1 %v6150_v52  ;;  %v6171_v55 = vld [vmem:[%s7191_s1 + $0xd0] sm:$0xff]  ;;  %v6190_v2 = vld [vmem:[%s7191_s1 + $0x108] sm:$0xff] }
  0x16   : > { %210 = vmatprep.subr.mxu0 %v5988_v1  ;;  %5439 = vmatprep.subr.mxu1 %v5988_v1  ;;  %v6157_v53 = vld [vmem:[%s7191_s1 + $0xe0] sm:$0xff]  ;;  %v5133_v60 = vld [vmem:[%s7191_s1 + $0x1f0] ss:$0 sm:$0xff]  ;;  %v5134_v62 = vld [vmem:[%s7191_s1 + $0x1f1] ss:$0 sm:$0xff] }
  0x17   : > { %211 = vmatpush1.msra.mxu0 %v181_v7  ;;  %5440 = vmatpush3.msra.mxu1 %v6157_v53  ;;  %v6197_v3 = vld [vmem:[%s7191_s1 + $0x100] sm:$0xff]  ;;  %v6206_v4 = vld [vmem:[%s7191_s1 + $0xf8] sm:$0xff]  ;;  %v6213_v5 = vld [vmem:[%s7191_s1 + $0xf0] sm:$0xff] }
  0x18   : > { %212 = vmatprep.subr.mxu0 %v5988_v1  ;;  %5441 = vmatprep.subr.mxu1 %v5988_v1  ;;  %v6220_v6 = vld [vmem:[%s7191_s1 + $0x128] sm:$0xff]  ;;  %v6229_v7 = vld [vmem:[%s7191_s1 + $0x120] sm:$0xff] }
  0x19   : > { %213 = vmatpush1.msra.mxu0 %v180_v8  ;;  %5442 = vmatpush3.msra.mxu1 %v6164_v54  ;;  %v6238_v8 = vld [vmem:[%s7191_s1 + $0x118] sm:$0xff] }
  0x1a   : > { %214 = vmatprep.subr.mxu0 %v5988_v1  ;;  %5443 = vmatprep.subr.mxu1 %v5988_v1 }
  0x1b   : > { %215 = vmatpush1.msra.mxu0 %v179_v9  ;;  %5444 = vmatpush3.msra.mxu1 %v6171_v55  ;;  %v6245_v9 = vld [vmem:[%s7191_s1 + $0x110] sm:$0xff] }
  0x1c   : > { %216 = vmatprep.subr.mxu0 %v5988_v1  ;;  %5448 = vmatprep.subr.mxu1 %v5988_v1 }
  0x1d   : > { %217 = vmatpush1.msra.mxu0 %v178_v10 }
  0x1e   : > { %218 = vmatprep.subr.mxu0 %v5988_v1 }
  0x1f   : > { %219 = vmatpush1.msra.mxu0 %v177_v11 }
  0x20   : > { %220 = vmatprep.subr.mxu0 %v5988_v1 }
  0x21   : > { %221 = vmatpush1.msra.mxu0 %v176_v12  ;;  %v6258_v12 = vld [vmem:[%s7191_s1 + $0x1f3] ss:$0 sm:$0xff] }
  0x22   : > { %222 = vmatprep.subr.mxu0 %v5988_v1 }
  0x23   : > { %223 = vmatpush1.msra.mxu0 %v175_v13 }
  0x24   : > { %224 = vmatprep.subr.mxu0 %v5988_v1 }
  0x25   : > { %225 = vmatpush1.msra.mxu0 %v174_v14  ;;  %v6263_v14 = vld [vmem:[%s7191_s1 + $0x1f2] ss:$0 sm:$0xff] }
  0x26   : > { %226 = vmatprep.subr.mxu0 %v5988_v1 }
  0x27   : > { %227 = vmatpush1.msra.mxu0 %v173_v15 }
  0x28   : > { %228 = vmatprep.subr.mxu0 %v5988_v1 }
  0x29   : > { %229 = vmatpush1.msra.mxu0 %v172_v16 }
  0x2a   : > { %230 = vmatprep.subr.mxu0 %v5988_v1 }
  0x2b   : > { %231 = vmatpush1.msra.mxu0 %v171_v17 }
  0x2c   : > { %248 = vmatprep.subr.mxu0 %v5988_v1 }
  0x2d   : > { %249 = vmatpush2.msra.mxu0 %v194_v18  ;;  %v6273_v18 = vld [vmem:[%s7191_s1 + $0x1f4] ss:$0 sm:$0xff] }
  0x2e   : > { %250 = vmatprep.subr.mxu0 %v5988_v1 }
  0x2f   : > { %251 = vmatpush2.msra.mxu0 %v193_v19 }
  0x30   : > { %252 = vmatprep.subr.mxu0 %v5988_v1 }
  0x31   : > { %253 = vmatpush2.msra.mxu0 %v192_v20 }
  0x32   : > { %254 = vmatprep.subr.mxu0 %v5988_v1 }
  0x33   : > { %255 = vmatpush2.msra.mxu0 %v191_v21 }
  0x34   : > { %256 = vmatprep.subr.mxu0 %v5988_v1 }
  0x35   : > { %257 = vmatpush2.msra.mxu0 %v190_v22 }
  0x36   : > { %258 = vmatprep.subr.mxu0 %v5988_v1 }
  0x37   : > { %259 = vmatpush2.msra.mxu0 %v189_v23 }
  0x38   : > { %260 = vmatprep.subr.mxu0 %v5988_v1 }
  0x39   : > { %261 = vmatpush2.msra.mxu0 %v188_v24 }
  0x3a   : > { %262 = vmatprep.subr.mxu0 %v5988_v1 }
  0x3b   : > { %263 = vmatpush2.msra.mxu0 %v187_v25 }
  0x3c   : > { %265 = vmatmul.mubr.f32.vlgmr.msra.gmra.mxu0 %v169_v26  ;;  %5502 = vmatprep.subr.mxu0 %v5988_v1 }
  0x3d   : > { %5510 = vmatprep.mubr.msk.f32.mxu0 %vm5989_vm2, %v5988_v1 }
  0xfc   : > { %v266_v28 = vpop.f32.mrf.mxu0 }
  0xfd   : > { %v267_v29 = vadd.f32 %v266_v28, %v195_v27 }
  0xfe   : > { %v268_v30 = vpop.f32.mrf.mxu0 }
  0xff   : > { %v273_v31 = vsel %vm272_vm1, %v267_v29, 0.0 }
 0x100   : > { %274 = vadd.xlane.f32.xlu0 %v273_v31 }
 0x189   : > { %v275_v32 = vpop.xlane.xlu0 %274 }
 0x18a   : > { %v277_v33 = vmul.f32 0.03125, %v275_v32 }
 0x18c   : > { %v278_v34 = vsub.f32 %v267_v29, %v277_v33 }
 0x18e   : > { %v279_v35 = vmul.f32 %v278_v34, %v278_v34 }
 0x190   : > { %v280_v36 = vsel %vm272_vm1, %v279_v35, 0.0 }
 0x191   : > { %281 = vadd.xlane.f32.xlu0 %v280_v36 }
 0x21a   : > { %v282_v37 = vpop.xlane.xlu0 %281 }
 0x21b   : > { %v283_v38 = vmul.f32 0.03125, %v282_v37 }
 0x21d   : > { %v284_v39 = vadd.f32 1e-05, %v283_v38 }
 0x21f   : > { %5928 = vrsqrt.f32 %v284_v39 }
 0x22c   : > { %v5929_v40 = vpop.eup %5928 }
 0x22d   : > { %v286_v42 = vmul.f32 %v5929_v40, %v278_v34 }
 0x22f   : > { %v291_v44 = vmul.f32 %v5131_v41, %v286_v42 }
 0x231   : > { %v6141_v45 = vadd.f32 %v5132_v43, %v291_v44 }
 0x233   : > { %v299_v46 = vsel %vm272_vm1, %v6141_v45, 0.0 }
 0x234   : > { %300 = vadd.xlane.f32.xlu1 %v299_v46 }
 0x2bd   : > { %v301_v47 = vpop.xlane.xlu1 %300 }
 0x2be   : > { %v302_v48 = vmul.f32 0.03125, %v301_v47 }
 0x2c0   : > { %v303_v49 = vsub.f32 %v6141_v45, %v302_v48 }
 0x2c2   : > { %v304_v50 = vmul.f32 %v303_v49, %v303_v49 }
 0x2c4   : > { %v305_v51 = vsel %vm272_vm1, %v304_v50, 0.0 }
 0x2c5   : > { %306 = vadd.xlane.f32.xlu1 %v305_v51 }
 0x2d6   : > { %739 = vrot.lane.b32.xlu1 %v6157_v53, %s5990_s5 }
 0x2da   : > { %737 = vrot.lane.b32.xlu1 %v6164_v54, %s5990_s5 }
 0x34e   : > { %v307_v56 = vpop.xlane.xlu1 %306 }
 0x34f   : > { %v308_v57 = vmul.f32 0.03125, %v307_v56 }
 0x351   : > { %v309_v58 = vadd.f32 1e-05, %v308_v57 }
 0x352   : > { %v740_v35 = vpop.permute.xlu1 %739 }
 0x353   : > { %5930 = vrsqrt.f32 %v309_v58 }
 0x356   : > { %v738_v36 = vpop.permute.xlu1 %737 }
 0x360   : > { %v5931_v59 = vpop.eup %5930 }
 0x361   : > { %v311_v61 = vmul.f32 %v5931_v59, %v303_v49 }
 0x363   : > { %v316_v63 = vmul.f32 %v5133_v60, %v311_v61 }
 0x365   : > { %v6185_v0 = vadd.f32 %v5134_v62, %v316_v63 }
 0x367   : > { %5446 = vmatmul.mubr.msk.f32.vlgmr.msra.gmra.mxu1 %vm331_vm3, %v6185_v0 }
 0x368   : > { %5449 = vmatpush3.msra.mxu1 %v6190_v2  ;;  %5456 = vmatprep.mubr.msk.f32.mxu1 %vm5989_vm2, %v5988_v1 }
 0x369   : > { %5450 = vmatprep.subr.mxu1 %v5988_v1 }
 0x36a   : > { %5451 = vmatpush3.msra.mxu1 %v6197_v3 }
 0x36b   : > { %5452 = vmatprep.subr.mxu1 %v5988_v1 }
 0x36c   : > { %5453 = vmatpush3.msra.mxu1 %v6206_v4 }
 0x36d   : > { %5454 = vmatprep.subr.mxu1 %v5988_v1 }
 0x36e   : > { %5455 = vmatpush3.msra.mxu1 %v6213_v5 }
 0x36f   : > { %5457 = vmatmul.mubr.msk.f32.vlgmr.msra.gmra.mxu1 %vm331_vm3, %v6185_v0  ;;  %5459 = vmatprep.subr.mxu1 %v5988_v1 }
 0x370   : > { %5460 = vmatpush3.msra.mxu1 %v6220_v6  ;;  %5467 = vmatprep.mubr.msk.f32.mxu1 %vm5989_vm2, %v5988_v1 }
 0x371   : > { %5461 = vmatprep.subr.mxu1 %v5988_v1 }
 0x372   : > { %5462 = vmatpush3.msra.mxu1 %v6229_v7 }
 0x373   : > { %5463 = vmatprep.subr.mxu1 %v5988_v1 }
 0x374   : > { %5464 = vmatpush3.msra.mxu1 %v6238_v8 }
 0x375   : > { %5465 = vmatprep.subr.mxu1 %v5988_v1 }
 0x376   : > { %5466 = vmatpush3.msra.mxu1 %v6245_v9 }
 0x377   : > { %5468 = vmatmul.mubr.msk.f32.vlgmr.msra.gmra.mxu1 %vm331_vm3, %v6185_v0  ;;  %5470 = vmatprep.subr.mxu1 %v5988_v1 }
 0x378   : > { %5472 = vmatprep.mubr.msk.f32.mxu1 %vm5989_vm2, %v5988_v1 }
 0x427   : > { %v401_v10 = vpop.f32.mrf.mxu1 }
 0x428   : > { %v402_v17 = vadd.f32 %v6263_v14, %v401_v10 }
 0x429   : > { %v5447_v11 = vpop.f32.mrf.mxu1 }
 0x42f   : > { %v480_v13 = vpop.f32.mrf.mxu1 }
 0x430   : > { %v481_v15 = vadd.f32 %v6258_v12, %v480_v13 }
 0x431   : > { %v5458_v16 = vpop.f32.mrf.mxu1 }
 0x432   : > { %5471 = vmatpush3.xpose.msk.msra.mxu1 %vm563_vm4, %v481_v15 }
 0x433   : > { %5475 = vmatprep.subr.mxu1 %v5988_v1 }
 0x435   : > { %5473 = vmatmul.mubr.msk.f32.vlgmr.msra.gmra.mxu1 %vm563_vm4, %v402_v17 }
 0x436   : > { %5477 = vmatprep.mubr.msk.f32.mxu1 %vm5989_vm2, %v5988_v1 }
 0x437   : > { %v559_v19 = vpop.f32.mrf.mxu1 }
 0x438   : > { %v560_v20 = vadd.f32 %v6273_v18, %v559_v19 }
 0x439   : > { %v5469_v21 = vpop.f32.mrf.mxu1 }
 0x43a   : > { %5476 = vmatpush3.msk.msra.mxu1 %vm656_vm5, %v560_v20  ;;  %v1164_v21 = vld [vmem:[%s7191_s1 + $0x138] sm:$0xff] }
 0x43b   : > { %5480 = vmatprep.subr.mxu1 %v5988_v1 }
 0x4f5   : > { %v636_v22 = vpop.f32.mrf.mxu1 }
 0x4f6   : > { %v641_v23 = vsel %vm640_vm6, %v636_v22, -inf }
 0x4f7   : > { %642 = vmax.xlane.f32.xlu0 %v641_v23  ;;  %v5474_v24 = vpop.f32.mrf.mxu1 }
 0x50d   : > { %741 = vrot.lane.b32.xlu0 %v6150_v52, %s5990_s5 }
 0x511   : > { %831 = vrot.lane.b32.xlu0 %v6190_v2, %s5990_s5 }
 0x515   : > { %827 = vrot.lane.b32.xlu0 %v6206_v4, %s5990_s5 }
 0x519   : > { %838 = vrot.lane.b32.xlu0 %v6258_v12, %s5990_s5 }
 0x51d   : > { %921 = vrot.lane.b32.xlu0 %v6220_v6, %s5990_s5 }
 0x521   : > { %917 = vrot.lane.b32.xlu0 %v6238_v8, %s5990_s5 }
 0x580   : > { %v643_v25 = vpop.xlane.xlu0 %642 }
 0x581   : > { %v644_v26 = vsub.f32 %v636_v22, %v643_v25 }
 0x583   : > { %v645_v27 = vmul.f32 1.442695, %v644_v26  ;;  %v730_v26 = vld [vmem:[%s7191_s1 + $0x130] sm:$0xff] }
 0x584   : > { %v742_v30 = vpop.permute.xlu0 %741 }
 0x585   : > { %5932 = vpow2.f32 %v645_v27 }
 0x588   : > { %v832_v31 = vpop.permute.xlu0 %831 }
 0x58c   : > { %v828_v32 = vpop.permute.xlu0 %827 }
 0x590   : > { %v839_v33 = vpop.permute.xlu0 %838 }
 0x592   : > { %v5933_v28 = vpop.eup %5932 }
 0x593   : > { %v647_v29 = vsel %vm640_vm6, %v5933_v28, 0.0 }
 0x594   : > { %648 = vadd.xlane.f32.xlu1 %v647_v29  ;;  %v922_v34 = vpop.permute.xlu0 %921 }
 0x595   : > { %5503 = vmatpush3.msra.mxu0 %v922_v34 }
 0x596   : > { %5504 = vmatprep.subr.mxu0 %v5988_v1 }
 0x598   : > { %v918_v46 = vpop.permute.xlu0 %917 }
 0x5a5   : > { %735 = vrot.lane.b32.xlu1 %v6171_v55, %s5990_s5 }
 0x5a9   : > { %829 = vrot.lane.b32.xlu1 %v6197_v3, %s5990_s5 }
 0x5ad   : > { %825 = vrot.lane.b32.xlu1 %v6213_v5, %s5990_s5 }
 0x5b1   : > { %748 = vrot.lane.b32.xlu1 %v6263_v14, %s5990_s5 }
 0x5b5   : > { %919 = vrot.lane.b32.xlu1 %v6229_v7, %s5990_s5 }
 0x5b9   : > { %915 = vrot.lane.b32.xlu1 %v6245_v9, %s5990_s5 }
 0x61d   : > { %v649_v37 = vpop.xlane.xlu1 %648 }
 0x61e   : > { %5934 = vrcp.f32 %v649_v37 }
 0x621   : > { %v736_v38 = vpop.permute.xlu1 %735 }
 0x625   : > { %v830_v39 = vpop.permute.xlu1 %829 }
 0x629   : > { %v826_v40 = vpop.permute.xlu1 %825 }
 0x62b   : > { %v5935_v41 = vpop.eup %5934 }
 0x62c   : > { %v651_v42 = vmul.f32 %v5935_v41, %v5933_v28 }
 0x62d   : > { %v749_v43 = vpop.permute.xlu1 %748 }
 0x62e   : > { %5478 = vmatmul.mubr.msk.f32.vlgmr.msra.gmra.mxu1 %vm652_vm7, %v651_v42 }
 0x62f   : > { %5481 = vmatpush3.msra.mxu1 %v742_v30  ;;  %5488 = vmatprep.mubr.msk.f32.mxu1 %vm5989_vm2, %v5988_v1 }
 0x630   : > { %5482 = vmatprep.subr.mxu1 %v5988_v1 }
 0x631   : > { %5483 = vmatpush3.msra.mxu1 %v740_v35  ;;  %v920_v44 = vpop.permute.xlu1 %919 }
 0x632   : > { %5484 = vmatprep.subr.mxu1 %v5988_v1  ;;  %5505 = vmatpush3.msra.mxu0 %v920_v44 }
 0x633   : > { %5485 = vmatpush3.msra.mxu1 %v738_v36  ;;  %5506 = vmatprep.subr.mxu0 %v5988_v1 }
 0x634   : > { %5486 = vmatprep.subr.mxu1 %v5988_v1  ;;  %5507 = vmatpush3.msra.mxu0 %v918_v46 }
 0x635   : > { %5487 = vmatpush3.msra.mxu1 %v736_v38  ;;  %5508 = vmatprep.subr.mxu0 %v5988_v1  ;;  %v916_v47 = vpop.permute.xlu1 %915 }
 0x636   : > { %5489 = vmatmul.mubr.msk.f32.vlgmr.msra.gmra.mxu1 %vm331_vm3, %v6185_v0  ;;  %5491 = vmatprep.subr.mxu1 %v5988_v1 }
 0x637   : > { %5492 = vmatpush3.msra.mxu1 %v832_v31  ;;  %5509 = vmatpush3.msra.mxu0 %v916_v47 }
 0x638   : > { %5493 = vmatprep.subr.mxu1 %v5988_v1  ;;  %5511 = vmatmul.mubr.msk.f32.vlgmr.msra.gmra.mxu0 %vm331_vm3, %v6185_v0 }
 0x639   : > { %5494 = vmatpush3.msra.mxu1 %v830_v39  ;;  %5499 = vmatprep.mubr.msk.f32.mxu1 %vm5989_vm2, %v5988_v1 }
 0x63a   : > { %5495 = vmatprep.subr.mxu1 %v5988_v1  ;;  %5523 = vmatprep.subr.mxu0 %v5988_v1 }
 0x63b   : > { %5496 = vmatpush3.msra.mxu1 %v828_v32  ;;  %5525 = vmatprep.mubr.msk.f32.mxu0 %vm5989_vm2, %v5988_v1 }
 0x63c   : > { %5497 = vmatprep.subr.mxu1 %v5988_v1  ;;  %5524 = vmatpush3.msra.mxu0 %v1164_v21 }
 0x63d   : > { %5498 = vmatpush3.msra.mxu1 %v826_v40  ;;  %5533 = vmatprep.subr.mxu0 %v5988_v1 }
 0x63e   : > { %5500 = vmatmul.mubr.msk.f32.vlgmr.msra.gmra.mxu1 %vm331_vm3, %v6185_v0  ;;  %5513 = vmatprep.subr.mxu1 %v5988_v1 }
 0x63f   : > { %5515 = vmatprep.mubr.msk.f32.mxu1 %vm5989_vm2, %v5988_v1 }
 0x6ee   : > { %v726_v48 = vpop.f32.mrf.mxu1 }
 0x6f0   : > { %v5479_v49 = vpop.f32.mrf.mxu1 }
 0x6f6   : > { %v817_v50 = vpop.f32.mrf.mxu1 }
 0x6f7   : > { %v818_v61 = vadd.f32 %v817_v50, %v749_v43 }
 0x6f8   : > { %v5490_v51 = vpop.f32.mrf.mxu1  ;;  %v997_v56 = vpop.f32.mrf.mxu0 }
 0x6fa   : > { %v5512_v57 = vpop.f32.mrf.mxu0 }
 0x6fe   : > { %v907_v58 = vpop.f32.mrf.mxu1 }
 0x6ff   : > { %v908_v59 = vadd.f32 %v907_v58, %v839_v33 }
 0x700   : > { %v5501_v60 = vpop.f32.mrf.mxu1 }
 0x701   : > { %5514 = vmatpush3.xpose.msk.msra.mxu1 %vm563_vm4, %v908_v59 }
 0x702   : > { %5518 = vmatprep.subr.mxu1 %v5988_v1 }
 0x704   : > { %5516 = vmatmul.mubr.msk.f32.vlgmr.msra.gmra.mxu1 %vm563_vm4, %v818_v61 }
 0x705   : > { %5520 = vmatprep.mubr.msk.f32.mxu1 %vm5989_vm2, %v5988_v1 }
 0x7c4   : > { %v1073_v62 = vpop.f32.mrf.mxu1 }
 0x7c5   : > { %v1077_v63 = vsel %vm640_vm6, %v1073_v62, -inf }
 0x7c6   : > { %1078 = vmax.xlane.f32.xlu0 %v1077_v63  ;;  %v5517_v10 = vpop.f32.mrf.mxu1 }
 0x7dc   : > { %928 = vrot.lane.b32.xlu0 %v6273_v18, %s5990_s5 }
 0x7e0   : > { %1400 = vrot.lane.b32.xlu0 %v6197_v3, %s5991_s6 }
 0x7e4   : > { %1398 = vrot.lane.b32.xlu0 %v6206_v4, %s5991_s6 }
 0x7e8   : > { %1396 = vrot.lane.b32.xlu0 %v6213_v5, %s5991_s6 }
 0x7ec   : > { %1311 = vrot.lane.b32.xlu0 %v6171_v55, %s5991_s6 }
 0x7f0   : > { %1323 = vrot.lane.b32.xlu0 %v6263_v14, %s5991_s6 }
 0x7f4   : > { %1485 = vrot.lane.b32.xlu0 %v6229_v7, %s5991_s6 }
 0x7f8   : > { %1481 = vrot.lane.b32.xlu0 %v6245_v9, %s5991_s6 }
 0x84f   : > { %v1079_v11 = vpop.xlane.xlu0 %1078 }
 0x850   : > { %v1080_v13 = vsub.f32 %v1073_v62, %v1079_v11 }
 0x852   : > { %v1081_v15 = vmul.f32 1.442695, %v1080_v13 }
 0x853   : > { %v929_v16 = vpop.permute.xlu0 %928 }
 0x854   : > { %5936 = vpow2.f32 %v1081_v15  ;;  %v998_v17 = vadd.f32 %v997_v56, %v929_v16 }
 0x856   : > { %5519 = vmatpush3.msk.msra.mxu1 %vm656_vm5, %v998_v17 }
 0x857   : > { %5528 = vmatprep.subr.mxu1 %v5988_v1  ;;  %v1401_v23 = vpop.permute.xlu0 %1400 }
 0x85b   : > { %v1399_v28 = vpop.permute.xlu0 %1398 }
 0x85f   : > { %v1397_v29 = vpop.permute.xlu0 %1396 }
 0x861   : > { %v5937_v19 = vpop.eup %5936 }
 0x862   : > { %v1083_v20 = vsel %vm640_vm6, %v5937_v19, 0.0 }
 0x863   : > { %1084 = vadd.xlane.f32.xlu1 %v1083_v20  ;;  %v1312_v33 = vpop.permute.xlu0 %1311 }
 0x867   : > { %v1324_v36 = vpop.permute.xlu0 %1323 }
 0x86b   : > { %v1486_v41 = vpop.permute.xlu0 %1485 }
 0x86f   : > { %v1482_v46 = vpop.permute.xlu0 %1481 }
 0x874   : > { %1402 = vrot.lane.b32.xlu1 %v6190_v2, %s5991_s6 }
 0x878   : > { %1317 = vrot.lane.b32.xlu1 %v6150_v52, %s5991_s6 }
 0x87c   : > { %1315 = vrot.lane.b32.xlu1 %v6157_v53, %s5991_s6 }
 0x880   : > { %1313 = vrot.lane.b32.xlu1 %v6164_v54, %s5991_s6 }
 0x884   : > { %1408 = vrot.lane.b32.xlu1 %v6258_v12, %s5991_s6 }
 0x888   : > { %1487 = vrot.lane.b32.xlu1 %v6220_v6, %s5991_s6 }
 0x88c   : > { %1483 = vrot.lane.b32.xlu1 %v6238_v8, %s5991_s6 }
 0x8ec   : > { %v1085_v22 = vpop.xlane.xlu1 %1084 }
 0x8ed   : > { %5938 = vrcp.f32 %v1085_v22 }
 0x8f0   : > { %v1403_v27 = vpop.permute.xlu1 %1402 }
 0x8f4   : > { %v1318_v30 = vpop.permute.xlu1 %1317 }
 0x8f8   : > { %v1316_v31 = vpop.permute.xlu1 %1315 }
 0x8fa   : > { %v5939_v24 = vpop.eup %5938 }
 0x8fb   : > { %v1087_v25 = vmul.f32 %v5939_v24, %v5937_v19 }
 0x8fc   : > { %v1314_v32 = vpop.permute.xlu1 %1313 }
 0x8fd   : > { %5521 = vmatmul.mubr.msk.f32.vlgmr.msra.gmra.mxu1 %vm652_vm7, %v1087_v25 }
 0x8fe   : > { %5529 = vmatpush3.msra.mxu1 %v730_v26  ;;  %5530 = vmatprep.mubr.msk.f32.mxu1 %vm5989_vm2, %v5988_v1 }
 0x8ff   : > { %5544 = vmatprep.subr.mxu1 %v5988_v1 }
 0x900   : > { %v1409_v34 = vpop.permute.xlu1 %1408 }
 0x901   : > { %5531 = vmatmul.mubr.msk.f32.vlgmr.msra.gmra.mxu1 %vm563_vm4, %v726_v48 }
 0x902   : > { %5545 = vmatpush3.msra.mxu1 %v1403_v27  ;;  %5552 = vmatprep.mubr.msk.f32.mxu1 %vm5989_vm2, %v5988_v1 }
 0x903   : > { %5546 = vmatprep.subr.mxu1 %v5988_v1 }
 0x904   : > { %5547 = vmatpush3.msra.mxu1 %v1401_v23  ;;  %v1488_v39 = vpop.permute.xlu1 %1487 }
 0x905   : > { %5548 = vmatprep.subr.mxu1 %v5988_v1 }
 0x906   : > { %5549 = vmatpush3.msra.mxu1 %v1399_v28 }
 0x907   : > { %5550 = vmatprep.subr.mxu1 %v5988_v1 }
 0x908   : > { %5551 = vmatpush3.msra.mxu1 %v1397_v29  ;;  %v1484_v42 = vpop.permute.xlu1 %1483 }
 0x909   : > { %5553 = vmatmul.mubr.msk.f32.vlgmr.msra.gmra.mxu1 %vm331_vm3, %v6185_v0  ;;  %5566 = vmatprep.subr.mxu1 %v5988_v1 }
 0x90a   : > { %5568 = vmatprep.mubr.msk.f32.mxu1 %vm5989_vm2, %v5988_v1 }
 0x9bd   : > { %v1160_v35 = vpop.f32.mrf.mxu1 }
 0x9be   : > { %5526 = vmatmul.mubr.msk.f32.vlgmr.msra.gmra.mxu0 %vm563_vm4, %v1160_v35 }
 0x9bf   : > { %5534 = vmatpush3.msra.mxu0 %v1318_v30  ;;  %v5522_v37 = vpop.f32.mrf.mxu1  ;;  %5541 = vmatprep.mubr.msk.f32.mxu0 %vm5989_vm2, %v5988_v1 }
 0x9c0   : > { %5535 = vmatprep.subr.mxu0 %v5988_v1 }
 0x9c1   : > { %5536 = vmatpush3.msra.mxu0 %v1316_v31  ;;  %v6402_v38 = vpop.f32.mrf.mxu1 }
 0x9c2   : > { %5537 = vmatprep.subr.mxu0 %v5988_v1 }
 0x9c3   : > { %5538 = vmatpush3.msra.mxu0 %v1314_v32  ;;  %v5532_v40 = vpop.f32.mrf.mxu1 }
 0x9c4   : > { %5539 = vmatprep.subr.mxu0 %v5988_v1 }
 0x9c5   : > { %5540 = vmatpush3.msra.mxu0 %v1312_v33 }
 0x9c6   : > { %5542 = vmatmul.mubr.msk.f32.vlgmr.msra.gmra.mxu0 %vm331_vm3, %v6185_v0  ;;  %5555 = vmatprep.subr.mxu0 %v5988_v1 }
 0x9c7   : > { %5556 = vmatpush3.msra.mxu0 %v1488_v39  ;;  %5563 = vmatprep.mubr.msk.f32.mxu0 %vm5989_vm2, %v5988_v1 }
 0x9c8   : > { %5557 = vmatprep.subr.mxu0 %v5988_v1 }
 0x9c9   : > { %v1477_v43 = vpop.f32.mrf.mxu1  ;;  %5558 = vmatpush3.msra.mxu0 %v1486_v41 }
 0x9ca   : > { %v1478_v44 = vadd.f32 %v1477_v43, %v1409_v34  ;;  %5559 = vmatprep.subr.mxu0 %v5988_v1 }
 0x9cb   : > { %v5554_v47 = vpop.f32.mrf.mxu1  ;;  %5560 = vmatpush3.msra.mxu0 %v1484_v42 }
 0x9cc   : > { %5561 = vmatprep.subr.mxu0 %v5988_v1  ;;  %5567 = vmatpush3.xpose.msk.msra.mxu1 %vm563_vm4, %v1478_v44 }
 0x9cd   : > { %5562 = vmatpush3.msra.mxu0 %v1482_v46  ;;  %5571 = vmatprep.subr.mxu1 %v5988_v1  ;;  %v2222_v46 = vld [vmem:[%s7191_s1 + $0x148] sm:$0xff] }
 0x9ce   : > { %5564 = vmatmul.mubr.msk.f32.vlgmr.msra.gmra.mxu0 %vm331_vm3, %v6185_v0  ;;  %5576 = vmatprep.subr.mxu0 %v5988_v1 }
 0x9cf   : > { %5578 = vmatprep.mubr.msk.f32.mxu0 %vm5989_vm2, %v5988_v1 }
 0xa7e   : > { %v6421_v48 = vpop.f32.mrf.mxu0 }
 0xa7f   : > { %v1308_v28 = vadd.f32 %v6402_v38, %v6421_v48 }
 0xa80   : > { %v5527_v49 = vpop.f32.mrf.mxu0 }
 0xa86   : > { %v1392_v50 = vpop.f32.mrf.mxu0 }
 0xa87   : > { %v1393_v51 = vadd.f32 %v1392_v50, %v1324_v36 }
 0xa88   : > { %v5543_v56 = vpop.f32.mrf.mxu0 }
 0xa89   : > { %5569 = vmatmul.mubr.msk.f32.vlgmr.msra.gmra.mxu1 %vm563_vm4, %v1393_v51 }
 0xa8a   : > { %5573 = vmatprep.mubr.msk.f32.mxu1 %vm5989_vm2, %v5988_v1 }
 0xa8e   : > { %v1562_v57 = vpop.f32.mrf.mxu0 }
 0xa90   : > { %v5565_v58 = vpop.f32.mrf.mxu0 }
 0xb49   : > { %v1638_v59 = vpop.f32.mrf.mxu1 }
 0xb4a   : > { %v1642_v60 = vsel %vm640_vm6, %v1638_v59, -inf }
 0xb4b   : > { %1643 = vmax.xlane.f32.xlu1 %v1642_v60  ;;  %v5570_v61 = vpop.f32.mrf.mxu1 }
 0xb5c   : > { %1895 = vrot.lane.b32.xlu1 %v6190_v2, %s5992_s11 }
 0xb60   : > { %1893 = vrot.lane.b32.xlu1 %v6197_v3, %s5992_s11 }
 0xb64   : > { %1891 = vrot.lane.b32.xlu1 %v6206_v4, %s5992_s11 }
 0xb68   : > { %1889 = vrot.lane.b32.xlu1 %v6213_v5, %s5992_s11 }
 0xb6c   : > { %1804 = vrot.lane.b32.xlu1 %v6171_v55, %s5992_s11  ;;  %v1729_v55 = vld [vmem:[%s7191_s1 + $0x140] sm:$0xff] }
 0xb6d   : > { %5577 = vmatpush3.msra.mxu0 %v1729_v55  ;;  %v2332_v55 = vld [vmem:[%s7191_s1 + $0x168] sm:$0xff] }
 0xb6e   : > { %5592 = vmatprep.subr.mxu0 %v5988_v1 }
 0xb70   : > { %1816 = vrot.lane.b32.xlu1 %v6263_v14, %s5992_s11 }
 0xb74   : > { %1978 = vrot.lane.b32.xlu1 %v6229_v7, %s5992_s11 }
 0xb78   : > { %1974 = vrot.lane.b32.xlu1 %v6245_v9, %s5992_s11 }
 0xbd4   : > { %v1644_v2 = vpop.xlane.xlu1 %1643 }
 0xbd5   : > { %v1645_v3 = vsub.f32 %v1638_v59, %v1644_v2 }
 0xbd7   : > { %v1646_v62 = vmul.f32 1.442695, %v1645_v3 }
 0xbd9   : > { %5940 = vpow2.f32 %v1646_v62 }
 0xbe6   : > { %v5941_v4 = vpop.eup %5940 }
 0xbe7   : > { %v1648_v63 = vsel %vm640_vm6, %v5941_v4, 0.0 }
 0xbe8   : > { %1649 = vadd.xlane.f32.xlu0 %v1648_v63 }
 0xbfe   : > { %1493 = vrot.lane.b32.xlu0 %v6273_v18, %s5991_s6 }
 0xc02   : > { %1810 = vrot.lane.b32.xlu0 %v6150_v52, %s5992_s11  ;;  %v1896_v52 = vpop.permute.xlu1 %1895 }
 0xc06   : > { %1808 = vrot.lane.b32.xlu0 %v6157_v53, %s5992_s11  ;;  %v1894_v53 = vpop.permute.xlu1 %1893 }
 0xc0a   : > { %1806 = vrot.lane.b32.xlu0 %v6164_v54, %s5992_s11  ;;  %v1892_v5 = vpop.permute.xlu1 %1891 }
 0xc0e   : > { %1901 = vrot.lane.b32.xlu0 %v6258_v12, %s5992_s11  ;;  %v1890_v12 = vpop.permute.xlu1 %1889 }
 0xc12   : > { %1980 = vrot.lane.b32.xlu0 %v6220_v6, %s5992_s11  ;;  %v1805_v14 = vpop.permute.xlu1 %1804 }
 0xc16   : > { %1976 = vrot.lane.b32.xlu0 %v6238_v8, %s5992_s11  ;;  %v1817_v8 = vpop.permute.xlu1 %1816 }
 0xc1a   : > { %v1979_v17 = vpop.permute.xlu1 %1978 }
 0xc1e   : > { %v1975_v21 = vpop.permute.xlu1 %1974 }
 0xc71   : > { %v1650_v54 = vpop.xlane.xlu0 %1649 }
 0xc72   : > { %5942 = vrcp.f32 %v1650_v54 }
 0xc75   : > { %v1494_v7 = vpop.permute.xlu0 %1493 }
 0xc76   : > { %v1563_v9 = vadd.f32 %v1562_v57, %v1494_v7  ;;  %v5170_v57 = vld [vmem:[%s7191_s1 + $0x1f5] ss:$0 sm:$0xff] }
 0xc78   : > { %5572 = vmatpush3.msk.msra.mxu1 %vm656_vm5, %v1563_v9 }
 0xc79   : > { %v1811_v6 = vpop.permute.xlu0 %1810  ;;  %5581 = vmatprep.subr.mxu1 %v5988_v1 }
 0xc7d   : > { %v1809_v10 = vpop.permute.xlu0 %1808 }
 0xc7f   : > { %v5943_v11 = vpop.eup %5942 }
 0xc80   : > { %v1652_v13 = vmul.f32 %v5943_v11, %v5941_v4 }
 0xc81   : > { %v1807_v15 = vpop.permute.xlu0 %1806 }
 0xc82   : > { %5574 = vmatmul.mubr.msk.f32.vlgmr.msra.gmra.mxu1 %vm652_vm7, %v1652_v13  ;;  %v2453_v13 = vld [vmem:[%s7191_s1 + $0x1e8] sm:$0xff] }
 0xc83   : > { %5582 = vmatpush3.msra.mxu1 %v1811_v6  ;;  %5589 = vmatprep.mubr.msk.f32.mxu1 %vm5989_vm2, %v5988_v1 }
 0xc84   : > { %5583 = vmatprep.subr.mxu1 %v5988_v1 }
 0xc85   : > { %5584 = vmatpush3.msra.mxu1 %v1809_v10  ;;  %v1902_v16 = vpop.permute.xlu0 %1901 }
 0xc86   : > { %5585 = vmatprep.subr.mxu1 %v5988_v1 }
 0xc87   : > { %5586 = vmatpush3.msra.mxu1 %v1807_v15  ;;  %v2452_v15 = vld [vmem:[%s7191_s1 + $0x1e0] sm:$0xff] }
 0xc88   : > { %5587 = vmatprep.subr.mxu1 %v5988_v1 }
 0xc89   : > { %5588 = vmatpush3.msra.mxu1 %v1805_v14  ;;  %v1981_v19 = vpop.permute.xlu0 %1980  ;;  %v5172_v14 = vld [vmem:[%s7191_s1 + $0x1f7] ss:$0 sm:$0xff] }
 0xc8a   : > { %5590 = vmatmul.mubr.msk.f32.vlgmr.msra.gmra.mxu1 %vm331_vm3, %v6185_v0  ;;  %5603 = vmatprep.subr.mxu1 %v5988_v1 }
 0xc8b   : > { %5604 = vmatpush3.msra.mxu1 %v1981_v19  ;;  %5611 = vmatprep.mubr.msk.f32.mxu1 %vm5989_vm2, %v5988_v1  ;;  %v2448_v19 = vld [vmem:[%s7191_s1 + $0x1c0] sm:$0xff] }
 0xc8c   : > { %5605 = vmatprep.subr.mxu1 %v5988_v1 }
 0xc8d   : > { %5606 = vmatpush3.msra.mxu1 %v1979_v17  ;;  %v1977_v20 = vpop.permute.xlu0 %1976  ;;  %v2449_v17 = vld [vmem:[%s7191_s1 + $0x1c8] sm:$0xff] }
 0xc8e   : > { %5607 = vmatprep.subr.mxu1 %v5988_v1 }
 0xc8f   : > { %5608 = vmatpush3.msra.mxu1 %v1977_v20  ;;  %v2447_v20 = vld [vmem:[%s7191_s1 + $0x1b8] sm:$0xff] }
 0xc90   : > { %5609 = vmatprep.subr.mxu1 %v5988_v1 }
 0xc91   : > { %5610 = vmatpush3.msra.mxu1 %v1975_v21  ;;  %v2446_v21 = vld [vmem:[%s7191_s1 + $0x1b0] sm:$0xff] }
 0xc92   : > { %5612 = vmatmul.mubr.msk.f32.vlgmr.msra.gmra.mxu1 %vm331_vm3, %v6185_v0  ;;  %5624 = vmatprep.subr.mxu1 %v5988_v1 }
 0xc93   : > { %5626 = vmatprep.mubr.msk.f32.mxu1 %vm5989_vm2, %v5988_v1  ;;  %5625 = vmatpush3.msra.mxu1 %v2222_v46 }
 0xc94   : > { %5640 = vmatprep.subr.mxu1 %v5988_v1 }
 0xd42   : > { %v1725_v22 = vpop.f32.mrf.mxu1 }
 0xd43   : > { %5579 = vmatmul.mubr.msk.f32.vlgmr.msra.gmra.mxu0 %vm563_vm4, %v1725_v22  ;;  %v2445_v22 = vld [vmem:[%s7191_s1 + $0x1a8] sm:$0xff] }
 0xd44   : > { %5593 = vmatpush3.msra.mxu0 %v1896_v52  ;;  %v5575_v23 = vpop.f32.mrf.mxu1  ;;  %5600 = vmatprep.mubr.msk.f32.mxu0 %vm5989_vm2, %v5988_v1  ;;  %v2330_v52 = vld [vmem:[%s7191_s1 + $0x158] sm:$0xff] }
 0xd45   : > { %5594 = vmatprep.subr.mxu0 %v5988_v1  ;;  %v2444_v23 = vld [vmem:[%s7191_s1 + $0x1a0] sm:$0xff] }
 0xd46   : > { %5595 = vmatpush3.msra.mxu0 %v1894_v53  ;;  %v2329_v53 = vld [vmem:[%s7191_s1 + $0x150] sm:$0xff] }
 0xd47   : > { %5596 = vmatprep.subr.mxu0 %v5988_v1 }
 0xd48   : > { %5597 = vmatpush3.msra.mxu0 %v1892_v5 }
 0xd49   : > { %5598 = vmatprep.subr.mxu0 %v5988_v1 }
 0xd4a   : > { %v1885_v24 = vpop.f32.mrf.mxu1  ;;  %5599 = vmatpush3.msra.mxu0 %v1890_v12  ;;  %v5171_v12 = vld [vmem:[%s7191_s1 + $0x1f6] ss:$0 sm:$0xff] }
 0xd4b   : > { %5601 = vmatmul.mubr.msk.f32.vlgmr.msra.gmra.mxu0 %vm331_vm3, %v6185_v0  ;;  %5614 = vmatprep.subr.mxu0 %v5988_v1  ;;  %v1886_v0 = vadd.f32 %v1885_v24, %v1817_v8  ;;  %v2451_v8 = vld [vmem:[%s7191_s1 + $0x1d8] sm:$0xff] }
 0xd4c   : > { %v5591_v25 = vpop.f32.mrf.mxu1  ;;  %5616 = vmatprep.mubr.msk.f32.mxu0 %vm5989_vm2, %v5988_v1  ;;  %v2443_v24 = vld [vmem:[%s7191_s1 + $0x198] sm:$0xff] }
 0xd4d   : > { %v2442_v25 = vld [vmem:[%s7191_s1 + $0x190] sm:$0xff] }
 0xd52   : > { %v2055_v26 = vpop.f32.mrf.mxu1 }
 0xd54   : > { %v5613_v27 = vpop.f32.mrf.mxu1 }
 0xd55   : > { %v2440_v27 = vld [vmem:[%s7191_s1 + $0x180] sm:$0xff] }
 0xe03   : > { %v1799_v29 = vpop.f32.mrf.mxu0 }
 0xe04   : > { %v1803_v30 = vadd.f32 %v1799_v29, %v1308_v28  ;;  %v2439_v28 = vld [vmem:[%s7191_s1 + $0x178] sm:$0xff]  ;;  %v2438_v29 = vld [vmem:[%s7191_s1 + $0x170] sm:$0xff] }
 0xe05   : > { %v5580_v31 = vpop.f32.mrf.mxu0 }
 0xe0b   : > { %v1970_v32 = vpop.f32.mrf.mxu0 }
 0xe0c   : > { %v1971_v33 = vadd.f32 %v1970_v32, %v1902_v16  ;;  %v2450_v16 = vld [vmem:[%s7191_s1 + $0x1d0] sm:$0xff] }
 0xe0d   : > { %v5602_v34 = vpop.f32.mrf.mxu0 }
 0xe0e   : > { %5615 = vmatpush3.xpose.msk.msra.mxu0 %vm563_vm4, %v1971_v33 }
 0xe0f   : > { %5619 = vmatprep.subr.mxu0 %v5988_v1 }
 0xe11   : > { %5617 = vmatmul.mubr.msk.f32.vlgmr.msra.gmra.mxu0 %vm563_vm4, %v1886_v0 }
 0xe12   : > { %5621 = vmatprep.mubr.msk.f32.mxu0 %vm5989_vm2, %v5988_v1 }
 0xed1   : > { %v2131_v35 = vpop.f32.mrf.mxu0 }
 0xed2   : > { %v2135_v36 = vsel %vm640_vm6, %v2131_v35, -inf }
 0xed3   : > { %2136 = vmax.xlane.f32.xlu0 %v2135_v36  ;;  %v5618_v37 = vpop.f32.mrf.mxu0 }
 0xee9   : > { %1986 = vrot.lane.b32.xlu0 %v6273_v18, %s5992_s11 }
 0xf5c   : > { %v2137_v38 = vpop.xlane.xlu0 %2136 }
 0xf5d   : > { %v2138_v39 = vsub.f32 %v2131_v35, %v2137_v38 }
 0xf5f   : > { %v2139_v40 = vmul.f32 1.442695, %v2138_v39 }
 0xf60   : > { %v1987_v41 = vpop.permute.xlu0 %1986 }
 0xf61   : > { %5944 = vpow2.f32 %v2139_v40  ;;  %v2056_v42 = vadd.f32 %v2055_v26, %v1987_v41  ;;  %v2441_v26 = vld [vmem:[%s7191_s1 + $0x188] sm:$0xff] }
 0xf63   : > { %5620 = vmatpush3.msk.msra.mxu0 %vm656_vm5, %v2056_v42 }
 0xf64   : > { %5629 = vmatprep.subr.mxu0 %v5988_v1 }
 0xf6e   : > { %v5945_v43 = vpop.eup %5944 }
 0xf6f   : > { %v2141_v44 = vsel %vm640_vm6, %v5945_v43, 0.0 }
 0xf70   : > { %2142 = vadd.xlane.f32.xlu1 %v2141_v44 }
 0xff9   : > { %v2143_v18 = vpop.xlane.xlu1 %2142 }
 0xffa   : > { %5946 = vrcp.f32 %v2143_v18 }
0x1007   : > { %v5947_v47 = vpop.eup %5946 }
0x1008   : > { %v2145_v48 = vmul.f32 %v5947_v47, %v5945_v43 }
0x100a   : > { %5622 = vmatmul.mubr.msk.f32.vlgmr.msra.gmra.mxu0 %vm652_vm7, %v2145_v48 }
0x100b   : > { %5637 = vmatprep.mubr.msk.f32.mxu0 %vm5989_vm2, %v5988_v1  ;;  %5630 = vmatpush3.msra.mxu0 %v2332_v55 }
0x100c   : > { %5631 = vmatprep.subr.mxu0 %v5988_v1 }
0x10ca   : > { %v2218_v49 = vpop.f32.mrf.mxu0 }
0x10cb   : > { %5627 = vmatmul.mubr.msk.f32.vlgmr.msra.gmra.mxu1 %vm563_vm4, %v2218_v49 }
0x10cc   : > { %v5623_v50 = vpop.f32.mrf.mxu0  ;;  %5672 = vmatprep.mubr.msk.f32.mxu1 %vm5989_vm2, %v5988_v1  ;;  %5641 = vmatpush3.msra.mxu1 %v2453_v13 }
0x10cd   : > { %5642 = vmatprep.subr.mxu1 %v5988_v1 }
0x10ce   : > { %5643 = vmatpush3.msra.mxu1 %v2452_v15 }
0x10cf   : > { %5644 = vmatprep.subr.mxu1 %v5988_v1 }
0x10d0   : > { %5645 = vmatpush3.msra.mxu1 %v2451_v8 }
0x10d1   : > { %5646 = vmatprep.subr.mxu1 %v5988_v1 }
0x10d2   : > { %5647 = vmatpush3.msra.mxu1 %v2450_v16 }
0x10d3   : > { %5648 = vmatprep.subr.mxu1 %v5988_v1 }
0x10d4   : > { %5649 = vmatpush3.msra.mxu1 %v2449_v17  ;;  %v5176_v17 = vld [vmem:[%s7191_s1 + $0x320] ss:$0 sm:$0xff] }
0x10d5   : > { %5650 = vmatprep.subr.mxu1 %v5988_v1 }
0x10d6   : > { %5651 = vmatpush3.msra.mxu1 %v2448_v19 }
0x10d7   : > { %5652 = vmatprep.subr.mxu1 %v5988_v1 }
0x10d8   : > { %5653 = vmatpush3.msra.mxu1 %v2447_v20  ;;  %v5177_v20 = vld [vmem:[%s7191_s1 + $0x321] ss:$0 sm:$0xff] }
0x10d9   : > { %5654 = vmatprep.subr.mxu1 %v5988_v1 }
0x10da   : > { %5655 = vmatpush3.msra.mxu1 %v2446_v21 }
0x10db   : > { %5656 = vmatprep.subr.mxu1 %v5988_v1 }
0x10dc   : > { %5657 = vmatpush3.msra.mxu1 %v2445_v22 }
0x10dd   : > { %5658 = vmatprep.subr.mxu1 %v5988_v1 }
0x10de   : > { %5659 = vmatpush3.msra.mxu1 %v2444_v23  ;;  %v6701_v23 = vld [vmem:[%s7191_s1 + $0x228] sm:$0xff] }
0x10df   : > { %5660 = vmatprep.subr.mxu1 %v5988_v1 }
0x10e0   : > { %5661 = vmatpush3.msra.mxu1 %v2443_v24  ;;  %v6710_v24 = vld [vmem:[%s7191_s1 + $0x258] sm:$0xff] }
0x10e1   : > { %5662 = vmatprep.subr.mxu1 %v5988_v1 }
0x10e2   : > { %5663 = vmatpush3.msra.mxu1 %v2442_v25  ;;  %v6719_v25 = vld [vmem:[%s7191_s1 + $0x250] sm:$0xff] }
0x10e3   : > { %5664 = vmatprep.subr.mxu1 %v5988_v1 }
0x10e4   : > { %5665 = vmatpush3.msra.mxu1 %v2441_v26  ;;  %v6728_v26 = vld [vmem:[%s7191_s1 + $0x248] sm:$0xff] }
0x10e5   : > { %5666 = vmatprep.subr.mxu1 %v5988_v1 }
0x10e6   : > { %5667 = vmatpush3.msra.mxu1 %v2440_v27  ;;  %v6735_v27 = vld [vmem:[%s7191_s1 + $0x240] sm:$0xff] }
0x10e7   : > { %5668 = vmatprep.subr.mxu1 %v5988_v1 }
0x10e8   : > { %5669 = vmatpush3.msra.mxu1 %v2439_v28 }
0x10e9   : > { %5670 = vmatprep.subr.mxu1 %v5988_v1 }
0x10ea   : > { %5671 = vmatpush3.msra.mxu1 %v2438_v29 }
0x10eb   : > { %5713 = vmatprep.subr.mxu1 %v5988_v1 }
0x118b   : > { %v2292_v51 = vpop.f32.mrf.mxu1 }
0x118c   : > { %v2296_v56 = vadd.f32 %v2292_v51, %v1803_v30  ;;  %v5173_v30 = vld [vmem:[%s7191_s1 + $0x1f8] ss:$0 sm:$0xff] }
0x118d   : > { %v5628_v58 = vpop.f32.mrf.mxu1 }
0x118e   : > { %v2297_v59 = vadd.f32 %v2296_v56, %v6141_v45  ;;  %v2331_v45 = vld [vmem:[%s7191_s1 + $0x160] sm:$0xff] }
0x118f   : > { %5632 = vmatpush3.msra.mxu0 %v2331_v45 }
0x1190   : > { %v6521_v60 = vadd.f32 %v5170_v57, %v2297_v59  ;;  %5633 = vmatprep.subr.mxu0 %v5988_v1 }
0x1191   : > { %5634 = vmatpush3.msra.mxu0 %v2330_v52 }
0x1192   : > { %v2306_v61 = vsel %vm272_vm1, %v6521_v60, 0.0  ;;  %5635 = vmatprep.subr.mxu0 %v5988_v1 }
0x1193   : > { %2307 = vadd.xlane.f32.xlu1 %v2306_v61  ;;  %5636 = vmatpush3.msra.mxu0 %v2329_v53 }
0x1194   : > { %5675 = vmatprep.subr.mxu0 %v5988_v1 }
0x121c   : > { %v2308_v2 = vpop.xlane.xlu1 %2307 }
0x121d   : > { %v2309_v3 = vmul.f32 0.03125, %v2308_v2 }
0x121f   : > { %v2310_v62 = vsub.f32 %v6521_v60, %v2309_v3 }
0x1221   : > { %v2311_v4 = vmul.f32 %v2310_v62, %v2310_v62 }
0x1223   : > { %v2312_v63 = vsel %vm272_vm1, %v2311_v4, 0.0 }
0x1224   : > { %2313 = vadd.xlane.f32.xlu1 %v2312_v63 }
0x12ad   : > { %v2314_v5 = vpop.xlane.xlu1 %2313 }
0x12ae   : > { %v2315_v54 = vmul.f32 0.03125, %v2314_v5 }
0x12b0   : > { %v2316_v7 = vadd.f32 1e-05, %v2315_v54 }
0x12b2   : > { %5948 = vrsqrt.f32 %v2316_v7 }
0x12bf   : > { %v5949_v9 = vpop.eup %5948 }
0x12c0   : > { %v2318_v6 = vmul.f32 %v5949_v9, %v2310_v62  ;;  %v5175_v62 = vld [vmem:[%s7191_s1 + $0x1f9] ss:$0 sm:$0xff] }
0x12c1   : > { %v6634_v9 = vld [vmem:[%s7191_s1 + $0x218] sm:$0xff] }
0x12c2   : > { %v2323_v10 = vmul.f32 %v5171_v12, %v2318_v6  ;;  %v6648_v12 = vld [vmem:[%s7191_s1 + $0x208] sm:$0xff]  ;;  %v6655_v6 = vld [vmem:[%s7191_s1 + $0x200] sm:$0xff] }
0x12c4   : > { %v2328_v11 = vadd.f32 %v5172_v14, %v2323_v10  ;;  %v6662_v14 = vld [vmem:[%s7191_s1 + $0x238] sm:$0xff]  ;;  %v6669_v10 = vld [vmem:[%s7191_s1 + $0x230] sm:$0xff] }
0x12c6   : > { %5638 = vmatmul.mubr.msk.f32.vlgmr.msra.gmra.mxu0 %vm331_vm3, %v2328_v11  ;;  %v6680_v11 = vld [vmem:[%s7191_s1 + $0x220] sm:$0xff] }
0x12c7   : > { %5683 = vmatprep.mubr.msk.f32.mxu0 %vm5989_vm2, %v5988_v1  ;;  %5676 = vmatpush3.msra.mxu0 %v6634_v9 }
0x12c8   : > { %5677 = vmatprep.subr.mxu0 %v5988_v1 }
0x1386   : > { %v2407_v31 = vpop.f32.mrf.mxu0 }
0x1387   : > { %v2408_v32 = vadd.f32 %v5173_v30, %v2407_v31  ;;  %v6748_v30 = vld [vmem:[%s7191_s1 + $0x323] ss:$0 sm:$0xff] }
0x1388   : > { %v5639_v33 = vpop.f32.mrf.mxu0 }
0x1389   : > { %v2411_v34 = vmul.f32 0.70710677, %v2408_v32  ;;  %v2435_v59 = vmul.f32 0.5, %v2408_v32  ;;  %v6753_v32 = vld [vmem:[%s7191_s1 + $0x322] ss:$0 sm:$0xff] }
0x138b   : > { %v2412_v0 = vand.u32 2147483647, %v2411_v34  ;;  %vm2432_vm8 = vcmp.lt.f32.partialorder %v2411_v34, 0.0 }
0x138d   : > { %v2413_v35 = vmul.f32 0.3275911, %v2412_v0  ;;  %v2426_v37 = vsub.f32 0.0, %v2412_v0 }
0x138f   : > { %v2414_v36 = vadd.f32 1.0, %v2413_v35  ;;  %v2427_v38 = vmul.f32 %v2426_v37, %v2412_v0  ;;  %v6763_v35 = vld [vmem:[%s7191_s1 + $0x324] ss:$0 sm:$0xff] }
0x1391   : > { %5950 = vrcp.f32 %v2414_v36  ;;  %v2428_v41 = vmul.f32 1.442695, %v2427_v38 }
0x1393   : > { %5952 = vpow2.f32 %v2428_v41 }
0x139e   : > { %v5951_v39 = vpop.eup %5950 }
0x139f   : > { %v2417_v40 = vmul.f32 1.0614054, %v5951_v39 }
0x13a0   : > { %v5953_v50 = vpop.eup %5952 }
0x13a1   : > { %v2418_v42 = vadd.f32 -1.4531521, %v2417_v40 }
0x13a3   : > { %v2419_v43 = vmul.f32 %v5951_v39, %v2418_v42 }
0x13a5   : > { %v2420_v44 = vadd.f32 1.4214138, %v2419_v43 }
0x13a7   : > { %v2421_v46 = vmul.f32 %v5951_v39, %v2420_v44 }
0x13a9   : > { %v2422_v18 = vadd.f32 -0.28449672, %v2421_v46 }
0x13ab   : > { %v2423_v47 = vmul.f32 %v5951_v39, %v2422_v18 }
0x13ad   : > { %v2424_v48 = vadd.f32 0.2548296, %v2423_v47 }
0x13af   : > { %v2425_v49 = vmul.f32 %v5951_v39, %v2424_v48 }
0x13b1   : > { %v2430_v51 = vmul.f32 %v5953_v50, %v2425_v49 }
0x13b3   : > { %v2431_v56 = vsub.f32 1.0, %v2430_v51 }
0x13b5   : > { %v2433_v57 = vsub.f32 0.0, %v2431_v56 }
0x13b7   : > { %v2434_v58 = vsel %vm2432_vm8, %v2433_v57, %v2431_v56 }
0x13b8   : > { %v2436_v61 = vadd.f32 1.0, %v2434_v58 }
0x13ba   : > { %v2437_v2 = vmul.f32 %v2436_v61, %v2435_v59 }
0x13bc   : > { %5673 = vmatmul.mubr.f32.vlgmr.msra.gmra.mxu1 %v2437_v2 }
0x13bd   : > { %5715 = vmatprep.mubr.msk.f32.mxu1 %vm5989_vm2, %v5988_v1 }
0x147c   : > { %v2520_v3 = vpop.f32.mrf.mxu1 }
0x147d   : > { %v2524_v4 = vadd.f32 %v2520_v3, %v6521_v60  ;;  %v6641_v60 = vld [vmem:[%s7191_s1 + $0x210] sm:$0xff] }
0x147e   : > { %v5674_v63 = vpop.f32.mrf.mxu1  ;;  %5678 = vmatpush3.msra.mxu0 %v6641_v60 }
0x147f   : > { %v6625_v55 = vadd.f32 %v5175_v62, %v2524_v4  ;;  %5679 = vmatprep.subr.mxu0 %v5988_v1 }
0x1480   : > { %5680 = vmatpush3.msra.mxu0 %v6648_v12 }
0x1481   : > { %v2533_v45 = vsel %vm272_vm1, %v6625_v55, 0.0  ;;  %5681 = vmatprep.subr.mxu0 %v5988_v1 }
0x1482   : > { %2534 = vadd.xlane.f32.xlu1 %v2533_v45  ;;  %5682 = vmatpush3.msra.mxu0 %v6655_v6 }
0x1483   : > { %5686 = vmatprep.subr.mxu0 %v5988_v1 }
0x150b   : > { %v2535_v52 = vpop.xlane.xlu1 %2534 }
0x150c   : > { %v2536_v53 = vmul.f32 0.03125, %v2535_v52 }
0x150e   : > { %v2537_v5 = vsub.f32 %v6625_v55, %v2536_v53 }
0x1510   : > { %v2538_v54 = vmul.f32 %v2537_v5, %v2537_v5 }
0x1512   : > { %v2539_v7 = vsel %vm272_vm1, %v2538_v54, 0.0 }
0x1513   : > { %2540 = vadd.xlane.f32.xlu1 %v2539_v7 }
0x1524   : > { %3060 = vrot.lane.b32.xlu1 %v6662_v14, %s5990_s5 }
0x1528   : > { %3058 = vrot.lane.b32.xlu1 %v6669_v10, %s5990_s5 }
0x152c   : > { %2970 = vrot.lane.b32.xlu1 %v6634_v9, %s5990_s5 }
0x1530   : > { %2968 = vrot.lane.b32.xlu1 %v6641_v60, %s5990_s5 }
0x1534   : > { %3054 = vrot.lane.b32.xlu1 %v6680_v11, %s5990_s5 }
0x159c   : > { %v2541_v13 = vpop.xlane.xlu1 %2540 }
0x159d   : > { %v2542_v15 = vmul.f32 0.03125, %v2541_v13 }
0x159f   : > { %v2543_v8 = vadd.f32 1e-05, %v2542_v15 }
0x15a0   : > { %v3061_v42 = vpop.permute.xlu1 %3060 }
0x15a1   : > { %5954 = vrsqrt.f32 %v2543_v8 }
0x15a4   : > { %v3059_v43 = vpop.permute.xlu1 %3058 }
0x15a8   : > { %v2971_v44 = vpop.permute.xlu1 %2970 }
0x15ac   : > { %v2969_v46 = vpop.permute.xlu1 %2968 }
0x15ae   : > { %v5955_v16 = vpop.eup %5954 }
0x15af   : > { %v2545_v19 = vmul.f32 %v5955_v16, %v2537_v5 }
0x15b0   : > { %v3055_v51 = vpop.permute.xlu1 %3054 }
0x15b1   : > { %v2550_v21 = vmul.f32 %v5176_v17, %v2545_v19 }
0x15b3   : > { %v6690_v22 = vadd.f32 %v5177_v20, %v2550_v21 }
0x15b5   : > { %5684 = vmatmul.mubr.msk.f32.vlgmr.msra.gmra.mxu0 %vm331_vm3, %v6690_v22 }
0x15b6   : > { %5687 = vmatpush3.msra.mxu0 %v6662_v14  ;;  %5694 = vmatprep.mubr.msk.f32.mxu0 %vm5989_vm2, %v5988_v1 }
0x15b7   : > { %5688 = vmatprep.subr.mxu0 %v5988_v1 }
0x15b8   : > { %5689 = vmatpush3.msra.mxu0 %v6669_v10 }
0x15b9   : > { %5690 = vmatprep.subr.mxu0 %v5988_v1 }
0x15ba   : > { %5691 = vmatpush3.msra.mxu0 %v6701_v23 }
0x15bb   : > { %5692 = vmatprep.subr.mxu0 %v5988_v1 }
0x15bc   : > { %5693 = vmatpush3.msra.mxu0 %v6680_v11 }
0x15bd   : > { %5695 = vmatmul.mubr.msk.f32.vlgmr.msra.gmra.mxu0 %vm331_vm3, %v6690_v22  ;;  %5697 = vmatprep.subr.mxu0 %v5988_v1 }
0x15be   : > { %5698 = vmatpush3.msra.mxu0 %v6710_v24  ;;  %5705 = vmatprep.mubr.msk.f32.mxu0 %vm5989_vm2, %v5988_v1 }
0x15bf   : > { %5699 = vmatprep.subr.mxu0 %v5988_v1 }
0x15c0   : > { %5700 = vmatpush3.msra.mxu0 %v6719_v25 }
0x15c1   : > { %5701 = vmatprep.subr.mxu0 %v5988_v1 }
0x15c2   : > { %5702 = vmatpush3.msra.mxu0 %v6728_v26 }
0x15c3   : > { %5703 = vmatprep.subr.mxu0 %v5988_v1 }
0x15c4   : > { %5704 = vmatpush3.msra.mxu0 %v6735_v27 }
0x15c5   : > { %5706 = vmatmul.mubr.msk.f32.vlgmr.msra.gmra.mxu0 %vm331_vm3, %v6690_v22  ;;  %5708 = vmatprep.subr.mxu0 %v5988_v1 }
0x15c6   : > { %5710 = vmatprep.mubr.msk.f32.mxu0 %vm5989_vm2, %v5988_v1 }
0x1675   : > { %v2634_v28 = vpop.f32.mrf.mxu0 }
0x1676   : > { %v2635_v0 = vadd.f32 %v6753_v32, %v2634_v28 }
0x1677   : > { %v5685_v29 = vpop.f32.mrf.mxu0 }
0x167d   : > { %v2713_v31 = vpop.f32.mrf.mxu0 }
0x167e   : > { %v2714_v33 = vadd.f32 %v6748_v30, %v2713_v31 }
0x167f   : > { %v5696_v34 = vpop.f32.mrf.mxu0 }
0x1680   : > { %5709 = vmatpush3.xpose.msk.msra.mxu0 %vm563_vm4, %v2714_v33 }
0x1681   : > { %5718 = vmatprep.subr.mxu0 %v5988_v1 }
0x1683   : > { %5711 = vmatmul.mubr.msk.f32.vlgmr.msra.gmra.mxu0 %vm563_vm4, %v2635_v0 }
0x1684   : > { %5726 = vmatprep.mubr.msk.f32.mxu0 %vm5989_vm2, %v5988_v1  ;;  %5719 = vmatpush3.msra.mxu0 %v2971_v44 }
0x1685   : > { %v2792_v36 = vpop.f32.mrf.mxu0  ;;  %5720 = vmatprep.subr.mxu0 %v5988_v1 }
0x1686   : > { %v2793_v37 = vadd.f32 %v6763_v35, %v2792_v36  ;;  %5721 = vmatpush3.msra.mxu0 %v2969_v46 }
0x1687   : > { %v5707_v38 = vpop.f32.mrf.mxu0  ;;  %5722 = vmatprep.subr.mxu0 %v5988_v1 }
0x1688   : > { %5714 = vmatpush3.msk.msra.mxu1 %vm656_vm5, %v2793_v37  ;;  %v3393_v38 = vld [vmem:[%s7191_s1 + $0x268] sm:$0xff] }
0x1689   : > { %5729 = vmatprep.subr.mxu1 %v5988_v1 }
0x1743   : > { %v2868_v39 = vpop.f32.mrf.mxu0 }
0x1744   : > { %v2872_v40 = vsel %vm640_vm6, %v2868_v39, -inf }
0x1745   : > { %2873 = vmax.xlane.f32.xlu0 %v2872_v40  ;;  %v5712_v41 = vpop.f32.mrf.mxu0 }
0x175b   : > { %3056 = vrot.lane.b32.xlu0 %v6701_v23, %s5990_s5 }
0x175f   : > { %3150 = vrot.lane.b32.xlu0 %v6710_v24, %s5990_s5 }
0x1763   : > { %3146 = vrot.lane.b32.xlu0 %v6728_v26, %s5990_s5 }
0x17ce   : > { %v2874_v18 = vpop.xlane.xlu0 %2873 }
0x17cf   : > { %v2875_v47 = vsub.f32 %v2868_v39, %v2874_v18 }
0x17d1   : > { %v2876_v48 = vmul.f32 1.442695, %v2875_v47 }
0x17d2   : > { %v3057_v57 = vpop.permute.xlu0 %3056 }
0x17d3   : > { %5956 = vpow2.f32 %v2876_v48 }
0x17d6   : > { %v3151_v61 = vpop.permute.xlu0 %3150 }
0x17da   : > { %v3147_v45 = vpop.permute.xlu0 %3146 }
0x17e0   : > { %v5957_v49 = vpop.eup %5956 }
0x17e1   : > { %v2878_v50 = vsel %vm640_vm6, %v5957_v49, 0.0 }
0x17e2   : > { %2879 = vadd.xlane.f32.xlu1 %v2878_v50 }
0x17f3   : > { %2966 = vrot.lane.b32.xlu1 %v6648_v12, %s5990_s5 }
0x17f7   : > { %2964 = vrot.lane.b32.xlu1 %v6655_v6, %s5990_s5 }
0x17fb   : > { %3067 = vrot.lane.b32.xlu1 %v6748_v30, %s5990_s5 }
0x17ff   : > { %2977 = vrot.lane.b32.xlu1 %v6753_v32, %s5990_s5 }
0x1803   : > { %3148 = vrot.lane.b32.xlu1 %v6719_v25, %s5990_s5 }
0x1807   : > { %3144 = vrot.lane.b32.xlu1 %v6735_v27, %s5990_s5 }
0x186b   : > { %v2880_v56 = vpop.xlane.xlu1 %2879 }
0x186c   : > { %5958 = vrcp.f32 %v2880_v56 }
0x186f   : > { %v2967_v58 = vpop.permute.xlu1 %2966 }
0x1870   : > { %5723 = vmatpush3.msra.mxu0 %v2967_v58 }
0x1871   : > { %5724 = vmatprep.subr.mxu0 %v5988_v1 }
0x1873   : > { %v2965_v59 = vpop.permute.xlu1 %2964 }
0x1874   : > { %5725 = vmatpush3.msra.mxu0 %v2965_v59 }
0x1875   : > { %5727 = vmatmul.mubr.msk.f32.vlgmr.msra.gmra.mxu0 %vm331_vm3, %v6690_v22  ;;  %5740 = vmatprep.subr.mxu0 %v5988_v1 }
0x1876   : > { %5741 = vmatpush3.msra.mxu0 %v3151_v61  ;;  %5748 = vmatprep.mubr.msk.f32.mxu0 %vm5989_vm2, %v5988_v1 }
0x1877   : > { %v3068_v2 = vpop.permute.xlu1 %3067  ;;  %5742 = vmatprep.subr.mxu0 %v5988_v1 }
0x1879   : > { %v5959_v3 = vpop.eup %5958 }
0x187a   : > { %v2882_v62 = vmul.f32 %v5959_v3, %v5957_v49 }
0x187b   : > { %v2978_v4 = vpop.permute.xlu1 %2977 }
0x187c   : > { %5716 = vmatmul.mubr.msk.f32.vlgmr.msra.gmra.mxu1 %vm652_vm7, %v2882_v62 }
0x187d   : > { %5730 = vmatpush3.msra.mxu1 %v3061_v42  ;;  %5737 = vmatprep.mubr.msk.f32.mxu1 %vm5989_vm2, %v5988_v1 }
0x187e   : > { %5731 = vmatprep.subr.mxu1 %v5988_v1 }
0x187f   : > { %5732 = vmatpush3.msra.mxu1 %v3059_v43  ;;  %v3149_v63 = vpop.permute.xlu1 %3148  ;;  %v2959_v43 = vld [vmem:[%s7191_s1 + $0x260] sm:$0xff] }
0x1880   : > { %5733 = vmatprep.subr.mxu1 %v5988_v1  ;;  %5743 = vmatpush3.msra.mxu0 %v3149_v63 }
0x1881   : > { %5734 = vmatpush3.msra.mxu1 %v3057_v57  ;;  %5744 = vmatprep.subr.mxu0 %v5988_v1 }
0x1882   : > { %5735 = vmatprep.subr.mxu1 %v5988_v1  ;;  %5745 = vmatpush3.msra.mxu0 %v3147_v45 }
0x1883   : > { %5736 = vmatpush3.msra.mxu1 %v3055_v51  ;;  %v3145_v52 = vpop.permute.xlu1 %3144  ;;  %5746 = vmatprep.subr.mxu0 %v5988_v1 }
0x1884   : > { %5738 = vmatmul.mubr.msk.f32.vlgmr.msra.gmra.mxu1 %vm331_vm3, %v6690_v22  ;;  %5747 = vmatpush3.msra.mxu0 %v3145_v52 }
0x1885   : > { %5749 = vmatmul.mubr.msk.f32.vlgmr.msra.gmra.mxu0 %vm331_vm3, %v6690_v22  ;;  %5751 = vmatprep.subr.mxu1 %v5988_v1 }
0x1886   : > { %5753 = vmatprep.mubr.msk.f32.mxu1 %vm5989_vm2, %v5988_v1  ;;  %5761 = vmatprep.subr.mxu0 %v5988_v1 }
0x1887   : > { %5763 = vmatprep.mubr.msk.f32.mxu0 %vm5989_vm2, %v5988_v1  ;;  %5762 = vmatpush3.msra.mxu0 %v3393_v38 }
0x1888   : > { %5771 = vmatprep.subr.mxu0 %v5988_v1 }
0x1935   : > { %v3046_v53 = vpop.f32.mrf.mxu0 }
0x1936   : > { %v3047_v19 = vadd.f32 %v3046_v53, %v2978_v4 }
0x1937   : > { %v5728_v5 = vpop.f32.mrf.mxu0 }
0x193c   : > { %v2955_v54 = vpop.f32.mrf.mxu1 }
0x193e   : > { %v5717_v7 = vpop.f32.mrf.mxu1 }
0x1944   : > { %v3136_v13 = vpop.f32.mrf.mxu1 }
0x1945   : > { %v3137_v15 = vadd.f32 %v3136_v13, %v3068_v2  ;;  %v3226_v8 = vpop.f32.mrf.mxu0 }
0x1946   : > { %v5739_v16 = vpop.f32.mrf.mxu1 }
0x1947   : > { %5752 = vmatpush3.xpose.msk.msra.mxu1 %vm563_vm4, %v3137_v15  ;;  %v5750_v17 = vpop.f32.mrf.mxu0 }
0x1948   : > { %5756 = vmatprep.subr.mxu1 %v5988_v1 }
0x194a   : > { %5754 = vmatmul.mubr.msk.f32.vlgmr.msra.gmra.mxu1 %vm563_vm4, %v3047_v19 }
0x194b   : > { %5758 = vmatprep.mubr.msk.f32.mxu1 %vm5989_vm2, %v5988_v1 }
0x1a0a   : > { %v3302_v20 = vpop.f32.mrf.mxu1 }
0x1a0b   : > { %v3306_v21 = vsel %vm640_vm6, %v3302_v20, -inf }
0x1a0c   : > { %3307 = vmax.xlane.f32.xlu0 %v3306_v21  ;;  %v5755_v28 = vpop.f32.mrf.mxu1 }
0x1a22   : > { %3157 = vrot.lane.b32.xlu0 %v6763_v35, %s5990_s5 }
0x1a26   : > { %3629 = vrot.lane.b32.xlu0 %v6669_v10, %s5991_s6 }
0x1a2a   : > { %3627 = vrot.lane.b32.xlu0 %v6701_v23, %s5991_s6 }
0x1a2e   : > { %3625 = vrot.lane.b32.xlu0 %v6680_v11, %s5991_s6 }
0x1a32   : > { %3540 = vrot.lane.b32.xlu0 %v6655_v6, %s5991_s6 }
0x1a36   : > { %3552 = vrot.lane.b32.xlu0 %v6753_v32, %s5991_s6 }
0x1a3a   : > { %3714 = vrot.lane.b32.xlu0 %v6719_v25, %s5991_s6 }
0x1a3e   : > { %3710 = vrot.lane.b32.xlu0 %v6735_v27, %s5991_s6 }
0x1a95   : > { %v3308_v29 = vpop.xlane.xlu0 %3307 }
0x1a96   : > { %v3309_v31 = vsub.f32 %v3302_v20, %v3308_v29 }
0x1a98   : > { %v3310_v33 = vmul.f32 1.442695, %v3309_v31 }
0x1a99   : > { %v3158_v34 = vpop.permute.xlu0 %3157 }
0x1a9a   : > { %5960 = vpow2.f32 %v3310_v33  ;;  %v3227_v0 = vadd.f32 %v3226_v8, %v3158_v34 }
0x1a9c   : > { %5757 = vmatpush3.msk.msra.mxu1 %vm656_vm5, %v3227_v0 }
0x1a9d   : > { %5766 = vmatprep.subr.mxu1 %v5988_v1  ;;  %v3630_v40 = vpop.permute.xlu0 %3629 }
0x1aa1   : > { %v3628_v46 = vpop.permute.xlu0 %3627 }
0x1aa5   : > { %v3626_v18 = vpop.permute.xlu0 %3625 }
0x1aa7   : > { %v5961_v36 = vpop.eup %5960 }
0x1aa8   : > { %v3312_v37 = vsel %vm640_vm6, %v5961_v36, 0.0 }
0x1aa9   : > { %3313 = vadd.xlane.f32.xlu1 %v3312_v37  ;;  %v3541_v50 = vpop.permute.xlu0 %3540 }
0x1aad   : > { %v3553_v57 = vpop.permute.xlu0 %3552 }
0x1ab1   : > { %v3715_v3 = vpop.permute.xlu0 %3714 }
0x1ab5   : > { %v3711_v45 = vpop.permute.xlu0 %3710 }
0x1aba   : > { %3631 = vrot.lane.b32.xlu1 %v6662_v14, %s5991_s6 }
0x1abe   : > { %3546 = vrot.lane.b32.xlu1 %v6634_v9, %s5991_s6 }
0x1ac2   : > { %3544 = vrot.lane.b32.xlu1 %v6641_v60, %s5991_s6 }
0x1ac6   : > { %3542 = vrot.lane.b32.xlu1 %v6648_v12, %s5991_s6 }
0x1aca   : > { %3637 = vrot.lane.b32.xlu1 %v6748_v30, %s5991_s6 }
0x1ace   : > { %3716 = vrot.lane.b32.xlu1 %v6710_v24, %s5991_s6 }
0x1ad2   : > { %3712 = vrot.lane.b32.xlu1 %v6728_v26, %s5991_s6 }
0x1b32   : > { %v3314_v39 = vpop.xlane.xlu1 %3313 }
0x1b33   : > { %5962 = vrcp.f32 %v3314_v39 }
0x1b36   : > { %v3632_v44 = vpop.permute.xlu1 %3631 }
0x1b3a   : > { %v3547_v47 = vpop.permute.xlu1 %3546 }
0x1b3e   : > { %v3545_v48 = vpop.permute.xlu1 %3544 }
0x1b40   : > { %v5963_v41 = vpop.eup %5962 }
0x1b41   : > { %v3316_v42 = vmul.f32 %v5963_v41, %v5961_v36 }
0x1b42   : > { %v3543_v49 = vpop.permute.xlu1 %3542 }
0x1b43   : > { %5759 = vmatmul.mubr.msk.f32.vlgmr.msra.gmra.mxu1 %vm652_vm7, %v3316_v42 }
0x1b44   : > { %5767 = vmatpush3.msra.mxu1 %v2959_v43  ;;  %5768 = vmatprep.mubr.msk.f32.mxu1 %vm5989_vm2, %v5988_v1 }
0x1b45   : > { %5782 = vmatprep.subr.mxu1 %v5988_v1 }
0x1b46   : > { %v3638_v51 = vpop.permute.xlu1 %3637 }
0x1b47   : > { %5769 = vmatmul.mubr.msk.f32.vlgmr.msra.gmra.mxu1 %vm563_vm4, %v2955_v54 }
0x1b48   : > { %5783 = vmatpush3.msra.mxu1 %v3632_v44  ;;  %5790 = vmatprep.mubr.msk.f32.mxu1 %vm5989_vm2, %v5988_v1 }
0x1b49   : > { %5784 = vmatprep.subr.mxu1 %v5988_v1 }
0x1b4a   : > { %5785 = vmatpush3.msra.mxu1 %v3630_v40  ;;  %v3717_v61 = vpop.permute.xlu1 %3716 }
0x1b4b   : > { %5786 = vmatprep.subr.mxu1 %v5988_v1 }
0x1b4c   : > { %5787 = vmatpush3.msra.mxu1 %v3628_v46 }
0x1b4d   : > { %5788 = vmatprep.subr.mxu1 %v5988_v1 }
0x1b4e   : > { %5789 = vmatpush3.msra.mxu1 %v3626_v18  ;;  %v3713_v62 = vpop.permute.xlu1 %3712 }
0x1b4f   : > { %5791 = vmatmul.mubr.msk.f32.vlgmr.msra.gmra.mxu1 %vm331_vm3, %v6690_v22  ;;  %5804 = vmatprep.subr.mxu1 %v5988_v1 }
0x1b50   : > { %5806 = vmatprep.mubr.msk.f32.mxu1 %vm5989_vm2, %v5988_v1 }
0x1c03   : > { %v3389_v56 = vpop.f32.mrf.mxu1 }
0x1c04   : > { %5764 = vmatmul.mubr.msk.f32.vlgmr.msra.gmra.mxu0 %vm563_vm4, %v3389_v56 }
0x1c05   : > { %5772 = vmatpush3.msra.mxu0 %v3547_v47  ;;  %v5760_v58 = vpop.f32.mrf.mxu1  ;;  %5779 = vmatprep.mubr.msk.f32.mxu0 %vm5989_vm2, %v5988_v1 }
0x1c06   : > { %5773 = vmatprep.subr.mxu0 %v5988_v1 }
0x1c07   : > { %5774 = vmatpush3.msra.mxu0 %v3545_v48  ;;  %v6882_v59 = vpop.f32.mrf.mxu1 }
0x1c08   : > { %5775 = vmatprep.subr.mxu0 %v5988_v1 }
0x1c09   : > { %5776 = vmatpush3.msra.mxu0 %v3543_v49  ;;  %v5770_v2 = vpop.f32.mrf.mxu1 }
0x1c0a   : > { %5777 = vmatprep.subr.mxu0 %v5988_v1 }
0x1c0b   : > { %5778 = vmatpush3.msra.mxu0 %v3541_v50 }
0x1c0c   : > { %5780 = vmatmul.mubr.msk.f32.vlgmr.msra.gmra.mxu0 %vm331_vm3, %v6690_v22  ;;  %5793 = vmatprep.subr.mxu0 %v5988_v1 }
0x1c0d   : > { %5794 = vmatpush3.msra.mxu0 %v3717_v61  ;;  %5801 = vmatprep.mubr.msk.f32.mxu0 %vm5989_vm2, %v5988_v1 }
0x1c0e   : > { %5795 = vmatprep.subr.mxu0 %v5988_v1 }
0x1c0f   : > { %v3706_v4 = vpop.f32.mrf.mxu1  ;;  %5796 = vmatpush3.msra.mxu0 %v3715_v3 }
0x1c10   : > { %v3707_v63 = vadd.f32 %v3706_v4, %v3638_v51  ;;  %5797 = vmatprep.subr.mxu0 %v5988_v1 }
0x1c11   : > { %v5792_v52 = vpop.f32.mrf.mxu1  ;;  %5798 = vmatpush3.msra.mxu0 %v3713_v62 }
0x1c12   : > { %5799 = vmatprep.subr.mxu0 %v5988_v1  ;;  %5805 = vmatpush3.xpose.msk.msra.mxu1 %vm563_vm4, %v3707_v63 }
0x1c13   : > { %5800 = vmatpush3.msra.mxu0 %v3711_v45  ;;  %5809 = vmatprep.subr.mxu1 %v5988_v1  ;;  %v4451_v45 = vld [vmem:[%s7191_s1 + $0x278] sm:$0xff] }
0x1c14   : > { %5802 = vmatmul.mubr.msk.f32.vlgmr.msra.gmra.mxu0 %vm331_vm3, %v6690_v22  ;;  %5814 = vmatprep.subr.mxu0 %v5988_v1 }
0x1c15   : > { %5816 = vmatprep.mubr.msk.f32.mxu0 %vm5989_vm2, %v5988_v1 }
0x1cc4   : > { %v6901_v53 = vpop.f32.mrf.mxu0 }
0x1cc5   : > { %v3537_v46 = vadd.f32 %v6882_v59, %v6901_v53 }
0x1cc6   : > { %v5765_v5 = vpop.f32.mrf.mxu0 }
0x1ccc   : > { %v3621_v54 = vpop.f32.mrf.mxu0 }
0x1ccd   : > { %v3622_v7 = vadd.f32 %v3621_v54, %v3553_v57 }
0x1cce   : > { %v5781_v13 = vpop.f32.mrf.mxu0 }
0x1ccf   : > { %5807 = vmatmul.mubr.msk.f32.vlgmr.msra.gmra.mxu1 %vm563_vm4, %v3622_v7 }
0x1cd0   : > { %5811 = vmatprep.mubr.msk.f32.mxu1 %vm5989_vm2, %v5988_v1 }
0x1cd4   : > { %v3791_v15 = vpop.f32.mrf.mxu0 }
0x1cd6   : > { %v5803_v8 = vpop.f32.mrf.mxu0 }
0x1d8f   : > { %v3867_v16 = vpop.f32.mrf.mxu1 }
0x1d90   : > { %v3871_v17 = vsel %vm640_vm6, %v3867_v16, -inf }
0x1d91   : > { %3872 = vmax.xlane.f32.xlu1 %v3871_v17  ;;  %v5808_v19 = vpop.f32.mrf.mxu1 }
0x1da2   : > { %4124 = vrot.lane.b32.xlu1 %v6662_v14, %s5992_s11 }
0x1da6   : > { %4122 = vrot.lane.b32.xlu1 %v6669_v10, %s5992_s11 }
0x1daa   : > { %4120 = vrot.lane.b32.xlu1 %v6701_v23, %s5992_s11 }
0x1dae   : > { %4118 = vrot.lane.b32.xlu1 %v6680_v11, %s5992_s11 }
0x1db2   : > { %4033 = vrot.lane.b32.xlu1 %v6655_v6, %s5992_s11  ;;  %v3958_v6 = vld [vmem:[%s7191_s1 + $0x270] sm:$0xff] }
0x1db3   : > { %5815 = vmatpush3.msra.mxu0 %v3958_v6  ;;  %v4561_v6 = vld [vmem:[%s7191_s1 + $0x298] sm:$0xff] }
0x1db4   : > { %5830 = vmatprep.subr.mxu0 %v5988_v1 }
0x1db6   : > { %4045 = vrot.lane.b32.xlu1 %v6753_v32, %s5992_s11 }
0x1dba   : > { %4207 = vrot.lane.b32.xlu1 %v6719_v25, %s5992_s11 }
0x1dbe   : > { %4203 = vrot.lane.b32.xlu1 %v6735_v27, %s5992_s11 }
0x1e1a   : > { %v3873_v14 = vpop.xlane.xlu1 %3872 }
0x1e1b   : > { %v3874_v10 = vsub.f32 %v3867_v16, %v3873_v14 }
0x1e1d   : > { %v3875_v20 = vmul.f32 1.442695, %v3874_v10 }
0x1e1f   : > { %5964 = vpow2.f32 %v3875_v20 }
0x1e2c   : > { %v5965_v23 = vpop.eup %5964 }
0x1e2d   : > { %v3877_v21 = vsel %vm640_vm6, %v5965_v23, 0.0 }
0x1e2e   : > { %3878 = vadd.xlane.f32.xlu0 %v3877_v21 }
0x1e44   : > { %3722 = vrot.lane.b32.xlu0 %v6763_v35, %s5991_s6 }
0x1e48   : > { %4039 = vrot.lane.b32.xlu0 %v6634_v9, %s5992_s11  ;;  %v4125_v9 = vpop.permute.xlu1 %4124 }
0x1e4c   : > { %4037 = vrot.lane.b32.xlu0 %v6641_v60, %s5992_s11  ;;  %v4123_v60 = vpop.permute.xlu1 %4122 }
0x1e50   : > { %4035 = vrot.lane.b32.xlu0 %v6648_v12, %s5992_s11  ;;  %v4121_v11 = vpop.permute.xlu1 %4120 }
0x1e54   : > { %4130 = vrot.lane.b32.xlu0 %v6748_v30, %s5992_s11  ;;  %v4119_v30 = vpop.permute.xlu1 %4118 }
0x1e58   : > { %4209 = vrot.lane.b32.xlu0 %v6710_v24, %s5992_s11  ;;  %v4034_v32 = vpop.permute.xlu1 %4033 }
0x1e5c   : > { %4205 = vrot.lane.b32.xlu0 %v6728_v26, %s5992_s11  ;;  %v4046_v26 = vpop.permute.xlu1 %4045 }
0x1e60   : > { %v4208_v0 = vpop.permute.xlu1 %4207 }
0x1e64   : > { %v4204_v38 = vpop.permute.xlu1 %4203 }
0x1eb7   : > { %v3879_v12 = vpop.xlane.xlu0 %3878 }
0x1eb8   : > { %5966 = vrcp.f32 %v3879_v12 }
0x1ebb   : > { %v3723_v25 = vpop.permute.xlu0 %3722 }
0x1ebc   : > { %v3792_v27 = vadd.f32 %v3791_v15, %v3723_v25  ;;  %v5213_v15 = vld [vmem:[%s7191_s1 + $0x325] ss:$0 sm:$0xff] }
0x1ebe   : > { %5810 = vmatpush3.msk.msra.mxu1 %vm656_vm5, %v3792_v27 }
0x1ebf   : > { %v4040_v24 = vpop.permute.xlu0 %4039  ;;  %5819 = vmatprep.subr.mxu1 %v5988_v1 }
0x1ec3   : > { %v4038_v28 = vpop.permute.xlu0 %4037 }
0x1ec5   : > { %v5967_v29 = vpop.eup %5966 }
0x1ec6   : > { %v3881_v31 = vmul.f32 %v5967_v29, %v5965_v23 }
0x1ec7   : > { %v4036_v33 = vpop.permute.xlu0 %4035 }
0x1ec8   : > { %5812 = vmatmul.mubr.msk.f32.vlgmr.msra.gmra.mxu1 %vm652_vm7, %v3881_v31  ;;  %v4682_v31 = vld [vmem:[%s7191_s1 + $0x318] sm:$0xff] }
0x1ec9   : > { %5820 = vmatpush3.msra.mxu1 %v4040_v24  ;;  %5827 = vmatprep.mubr.msk.f32.mxu1 %vm5989_vm2, %v5988_v1 }
0x1eca   : > { %5821 = vmatprep.subr.mxu1 %v5988_v1 }
0x1ecb   : > { %5822 = vmatpush3.msra.mxu1 %v4038_v28  ;;  %v4131_v34 = vpop.permute.xlu0 %4130 }
0x1ecc   : > { %5823 = vmatprep.subr.mxu1 %v5988_v1 }
0x1ecd   : > { %5824 = vmatpush3.msra.mxu1 %v4036_v33  ;;  %v4681_v33 = vld [vmem:[%s7191_s1 + $0x310] sm:$0xff] }
0x1ece   : > { %5825 = vmatprep.subr.mxu1 %v5988_v1 }
0x1ecf   : > { %5826 = vmatpush3.msra.mxu1 %v4034_v32  ;;  %v4210_v36 = vpop.permute.xlu0 %4209  ;;  %v5215_v32 = vld [vmem:[%s7191_s1 + $0x327] ss:$0 sm:$0xff] }
0x1ed0   : > { %5828 = vmatmul.mubr.msk.f32.vlgmr.msra.gmra.mxu1 %vm331_vm3, %v6690_v22  ;;  %5841 = vmatprep.subr.mxu1 %v5988_v1 }
0x1ed1   : > { %5842 = vmatpush3.msra.mxu1 %v4210_v36  ;;  %5849 = vmatprep.mubr.msk.f32.mxu1 %vm5989_vm2, %v5988_v1  ;;  %v4677_v36 = vld [vmem:[%s7191_s1 + $0x2f0] sm:$0xff] }
0x1ed2   : > { %5843 = vmatprep.subr.mxu1 %v5988_v1 }
0x1ed3   : > { %5844 = vmatpush3.msra.mxu1 %v4208_v0  ;;  %v4206_v37 = vpop.permute.xlu0 %4205  ;;  %v4678_v0 = vld [vmem:[%s7191_s1 + $0x2f8] sm:$0xff] }
0x1ed4   : > { %5845 = vmatprep.subr.mxu1 %v5988_v1 }
0x1ed5   : > { %5846 = vmatpush3.msra.mxu1 %v4206_v37  ;;  %v4676_v37 = vld [vmem:[%s7191_s1 + $0x2e8] sm:$0xff] }
0x1ed6   : > { %5847 = vmatprep.subr.mxu1 %v5988_v1 }
0x1ed7   : > { %5848 = vmatpush3.msra.mxu1 %v4204_v38  ;;  %v4675_v38 = vld [vmem:[%s7191_s1 + $0x2e0] sm:$0xff] }
0x1ed8   : > { %5850 = vmatmul.mubr.msk.f32.vlgmr.msra.gmra.mxu1 %vm331_vm3, %v6690_v22  ;;  %5862 = vmatprep.subr.mxu1 %v5988_v1 }
0x1ed9   : > { %5864 = vmatprep.mubr.msk.f32.mxu1 %vm5989_vm2, %v5988_v1  ;;  %5863 = vmatpush3.msra.mxu1 %v4451_v45 }
0x1eda   : > { %5878 = vmatprep.subr.mxu1 %v5988_v1 }
0x1f88   : > { %v3954_v39 = vpop.f32.mrf.mxu1 }
0x1f89   : > { %5817 = vmatmul.mubr.msk.f32.vlgmr.msra.gmra.mxu0 %vm563_vm4, %v3954_v39  ;;  %v4674_v39 = vld [vmem:[%s7191_s1 + $0x2d8] sm:$0xff] }
0x1f8a   : > { %5831 = vmatpush3.msra.mxu0 %v4125_v9  ;;  %v5813_v40 = vpop.f32.mrf.mxu1  ;;  %5838 = vmatprep.mubr.msk.f32.mxu0 %vm5989_vm2, %v5988_v1  ;;  %v4559_v9 = vld [vmem:[%s7191_s1 + $0x288] sm:$0xff] }
0x1f8b   : > { %5832 = vmatprep.subr.mxu0 %v5988_v1  ;;  %v4673_v40 = vld [vmem:[%s7191_s1 + $0x2d0] sm:$0xff] }
0x1f8c   : > { %5833 = vmatpush3.msra.mxu0 %v4123_v60  ;;  %v4558_v60 = vld [vmem:[%s7191_s1 + $0x280] sm:$0xff] }
0x1f8d   : > { %5834 = vmatprep.subr.mxu0 %v5988_v1 }
0x1f8e   : > { %5835 = vmatpush3.msra.mxu0 %v4121_v11 }
0x1f8f   : > { %5836 = vmatprep.subr.mxu0 %v5988_v1 }
0x1f90   : > { %v4114_v41 = vpop.f32.mrf.mxu1  ;;  %5837 = vmatpush3.msra.mxu0 %v4119_v30  ;;  %v5214_v30 = vld [vmem:[%s7191_s1 + $0x326] ss:$0 sm:$0xff] }
0x1f91   : > { %5839 = vmatmul.mubr.msk.f32.vlgmr.msra.gmra.mxu0 %vm331_vm3, %v6690_v22  ;;  %5852 = vmatprep.subr.mxu0 %v5988_v1  ;;  %v4115_v22 = vadd.f32 %v4114_v41, %v4046_v26  ;;  %v4680_v26 = vld [vmem:[%s7191_s1 + $0x308] sm:$0xff] }
0x1f92   : > { %v5829_v42 = vpop.f32.mrf.mxu1  ;;  %5854 = vmatprep.mubr.msk.f32.mxu0 %vm5989_vm2, %v5988_v1  ;;  %v4672_v41 = vld [vmem:[%s7191_s1 + $0x2c8] sm:$0xff] }
0x1f93   : > { %v4671_v42 = vld [vmem:[%s7191_s1 + $0x2c0] sm:$0xff] }
0x1f98   : > { %v4284_v43 = vpop.f32.mrf.mxu1 }
0x1f9a   : > { %v5851_v44 = vpop.f32.mrf.mxu1 }
0x1f9b   : > { %v4669_v44 = vld [vmem:[%s7191_s1 + $0x2b0] sm:$0xff] }
0x2049   : > { %v4028_v18 = vpop.f32.mrf.mxu0 }
0x204a   : > { %v4032_v47 = vadd.f32 %v4028_v18, %v3537_v46  ;;  %v4668_v46 = vld [vmem:[%s7191_s1 + $0x2a8] sm:$0xff]  ;;  %v4667_v18 = vld [vmem:[%s7191_s1 + $0x2a0] sm:$0xff] }
0x204b   : > { %v5818_v48 = vpop.f32.mrf.mxu0 }
0x2051   : > { %v4199_v49 = vpop.f32.mrf.mxu0 }
0x2052   : > { %v4200_v50 = vadd.f32 %v4199_v49, %v4131_v34  ;;  %v4679_v34 = vld [vmem:[%s7191_s1 + $0x300] sm:$0xff] }
0x2053   : > { %v5840_v51 = vpop.f32.mrf.mxu0 }
0x2054   : > { %5853 = vmatpush3.xpose.msk.msra.mxu0 %vm563_vm4, %v4200_v50 }
0x2055   : > { %5857 = vmatprep.subr.mxu0 %v5988_v1 }
0x2057   : > { %5855 = vmatmul.mubr.msk.f32.vlgmr.msra.gmra.mxu0 %vm563_vm4, %v4115_v22 }
0x2058   : > { %5859 = vmatprep.mubr.msk.f32.mxu0 %vm5989_vm2, %v5988_v1 }
0x2117   : > { %v4360_v56 = vpop.f32.mrf.mxu0 }
0x2118   : > { %v4364_v57 = vsel %vm640_vm6, %v4360_v56, -inf }
0x2119   : > { %4365 = vmax.xlane.f32.xlu0 %v4364_v57  ;;  %v5856_v58 = vpop.f32.mrf.mxu0 }
0x212f   : > { %4215 = vrot.lane.b32.xlu0 %v6763_v35, %s5992_s11 }
0x21a2   : > { %v4366_v59 = vpop.xlane.xlu0 %4365 }
0x21a3   : > { %v4367_v61 = vsub.f32 %v4360_v56, %v4366_v59 }
0x21a5   : > { %v4368_v2 = vmul.f32 1.442695, %v4367_v61 }
0x21a6   : > { %v4216_v3 = vpop.permute.xlu0 %4215 }
0x21a7   : > { %5968 = vpow2.f32 %v4368_v2  ;;  %v4285_v62 = vadd.f32 %v4284_v43, %v4216_v3  ;;  %v4670_v43 = vld [vmem:[%s7191_s1 + $0x2b8] sm:$0xff] }
0x21a9   : > { %5858 = vmatpush3.msk.msra.mxu0 %vm656_vm5, %v4285_v62 }
0x21aa   : > { %5867 = vmatprep.subr.mxu0 %v5988_v1 }
0x21b4   : > { %v5969_v4 = vpop.eup %5968 }
0x21b5   : > { %v4370_v63 = vsel %vm640_vm6, %v5969_v4, 0.0 }
0x21b6   : > { %4371 = vadd.xlane.f32.xlu1 %v4370_v63 }
0x223f   : > { %v4372_v35 = vpop.xlane.xlu1 %4371 }
0x2240   : > { %5970 = vrcp.f32 %v4372_v35 }
0x224d   : > { %v5971_v52 = vpop.eup %5970 }
0x224e   : > { %v4374_v53 = vmul.f32 %v5971_v52, %v5969_v4 }
0x2250   : > { %5860 = vmatmul.mubr.msk.f32.vlgmr.msra.gmra.mxu0 %vm652_vm7, %v4374_v53 }
0x2251   : > { %5875 = vmatprep.mubr.msk.f32.mxu0 %vm5989_vm2, %v5988_v1  ;;  %5868 = vmatpush3.msra.mxu0 %v4561_v6 }
0x2252   : > { %5869 = vmatprep.subr.mxu0 %v5988_v1 }
0x2310   : > { %v4447_v5 = vpop.f32.mrf.mxu0 }
0x2311   : > { %5865 = vmatmul.mubr.msk.f32.vlgmr.msra.gmra.mxu1 %vm563_vm4, %v4447_v5 }
0x2312   : > { %v5861_v54 = vpop.f32.mrf.mxu0  ;;  %5910 = vmatprep.mubr.msk.f32.mxu1 %vm5989_vm2, %v5988_v1  ;;  %5879 = vmatpush3.msra.mxu1 %v4682_v31  ;;  %v4778_v31 = vld [vmem:[%s7192_s2] sm:$0xff] }
0x2313   : > { %5880 = vmatprep.subr.mxu1 %v5988_v1 }
0x2314   : > { %5881 = vmatpush3.msra.mxu1 %v4681_v33  ;;  %v4799_v33 = vld [vmem:[%s7192_s2 + $0xa8] sm:$0xff] }
0x2315   : > { %5882 = vmatprep.subr.mxu1 %v5988_v1 }
0x2316   : > { %5883 = vmatpush3.msra.mxu1 %v4680_v26 }
0x2317   : > { %5884 = vmatprep.subr.mxu1 %v5988_v1 }
0x2318   : > { %5885 = vmatpush3.msra.mxu1 %v4679_v34 }
0x2319   : > { %5886 = vmatprep.subr.mxu1 %v5988_v1 }
0x231a   : > { %5887 = vmatpush3.msra.mxu1 %v4678_v0 }
0x231b   : > { %5888 = vmatprep.subr.mxu1 %v5988_v1 }
0x231c   : > { %5889 = vmatpush3.msra.mxu1 %v4677_v36 }
0x231d   : > { %5890 = vmatprep.subr.mxu1 %v5988_v1 }
0x231e   : > { %5891 = vmatpush3.msra.mxu1 %v4676_v37  ;;  %v4760_v37 = vld [vmem:[%s7191_s1 + $0xca] sm:$0x1] }
0x231f   : > { %5892 = vmatprep.subr.mxu1 %v5988_v1 }
0x2320   : > { %5893 = vmatpush3.msra.mxu1 %v4675_v38 }
0x2321   : > { %5894 = vmatprep.subr.mxu1 %v5988_v1 }
0x2322   : > { %5895 = vmatpush3.msra.mxu1 %v4674_v39  ;;  %v4761_v39 = vld [vmem:[%s7191_s1 + $0xcb] sm:$0x1] }
0x2323   : > { %5896 = vmatprep.subr.mxu1 %v5988_v1 }
0x2324   : > { %5897 = vmatpush3.msra.mxu1 %v4673_v40 }
0x2325   : > { %5898 = vmatprep.subr.mxu1 %v5988_v1 }
0x2326   : > { %5899 = vmatpush3.msra.mxu1 %v4672_v41 }
0x2327   : > { %5900 = vmatprep.subr.mxu1 %v5988_v1 }
0x2328   : > { %5901 = vmatpush3.msra.mxu1 %v4671_v42  ;;  %v4798_v42 = vld [vmem:[%s7192_s2 + $0xa0] sm:$0xff] }
0x2329   : > { %5902 = vmatprep.subr.mxu1 %v5988_v1 }
0x232a   : > { %5903 = vmatpush3.msra.mxu1 %v4670_v43  ;;  %v4793_v43 = vld [vmem:[%s7192_s2 + $0x78] sm:$0xff] }
0x232b   : > { %5904 = vmatprep.subr.mxu1 %v5988_v1 }
0x232c   : > { %5905 = vmatpush3.msra.mxu1 %v4669_v44  ;;  %v4792_v44 = vld [vmem:[%s7192_s2 + $0x70] sm:$0xff] }
0x232d   : > { %5906 = vmatprep.subr.mxu1 %v5988_v1 }
0x232e   : > { %5907 = vmatpush3.msra.mxu1 %v4668_v46  ;;  %v4787_v46 = vld [vmem:[%s7192_s2 + $0x48] sm:$0xff] }
0x232f   : > { %5908 = vmatprep.subr.mxu1 %v5988_v1 }
0x2330   : > { %5909 = vmatpush3.msra.mxu1 %v4667_v18  ;;  %v4786_v18 = vld [vmem:[%s7192_s2 + $0x40] sm:$0xff] }
0x23d1   : > { %v4521_v7 = vpop.f32.mrf.mxu1 }
0x23d2   : > { %v4525_v13 = vadd.f32 %v4521_v7, %v4032_v47  ;;  %v5216_v47 = vld [vmem:[%s7191_s1 + $0x328] ss:$0 sm:$0xff] }
0x23d3   : > { %v5866_v8 = vpop.f32.mrf.mxu1 }
0x23d4   : > { %v4526_v16 = vadd.f32 %v4525_v13, %v6625_v55  ;;  %v4560_v55 = vld [vmem:[%s7191_s1 + $0x290] sm:$0xff] }
0x23d5   : > { %5870 = vmatpush3.msra.mxu0 %v4560_v55 }
0x23d6   : > { %v7001_v17 = vadd.f32 %v5213_v15, %v4526_v16  ;;  %5871 = vmatprep.subr.mxu0 %v5988_v1 }
0x23d7   : > { %5872 = vmatpush3.msra.mxu0 %v4559_v9 }
0x23d8   : > { %v4535_v19 = vsel %vm272_vm1, %v7001_v17, 0.0  ;;  %5873 = vmatprep.subr.mxu0 %v5988_v1 }
0x23d9   : > { %4536 = vadd.xlane.f32.xlu1 %v4535_v19  ;;  %5874 = vmatpush3.msra.mxu0 %v4558_v60 }
0x2462   : > { %v4537_v14 = vpop.xlane.xlu1 %4536 }
0x2463   : > { %v4538_v10 = vmul.f32 0.03125, %v4537_v14 }
0x2465   : > { %v4539_v20 = vsub.f32 %v7001_v17, %v4538_v10 }
0x2467   : > { %v4540_v23 = vmul.f32 %v4539_v20, %v4539_v20 }
0x2469   : > { %v4541_v21 = vsel %vm272_vm1, %v4540_v23, 0.0 }
0x246a   : > { %4542 = vadd.xlane.f32.xlu1 %v4541_v21 }
0x24f3   : > { %v4543_v11 = vpop.xlane.xlu1 %4542 }
0x24f4   : > { %v4544_v12 = vmul.f32 0.03125, %v4543_v11 }
0x24f6   : > { %v4545_v25 = vadd.f32 1e-05, %v4544_v12 }
0x24f8   : > { %5972 = vrsqrt.f32 %v4545_v25 }
0x2505   : > { %v5973_v27 = vpop.eup %5972 }
0x2506   : > { %v4547_v24 = vmul.f32 %v5973_v27, %v4539_v20  ;;  %v5218_v20 = vld [vmem:[%s7191_s1 + $0x329] ss:$0 sm:$0xff]  ;;  %v4797_v27 = vld [vmem:[%s7192_s2 + $0x98] sm:$0xff] }
0x2507   : > { %4829 = vmatprep.subr.mxu0 %v4797_v27 }
0x2508   : > { %v4552_v28 = vmul.f32 %v5214_v30, %v4547_v24  ;;  %v4791_v30 = vld [vmem:[%s7192_s2 + $0x68] sm:$0xff]  ;;  %v4790_v24 = vld [vmem:[%s7192_s2 + $0x60] sm:$0xff] }
0x250a   : > { %v4557_v29 = vadd.f32 %v5215_v32, %v4552_v28  ;;  %v4785_v32 = vld [vmem:[%s7192_s2 + $0x38] sm:$0xff]  ;;  %v4784_v28 = vld [vmem:[%s7192_s2 + $0x30] sm:$0xff] }
0x250c   : > { %5876 = vmatmul.mubr.msk.f32.vlgmr.msra.gmra.mxu0 %vm331_vm3, %v4557_v29  ;;  %v4779_v29 = vld [vmem:[%s7192_s2 + $0x8] sm:$0xff] }
0x250d   : > { %4869 = vmatprep.mubr.f32.mxu0 %v5988_v1 }
0x25cc   : > { %v4636_v48 = vpop.f32.mrf.mxu0 }
0x25cd   : > { %v4637_v49 = vadd.f32 %v5216_v47, %v4636_v48  ;;  %v4781_v47 = vld [vmem:[%s7192_s2 + $0x18] sm:$0xff]  ;;  %v4780_v48 = vld [vmem:[%s7192_s2 + $0x10] sm:$0xff] }
0x25ce   : > { %v5877_v50 = vpop.f32.mrf.mxu0 }
0x25cf   : > { %v4640_v51 = vmul.f32 0.70710677, %v4637_v49  ;;  %v4664_v16 = vmul.f32 0.5, %v4637_v49  ;;  %v4801_v49 = vld [vmem:[%s7192_s2 + $0xb8] sm:$0xff]  ;;  %v4800_v50 = vld [vmem:[%s7192_s2 + $0xb0] sm:$0xff] }
0x25d1   : > { %v4641_v22 = vand.u32 2147483647, %v4640_v51  ;;  %vm4661_vm9 = vcmp.lt.f32.partialorder %v4640_v51, 0.0  ;;  %v4795_v51 = vld [vmem:[%s7192_s2 + $0x88] sm:$0xff] }
0x25d3   : > { %v4642_v56 = vmul.f32 0.3275911, %v4641_v22  ;;  %v4655_v58 = vsub.f32 0.0, %v4641_v22 }
0x25d5   : > { %v4643_v57 = vadd.f32 1.0, %v4642_v56  ;;  %v4656_v59 = vmul.f32 %v4655_v58, %v4641_v22  ;;  %v4794_v22 = vld [vmem:[%s7192_s2 + $0x80] sm:$0xff]  ;;  %v4789_v56 = vld [vmem:[%s7192_s2 + $0x58] sm:$0xff]  ;;  %v4783_v58 = vld [vmem:[%s7192_s2 + $0x28] sm:$0xff] }
0x25d7   : > { %5974 = vrcp.f32 %v4643_v57  ;;  %v4657_v3 = vmul.f32 1.442695, %v4656_v59  ;;  %v4788_v57 = vld [vmem:[%s7192_s2 + $0x50] sm:$0xff]  ;;  %v4782_v59 = vld [vmem:[%s7192_s2 + $0x20] sm:$0xff] }
0x25d9   : > { %5976 = vpow2.f32 %v4657_v3  ;;  %v5030_v3 = vlaneseq }
0x25db   : > { %vm5067_vm11 = vcmp.lt.s32.totalorder %v5030_v3, 768 }
0x25e4   : > { %v5975_v61 = vpop.eup %5974 }
0x25e5   : > { %v4646_v2 = vmul.f32 1.0614054, %v5975_v61 }
0x25e6   : > { %v5977_v54 = vpop.eup %5976 }
0x25e7   : > { %v4647_v62 = vadd.f32 -1.4531521, %v4646_v2 }
0x25e9   : > { %v4648_v4 = vmul.f32 %v5975_v61, %v4647_v62 }
0x25eb   : > { %v4649_v63 = vadd.f32 1.4214138, %v4648_v4 }
0x25ed   : > { %v4650_v45 = vmul.f32 %v5975_v61, %v4649_v63 }
0x25ef   : > { %v4651_v35 = vadd.f32 -0.28449672, %v4650_v45  ;;  %v5031_v45 = vshrl.u32 %v5030_v3, 7 }
0x25f1   : > { %v4652_v52 = vmul.f32 %v5975_v61, %v4651_v35 }
0x25f3   : > { %v4653_v53 = vadd.f32 0.2548296, %v4652_v52 }
0x25f5   : > { %v4654_v5 = vmul.f32 %v5975_v61, %v4653_v53  ;;  %v5993_v61 = vmov 1966171168  }
0x25f6   : > { %v5028_v2 = vunpack.c.l.s4 %v5993_v61 }
0x25f7   : > { %v4659_v7 = vmul.f32 %v5977_v54, %v4654_v5 }
0x25f8   : > { %v5029_v63 = vunpack.c.0.s8 %v5028_v2 }
0x25f9   : > { %v4660_v13 = vsub.f32 1.0, %v4659_v7 }
0x25fa   : > { %v5032_v5 = vsub.s32 %v5029_v63, %v5031_v45 }
0x25fb   : > { %v4662_v15 = vsub.f32 0.0, %v4660_v13 }
0x25fd   : > { %v4663_v8 = vsel %vm4661_vm9, %v4662_v15, %v4660_v13 }
0x25fe   : > { %v4665_v19 = vadd.f32 1.0, %v4663_v8 }
0x2600   : > { %v4666_v14 = vmul.f32 %v4665_v19, %v4664_v16 }
0x2602   : > { %5911 = vmatmul.mubr.f32.vlgmr.msra.gmra.mxu1 %v4666_v14 }
0x26c2   : > { %v4749_v10 = vpop.f32.mrf.mxu1 }
0x26c3   : > { %v4753_v23 = vadd.f32 %v4749_v10, %v7001_v17  ;;  %v4796_v17 = vld [vmem:[%s7192_s2 + $0x90] sm:$0xff] }
0x26c4   : > { %v5912_v21 = vpop.f32.mrf.mxu1  ;;  %4830 = vmatpush1.msra.mxu0 %v4796_v17 }
0x26c5   : > { %v4759_v6 = vadd.f32 %v5218_v20, %v4753_v23  ;;  %4831 = vmatprep.subr.mxu0 %v4791_v30 }
0x26c6   : > { %4832 = vmatpush1.msra.mxu0 %v4790_v24 }
0x26c7   : > { %v4763_v55 = vsel %vm4762_vm10, %v4759_v6, 0.0  ;;  %4833 = vmatprep.subr.mxu0 %v4785_v32 }
0x26c8   : > { %4764 = vadd.xlane.f32.xlu1 %v4763_v55  ;;  %4834 = vmatpush1.msra.mxu0 %v4784_v28 }
0x26c9   : > { %4835 = vmatprep.subr.mxu0 %v4779_v29 }
0x26ca   : > { %4836 = vmatpush1.msra.mxu0 %v4778_v31 }
0x26cb   : > { %4900 = vmatprep.subr.mxu0 %v4799_v33 }
0x2751   : > { %v4765_v9 = vpop.xlane.xlu1 %4764 }
0x2752   : > { %v4766_v60 = vmul.f32 0.03125, %v4765_v9 }
0x2754   : > { %v4767_v11 = vsub.f32 %v4759_v6, %v4766_v60 }
0x2756   : > { %v4768_v12 = vmul.f32 %v4767_v11, %v4767_v11 }
0x2758   : > { %v4769_v25 = vsel %vm4762_vm10, %v4768_v12, 0.0 }
0x2759   : > { %4770 = vadd.xlane.f32.xlu1 %v4769_v25 }
0x27e2   : > { %v4771_v26 = vpop.xlane.xlu1 %4770 }
0x27e3   : > { %v4772_v34 = vmul.f32 0.03125, %v4771_v26 }
0x27e5   : > { %v4773_v0 = vadd.f32 1e-05, %v4772_v34 }
0x27e7   : > { %5978 = vrsqrt.f32 %v4773_v0 }
0x27f4   : > { %v5979_v36 = vpop.eup %5978 }
0x27f5   : > { %v4775_v38 = vmul.f32 %v5979_v36, %v4767_v11 }
0x27f7   : > { %v4776_v40 = vmul.f32 %v4775_v38, %v4760_v37 }
0x27f9   : > { %v4777_v41 = vadd.f32 %v4776_v40, %v4761_v39 }
0x27fb   : > { %5219 = vmatmul.mubr.msk.f32.vlgmr.msra.gmra.mxu0 %vm331_vm3, %v4777_v41 }
0x27fc   : > { %4901 = vmatpush1.msra.mxu0 %v4798_v42  ;;  %4940 = vmatprep.mubr.f32.mxu0 %v5988_v1 }
0x27fd   : > { %4902 = vmatprep.subr.mxu0 %v4793_v43 }
0x27fe   : > { %4903 = vmatpush1.msra.mxu0 %v4792_v44 }
0x27ff   : > { %4904 = vmatprep.subr.mxu0 %v4787_v46 }
0x2800   : > { %4905 = vmatpush1.msra.mxu0 %v4786_v18 }
0x2801   : > { %4906 = vmatprep.subr.mxu0 %v4781_v47 }
0x2802   : > { %4907 = vmatpush1.msra.mxu0 %v4780_v48 }
0x2803   : > { %5220 = vmatmul.mubr.msk.f32.vlgmr.msra.gmra.mxu0 %vm331_vm3, %v4777_v41  ;;  %4971 = vmatprep.subr.mxu0 %v4801_v49 }
0x2804   : > { %4972 = vmatpush1.msra.mxu0 %v4800_v50  ;;  %5011 = vmatprep.mubr.f32.mxu0 %v5988_v1 }
0x2805   : > { %4973 = vmatprep.subr.mxu0 %v4795_v51 }
0x2806   : > { %4974 = vmatpush1.msra.mxu0 %v4794_v22 }
0x2807   : > { %4975 = vmatprep.subr.mxu0 %v4789_v56 }
0x2808   : > { %4976 = vmatpush1.msra.mxu0 %v4788_v57 }
0x2809   : > { %4977 = vmatprep.subr.mxu0 %v4783_v58 }
0x280a   : > { %4978 = vmatpush1.msra.mxu0 %v4782_v59 }
0x280b   : > { %5221 = vmatmul.mubr.msk.f32.vlgmr.msra.gmra.mxu0 %vm331_vm3, %v4777_v41 }
0x28bb   : > { %v4871_v1 = vpop.f32.mrf.mxu0 }
0x28bd   : > { %v4873_v62 = vpop.f32.mrf.mxu0 }
0x28be   : > { %v5024_v53 = vcombine.low %v4871_v1, %v4873_v62 }
0x28c0   : > { %v5033_v13 = vrot.slane %v5024_v53, %v5032_v5 }
0x28c3   : > { %v4942_v4 = vpop.f32.mrf.mxu0 }
0x28c5   : > { %v4944_v35 = vpop.f32.mrf.mxu0 }
0x28c6   : > { %v5025_v52 = vcombine.low %v4942_v4, %v4944_v35 }
0x28c8   : > { %v5040_v54 = vrot.slane %v5025_v52, %v5032_v5 }
0x28ca   : > { %v5048_v8 = vcombine.low %v5033_v13, %v5040_v54 }
0x28cb   : > { %v5013_v7 = vpop.f32.mrf.mxu0 }
0x28cc   : > { %v5055_v14 = vrot.slane %v5048_v8, %v5032_v5 }
0x28cd   : > { %v5015_v15 = vpop.f32.mrf.mxu0 }
0x28ce   : > { %v5026_v16 = vcombine.low %v5013_v7, %v5015_v15 }
0x28d0   : > { %v5047_v19 = vrot.slane %v5026_v16, %v5032_v5 }
0x28d2   : > { %v5062_v10 = vrot.slane %v5047_v19, %v5032_v5 }
0x28d4   : > { %v5063_v20 = vcombine.low %v5055_v14, %v5062_v10 }
0x28d6   : > { %5069 = vst.msk [vmem:[%s168_s23] sm:$0x3f] %vm5067_vm11, %v5063_v20 }
0x28d7 PF: > { %s13_s12 = sadd.s32 1, %s5986_s12  }
0x28d8   : > { %p10_p4 = scmp.ge.s32.totalorder %s13_s12, 4  }
0x28da   :  { %12 = sbr.rel (!%p10_p4) target bundleno = 1 (0x1), region = 62 }

</bundles_post_ra>
